<compile_context>
chip_gen: v7x
topology: tpu7x:2x2x1
jax: 0.10.0
libtpu: 0.0.40
codegen_flags: <defaults>
</compile_context>

<pallas_src>
import functools
import math

import jax
import jax.numpy as jnp
from jax import lax
from jax.experimental import pallas as pl
from jax.experimental.pallas import tpu as pltpu

_NEG_INF = -1e30  # finite "minus infinity" for additive masks


def _decoder_stack_kernel(
    x_ref, smask_ref, spad_ref, emask_ref, ext_ref,
    sa_wqkv_ref, sa_wo_ref, ea_wq_ref, ea_wkv_ref, ea_wo_ref,
    w1_ref, w2_ref, vecs_ref, b1_ref,
    out_ref, x_carry,
    *, num_heads,
):
    layer = pl.program_id(1)
    num_layers = pl.num_programs(1)

    BT, S, D = x_ref.shape
    Se = ext_ref.shape[1]
    H = num_heads
    hd = D // H
    M = BT * S

    @pl.when(layer == 0)
    def _():
        x_carry[...] = x_ref[...].reshape(M, D)

    x = x_carry[...]                          # (M, D) f32 running activation
    ext = ext_ref[...].reshape(BT * Se, D)    # (BT*Se, D) bf16
    vecs = vecs_ref[0]                        # (16, D) f32 packed biases / LN
    smask = smask_ref[...]                    # (S, S) shared additive mask
    spad = spad_ref[...]                      # (BT, 1, S) additive key padding
    emask = emask_ref[...]                    # (BT, 1, Se) additive src padding

    def row(i):                               # (1, D) slice of packed vectors
        return vecs[i:i + 1, :]

    def layer_norm(v, g, b):
        mu = jnp.mean(v, axis=-1, keepdims=True)
        var = jnp.mean(jnp.square(v - mu), axis=-1, keepdims=True)
        return (v - mu) * lax.rsqrt(var + 1e-5) * g + b

    def gelu(v):
        c = math.sqrt(2.0 / math.pi)
        return 0.5 * v * (1.0 + jnp.tanh(c * (v + 0.044715 * v * v * v)))

    def attend(q, k, v, mask_for_batch):
        # q: (BT*Sq, D) f32 (Q already pre-scaled), k/v: (BT*Sk, D) f32.
        # mask_for_batch(b) -> additive mask broadcastable to (H, Sq, Sk).
        Sq = q.shape[0] // BT
        Sk = k.shape[0] // BT
        q16 = q.astype(jnp.bfloat16)
        k16 = k.astype(jnp.bfloat16)
        v16 = v.astype(jnp.bfloat16)
        ctxs = []
        # Static unroll over the (small) per-tile batch: score matmuls are
        # per-sequence by construction; all heads go through one batched
        # contraction with f32 accumulation on the MXU.
        for b in range(BT):
            qb = q16[b * Sq:(b + 1) * Sq].reshape(Sq, H, hd)
            kb = k16[b * Sk:(b + 1) * Sk].reshape(Sk, H, hd)
            vb = v16[b * Sk:(b + 1) * Sk].reshape(Sk, H, hd)
            s = jnp.einsum("qhd,khd->hqk", qb, kb,
                           preferred_element_type=jnp.float32)
            s = s + mask_for_batch(b)
            m = jnp.maximum(jnp.max(s, axis=-1, keepdims=True), _NEG_INF)
            p = jnp.exp(s - m)
            denom = jnp.sum(p, axis=-1, keepdims=True)
            denom = denom + (denom == 0.0).astype(jnp.float32)  # masked guard
            p = (p * pl.reciprocal(denom, approx=True)).astype(jnp.bfloat16)
            ctx = jnp.einsum("hqk,khd->qhd", p, vb,
                             preferred_element_type=jnp.float32)
            ctxs.append(ctx.reshape(Sq, D))
        return jnp.concatenate(ctxs, axis=0) if BT > 1 else ctxs[0]

    # ---- self-attention (kv=None path: keys/values are x itself) ------------
    qkv = jnp.dot(x.astype(jnp.bfloat16), sa_wqkv_ref[0],
                  preferred_element_type=jnp.float32)          # (M, 3D)
    q = qkv[:, 0:D] + row(0)           # Q weight/bias pre-scaled at init
    k = qkv[:, D:2 * D] + row(1)
    v = qkv[:, 2 * D:3 * D] + row(2)
    a = attend(q, k, v, lambda b: (smask + spad[b])[None, :, :])
    a = jnp.dot(a.astype(jnp.bfloat16), sa_wo_ref[0],
                preferred_element_type=jnp.float32) + row(3)
    x1 = layer_norm(x + a, row(4), row(5))

    # ---- external (cross) attention (with_external=True) --------------------
    q2 = jnp.dot(x1.astype(jnp.bfloat16), ea_wq_ref[0],
                 preferred_element_type=jnp.float32) + row(6)
    kv2 = jnp.dot(ext, ea_wkv_ref[0],
                  preferred_element_type=jnp.float32)          # (BT*Se, 2D)
    k2 = kv2[:, 0:D] + row(7)
    v2 = kv2[:, D:2 * D] + row(8)
    a2 = attend(q2, k2, v2, lambda b: emask[b][None, :, :])
    a2 = jnp.dot(a2.astype(jnp.bfloat16), ea_wo_ref[0],
                 preferred_element_type=jnp.float32) + row(9)
    x2 = layer_norm(x1 + a2, row(10), row(11))

    # ---- position-wise feed-forward ------------------------------------------
    h = jnp.dot(x2.astype(jnp.bfloat16), w1_ref[0],
                preferred_element_type=jnp.float32) + b1_ref[0]
    h = gelu(h)
    f = jnp.dot(h.astype(jnp.bfloat16), w2_ref[0],
                preferred_element_type=jnp.float32) + row(12)
    x3 = layer_norm(x2 + f, row(13), row(14))

    x_carry[...] = x3

    @pl.when(layer == num_layers - 1)
    def _():
        out_ref[...] = x3.reshape(BT, S, D).astype(out_ref.dtype)


def _vmem_limit_bytes():
    """Per-generation VMEM limit: ~56 MiB on v7x (64 MiB), ~112 MiB elsewhere."""
    cap = 128 * 1024 * 1024
    try:
        info = pltpu.get_tpu_info()
        c = getattr(info, "vmem_capacity_bytes", None)
        if c:
            cap = int(c)
    except Exception:
        pass
    return min(cap * 7 // 8, 112 * 1024 * 1024)


def transformer_decoder(x, params, *, num_heads, self_attn_mask=None,
                        self_padding_mask=None, external_states=None,
                        external_padding_mask=None, batch_tiles=1):
    """Stacked Transformer decoder layers (kv=None path, with_external=True).

    `self_attn_mask` is an additive float mask (0 / -inf), matching PyTorch's
    additive attn_mask semantics.  Padding masks are boolean (True = pad).
    """
    B, S, D = x.shape
    assert D % num_heads == 0 and B % batch_tiles == 0
    BT = B // batch_tiles
    ext = external_states
    Se = ext.shape[1]
    L = params["sa_wqkv"].shape[0]
    F = params["w1"].shape[-1]

    x = x.astype(jnp.float32)
    ext = ext.astype(jnp.bfloat16)

    if self_attn_mask is not None:
        smask = jnp.maximum(self_attn_mask.astype(jnp.float32), _NEG_INF)
    else:
        smask = jnp.zeros((S, S), jnp.float32)
    if self_padding_mask is not None:
        spad = jnp.where(self_padding_mask[:, None, :], _NEG_INF,
                         0.0).astype(jnp.float32)
    else:
        spad = jnp.zeros((B, 1, S), jnp.float32)
    if external_padding_mask is not None:
        emask = jnp.where(external_padding_mask[:, None, :], _NEG_INF,
                          0.0).astype(jnp.float32)
    else:
        emask = jnp.zeros((B, 1, Se), jnp.float32)

    kernel = functools.partial(_decoder_stack_kernel, num_heads=num_heads)

    batch_block = lambda shape: pl.BlockSpec(shape, lambda nb, l: (nb, 0, 0))
    layer_block = lambda shape: pl.BlockSpec(shape, lambda nb, l: (l, 0, 0))

    in_specs = [
        batch_block((BT, S, D)),                      # x
        pl.BlockSpec((S, S), lambda nb, l: (0, 0)),   # shared self-attn mask
        batch_block((BT, 1, S)),                      # self padding mask rows
        batch_block((BT, 1, Se)),                     # external padding mask
        batch_block((BT, Se, D)),                     # external states
        layer_block((1, D, 3 * D)),                   # sa_wqkv (Q pre-scaled)
        layer_block((1, D, D)),                       # sa_wo
        layer_block((1, D, D)),                       # ea_wq (pre-scaled)
        layer_block((1, D, 2 * D)),                   # ea_wkv
        layer_block((1, D, D)),                       # ea_wo
        layer_block((1, D, F)),                       # w1
        layer_block((1, F, D)),                       # w2
        layer_block((1, 16, D)),                      # packed biases / LN params
        layer_block((1, 1, F)),                       # b1
    ]

    # Advisory cost estimate (per full forward) for XLA's scheduler.
    M, Me = B * S, B * Se
    mm_flops = 2 * L * (
        M * D * 3 * D + M * D * D            # self QKV + output projection
        + 2 * M * S * D                      # self-attn scores + context
        + M * D * D + Me * D * 2 * D         # cross Q, cross KV
        + M * D * D + 2 * M * Se * D         # cross output proj, scores + ctx
        + 2 * M * D * F)                     # FFN w1 + w2
    transc = L * (B * num_heads * S * (S + Se) + M * F + 3 * M)
    w_bytes = 2 * L * (8 * D * D + 2 * D * F) + 4 * L * (16 * D + F)
    act_bytes = 8 * M * D + 2 * Me * D + 4 * (S * S + B * S + B * Se)
    cost = pl.CostEstimate(flops=int(mm_flops), transcendentals=int(transc),
                           bytes_accessed=int(w_bytes + act_bytes))

    return pl.pallas_call(
        kernel,
        out_shape=jax.ShapeDtypeStruct((B, S, D), jnp.float32),
        grid=(batch_tiles, L),
        in_specs=in_specs,
        out_specs=batch_block((BT, S, D)),
        scratch_shapes=[pltpu.VMEM((BT * S, D), jnp.float32)],
        compiler_params=pltpu.CompilerParams(
            dimension_semantics=("parallel", "arbitrary"),
            vmem_limit_bytes=_vmem_limit_bytes()),
        cost_estimate=cost,
    )(x, smask, spad, emask, ext,
      params["sa_wqkv"], params["sa_wo"], params["ea_wq"], params["ea_wkv"],
      params["ea_wo"], params["w1"], params["w2"], params["vecs"],
      params["b1"])


def init_params(key, num_layers, embedding_size, ffn_size, num_heads):
    """Deterministic synthetic init: normal(0, 0.02) weights, zero biases,
    LayerNorm gamma=1 / beta=0.  Linear weights stored (in, out), stacked over
    layers, Q/K/V (and cross K/V) pre-concatenated along the out dim, all
    (1, D) vectors packed into one (L, 16, D) block.  The 1/sqrt(head_dim)
    attention scale is folded into the Q weights and Q biases here."""
    D, F = embedding_size, ffn_size
    scale = (D // num_heads) ** -0.5
    sa_wqkv, sa_wo, ea_wq, ea_wkv, ea_wo, w1, w2, vecs, b1 = ([] for _ in range(9))
    z = jnp.zeros((D,), jnp.float32)
    o = jnp.ones((D,), jnp.float32)
    for l in range(num_layers):
        lk = jax.random.fold_in(key, l)
        ks = jax.random.split(lk, 10)
        nrm = lambda k, shape: 0.02 * jax.random.normal(k, shape, jnp.float32)
        s_q, s_k, s_v, s_o = (nrm(ks[i], (D, D)) for i in range(4))
        e_q, e_k, e_v, e_o = (nrm(ks[i], (D, D)) for i in range(4, 8))
        sa_wqkv.append(jnp.concatenate([s_q * scale, s_k, s_v], axis=1))
        sa_wo.append(s_o)
        ea_wq.append(e_q * scale)
        ea_wkv.append(jnp.concatenate([e_k, e_v], axis=1))
        ea_wo.append(e_o)
        w1.append(nrm(ks[8], (D, F)))
        w2.append(nrm(ks[9], (F, D)))
        # rows: sa_bq(*scale) sa_bk sa_bv sa_bo ln1_g ln1_b ea_bq(*scale) ea_bk
        #       ea_bv ea_bo ln2_g ln2_b b2 ln3_g ln3_b <pad>
        vecs.append(jnp.stack([z * scale, z, z, z, o, z, z * scale, z, z, z,
                               o, z, z, o, z, z]))
        b1.append(jnp.zeros((1, F), jnp.float32))
    stack = lambda xs, dt: jnp.stack(xs).astype(dt)
    return {
        "sa_wqkv": stack(sa_wqkv, jnp.bfloat16),
        "sa_wo": stack(sa_wo, jnp.bfloat16),
        "ea_wq": stack(ea_wq, jnp.bfloat16),
        "ea_wkv": stack(ea_wkv, jnp.bfloat16),
        "ea_wo": stack(ea_wo, jnp.bfloat16),
        "w1": stack(w1, jnp.bfloat16),
        "w2": stack(w2, jnp.bfloat16),
        "vecs": stack(vecs, jnp.float32),
        "b1": stack(b1, jnp.float32),
    }


if __name__ == "__main__":
    # small shapes consistent with the module's forward
    B, S, S_src = 2, 8, 16
    embedding_size, ffn_size, num_heads, num_layers = 32, 64, 4, 2

    key = jax.random.PRNGKey(0)
    kx, ke, kp = jax.random.split(key, 3)

    x = jax.random.normal(kx, (B, S, embedding_size), jnp.float32)
    external_states = jax.random.normal(ke, (B, S_src, embedding_size),
                                        jnp.float32)

    # causal (diagonal) self-attention mask: additive 0 / -1e30
    causal = jnp.where(jnp.triu(jnp.ones((S, S), dtype=bool), k=1),
                       _NEG_INF, 0.0).astype(jnp.float32)
    # pad out the last two source positions of batch element 1
    external_padding_mask = jnp.zeros((B, S_src),
                                      dtype=bool).at[1, S_src - 2:].set(True)

    params = init_params(kp, num_layers, embedding_size, ffn_size, num_heads)

    out = transformer_decoder(
        x, params, num_heads=num_heads,
        self_attn_mask=causal,
        self_padding_mask=None,
        external_states=external_states,
        external_padding_mask=external_padding_mask,
    )
    jax.block_until_ready(out)
    assert out.shape == (B, S, embedding_size) and out.dtype == jnp.float32
    assert bool(jnp.all(jnp.isfinite(out)))
    print("KERNEL_OK")
</pallas_src>

<mosaic_0001>
module attributes {stable_mosaic.version = 11 : i64} {
  func.func @_decoder_stack_kernel(%arg0: i32, %arg1: i32, %arg2: memref<2x8x32xf32, #tpu.memory_space<vmem>>, %arg3: memref<8x8xf32, #tpu.memory_space<vmem>>, %arg4: memref<2x1x8xf32, #tpu.memory_space<vmem>>, %arg5: memref<2x1x16xf32, #tpu.memory_space<vmem>>, %arg6: memref<2x16x32xbf16, #tpu.memory_space<vmem>>, %arg7: memref<1x32x96xbf16, #tpu.memory_space<vmem>>, %arg8: memref<1x32x32xbf16, #tpu.memory_space<vmem>>, %arg9: memref<1x32x32xbf16, #tpu.memory_space<vmem>>, %arg10: memref<1x32x64xbf16, #tpu.memory_space<vmem>>, %arg11: memref<1x32x32xbf16, #tpu.memory_space<vmem>>, %arg12: memref<1x32x64xbf16, #tpu.memory_space<vmem>>, %arg13: memref<1x64x32xbf16, #tpu.memory_space<vmem>>, %arg14: memref<1x16x32xf32, #tpu.memory_space<vmem>>, %arg15: memref<1x1x64xf32, #tpu.memory_space<vmem>>, %arg16: memref<2x8x32xf32, #tpu.memory_space<vmem>>, %arg17: memref<16x32xf32, #tpu.memory_space<vmem>>) attributes {dimension_semantics = [#tpu.dimension_semantics<parallel>, #tpu.dimension_semantics<arbitrary>], iteration_bounds = array<i64: 1, 2>, scalar_prefetch = 0 : i64, scratch_operands = 1 : i64, tpu.core_type = #tpu.core_type<tc>, window_params = [{transform_indices = @transform_0, window_bounds = array<i64: 2, 8, 32>}, {pipeline_mode = #tpu.pipeline_mode<synchronous>, transform_indices = @transform_1, window_bounds = array<i64: 8, 8>}, {transform_indices = @transform_2, window_bounds = array<i64: 2, 1, 8>}, {transform_indices = @transform_3, window_bounds = array<i64: 2, 1, 16>}, {transform_indices = @transform_4, window_bounds = array<i64: 2, 16, 32>}, {transform_indices = @transform_5, window_bounds = array<i64: 1, 32, 96>}, {transform_indices = @transform_6, window_bounds = array<i64: 1, 32, 32>}, {transform_indices = @transform_7, window_bounds = array<i64: 1, 32, 32>}, {transform_indices = @transform_8, window_bounds = array<i64: 1, 32, 64>}, {transform_indices = @transform_9, window_bounds = array<i64: 1, 32, 32>}, {transform_indices = @transform_10, window_bounds = array<i64: 1, 32, 64>}, {transform_indices = @transform_11, window_bounds = array<i64: 1, 64, 32>}, {transform_indices = @transform_12, window_bounds = array<i64: 1, 16, 32>}, {transform_indices = @transform_13, window_bounds = array<i64: 1, 1, 64>}, {transform_indices = @transform_14, window_bounds = array<i64: 2, 8, 32>}]} {
    %c0_i32 = arith.constant 0 : i32
    %0 = arith.cmpi eq, %arg1, %c0_i32 : i32
    %1 = arith.extui %0 : i1 to i32
    %c0_i32_0 = arith.constant 0 : i32
    %2 = arith.cmpi ne, %1, %c0_i32_0 : i32
    scf.if %2 {
      %c0_92 = arith.constant 0 : index
      %c0_93 = arith.constant 0 : index
      %c0_94 = arith.constant 0 : index
      %310 = vector.load %arg2[%c0_92, %c0_93, %c0_94] : memref<2x8x32xf32, #tpu.memory_space<vmem>>, vector<2x8x32xf32>
      %311 = vector.shape_cast %310 : vector<2x8x32xf32> to vector<16x32xf32>
      %c0_95 = arith.constant 0 : index
      %c0_96 = arith.constant 0 : index
      %312 = vector.load %arg17[%c0_95, %c0_96] : memref<16x32xf32, #tpu.memory_space<vmem>>, vector<16x32xf32>
      tpu.vector_store %arg17[%c0_95, %c0_96], %311 {strides = array<i32>} : memref<16x32xf32, #tpu.memory_space<vmem>>, vector<16x32xf32>,
    } else {
    }
    %c0 = arith.constant 0 : index
    %c0_1 = arith.constant 0 : index
    %3 = vector.load %arg17[%c0, %c0_1] : memref<16x32xf32, #tpu.memory_space<vmem>>, vector<16x32xf32>
    %c0_2 = arith.constant 0 : index
    %c0_3 = arith.constant 0 : index
    %c0_4 = arith.constant 0 : index
    %4 = vector.load %arg6[%c0_2, %c0_3, %c0_4] : memref<2x16x32xbf16, #tpu.memory_space<vmem>>, vector<2x16x32xbf16>
    %5 = vector.shape_cast %4 : vector<2x16x32xbf16> to vector<32x32xbf16>
    %c0_5 = arith.constant 0 : index
    %c0_6 = arith.constant 0 : index
    %c0_7 = arith.constant 0 : index
    %6 = vector.load %arg14[%c0_5, %c0_6, %c0_7] : memref<1x16x32xf32, #tpu.memory_space<vmem>>, vector<1x16x32xf32>
    %7 = vector.shape_cast %6 : vector<1x16x32xf32> to vector<16x32xf32>
    %c0_8 = arith.constant 0 : index
    %c0_9 = arith.constant 0 : index
    %8 = vector.load %arg3[%c0_8, %c0_9] : memref<8x8xf32, #tpu.memory_space<vmem>>, vector<8x8xf32>
    %c0_10 = arith.constant 0 : index
    %c0_11 = arith.constant 0 : index
    %c0_12 = arith.constant 0 : index
    %9 = vector.load %arg4[%c0_10, %c0_11, %c0_12] : memref<2x1x8xf32, #tpu.memory_space<vmem>>, vector<2x1x8xf32>
    %c0_13 = arith.constant 0 : index
    %c0_14 = arith.constant 0 : index
    %c0_15 = arith.constant 0 : index
    %10 = vector.load %arg5[%c0_13, %c0_14, %c0_15] : memref<2x1x16xf32, #tpu.memory_space<vmem>>, vector<2x1x16xf32>
    %11 = arith.truncf %3 : vector<16x32xf32> to vector<16x32xbf16>
    %c0_16 = arith.constant 0 : index
    %c0_17 = arith.constant 0 : index
    %c0_18 = arith.constant 0 : index
    %12 = vector.load %arg7[%c0_16, %c0_17, %c0_18] : memref<1x32x96xbf16, #tpu.memory_space<vmem>>, vector<1x32x96xbf16>
    %13 = vector.shape_cast %12 : vector<1x32x96xbf16> to vector<32x96xbf16>
    %cst = arith.constant dense<0.000000e+00> : vector<16x96xf32>
    %14 = tpu.matmul %11, %13, %cst {dimension_numbers = #tpu.dot_dimension_numbers<[1], [0], [0], [1], [0, 0, 1, 1], [], []>} : vector<16x32xbf16>, vector<32x96xbf16>, vector<16x96xf32> -> vector<16x96xf32>
    %15 = vector.extract_strided_slice %14 {offsets = [0, 0], sizes = [16, 32], strides = [1, 1]} : vector<16x96xf32> to vector<16x32xf32>
    %16 = vector.extract_strided_slice %7 {offsets = [0, 0], sizes = [1, 32], strides = [1, 1]} : vector<16x32xf32> to vector<1x32xf32>
    %17 = vector.broadcast %16 : vector<1x32xf32> to vector<16x32xf32>
    %18 = arith.addf %15, %17 : vector<16x32xf32>
    %19 = vector.extract_strided_slice %14 {offsets = [0, 32], sizes = [16, 32], strides = [1, 1]} : vector<16x96xf32> to vector<16x32xf32>
    %20 = vector.extract_strided_slice %7 {offsets = [1, 0], sizes = [1, 32], strides = [1, 1]} : vector<16x32xf32> to vector<1x32xf32>
    %21 = vector.broadcast %20 : vector<1x32xf32> to vector<16x32xf32>
    %22 = arith.addf %19, %21 : vector<16x32xf32>
    %23 = vector.extract_strided_slice %14 {offsets = [0, 64], sizes = [16, 32], strides = [1, 1]} : vector<16x96xf32> to vector<16x32xf32>
    %24 = vector.extract_strided_slice %7 {offsets = [2, 0], sizes = [1, 32], strides = [1, 1]} : vector<16x32xf32> to vector<1x32xf32>
    %25 = vector.broadcast %24 : vector<1x32xf32> to vector<16x32xf32>
    %26 = arith.addf %23, %25 : vector<16x32xf32>
    %27 = arith.truncf %18 : vector<16x32xf32> to vector<16x32xbf16>
    %28 = arith.truncf %22 : vector<16x32xf32> to vector<16x32xbf16>
    %29 = arith.truncf %26 : vector<16x32xf32> to vector<16x32xbf16>
    %30 = vector.extract_strided_slice %27 {offsets = [0, 0], sizes = [8, 32], strides = [1, 1]} : vector<16x32xbf16> to vector<8x32xbf16>
    %31 = vector.shape_cast %30 : vector<8x32xbf16> to vector<8x4x8xbf16>
    %32 = vector.extract_strided_slice %28 {offsets = [0, 0], sizes = [8, 32], strides = [1, 1]} : vector<16x32xbf16> to vector<8x32xbf16>
    %33 = vector.shape_cast %32 : vector<8x32xbf16> to vector<8x4x8xbf16>
    %34 = vector.extract_strided_slice %29 {offsets = [0, 0], sizes = [8, 32], strides = [1, 1]} : vector<16x32xbf16> to vector<8x32xbf16>
    %35 = vector.shape_cast %34 : vector<8x32xbf16> to vector<8x4x8xbf16>
    "tpu.trace_start"() <{level = 10 : i32, message = "qhd,khd->hqk"}> : () -> ()
    %cst_19 = arith.constant dense<0.000000e+00> : vector<4x8x8xf32>
    %36 = tpu.matmul %31, %33, %cst_19 {dimension_numbers = #tpu.dot_dimension_numbers<[2], [2], [0], [0], [0, 1, 0, 0, 1, 0], [1], [1]>} : vector<8x4x8xbf16>, vector<8x4x8xbf16>, vector<4x8x8xf32> -> vector<4x8x8xf32>
    "tpu.trace_stop"() : () -> ()
    %37 = vector.extract_strided_slice %9 {offsets = [0, 0, 0], sizes = [1, 1, 8], strides = [1, 1, 1]} : vector<2x1x8xf32> to vector<1x1x8xf32>
    %38 = vector.shape_cast %37 : vector<1x1x8xf32> to vector<1x8xf32>
    %39 = vector.broadcast %38 : vector<1x8xf32> to vector<8x8xf32>
    %40 = arith.addf %8, %39 : vector<8x8xf32>
    %41 = vector.shape_cast %40 : vector<8x8xf32> to vector<1x8x8xf32>
    %42 = vector.broadcast %41 : vector<1x8x8xf32> to vector<4x8x8xf32>
    %43 = arith.addf %36, %42 : vector<4x8x8xf32>
    %cst_20 = arith.constant dense<0xFF800000> : vector<4x8xf32>
    %44 = vector.multi_reduction <maximumf>, %43, %cst_20 [2] : vector<4x8x8xf32> to vector<4x8xf32>
    %45 = vector.shape_cast %44 : vector<4x8xf32> to vector<4x8x1xf32>
    %cst_21 = arith.constant -1.000000e+30 : f32
    %46 = vector.broadcast %cst_21 : f32 to vector<4x8x1xf32>
    %47 = arith.maximumf %45, %46 : vector<4x8x1xf32>
    %48 = vector.broadcast %47 : vector<4x8x1xf32> to vector<4x8x8xf32>
    %49 = arith.subf %43, %48 : vector<4x8x8xf32>
    %50 = math.exp %49 : vector<4x8x8xf32>
    %cst_22 = arith.constant dense<0.000000e+00> : vector<4x8xf32>
    %51 = vector.multi_reduction <add>, %50, %cst_22 [2] : vector<4x8x8xf32> to vector<4x8xf32>
    %52 = vector.shape_cast %51 : vector<4x8xf32> to vector<4x8x1xf32>
    %cst_23 = arith.constant 0.000000e+00 : f32
    %53 = vector.broadcast %cst_23 : f32 to vector<4x8x1xf32>
    %54 = arith.cmpf oeq, %52, %53 : vector<4x8x1xf32>
    %55 = arith.extui %54 : vector<4x8x1xi1> to vector<4x8x1xi32>
    %56 = arith.sitofp %55 : vector<4x8x1xi32> to vector<4x8x1xf32>
    %57 = arith.addf %52, %56 : vector<4x8x1xf32>
    %58 = tpu.reciprocal %57 {approx = true} : vector<4x8x1xf32> -> vector<4x8x1xf32>
    %59 = vector.broadcast %58 : vector<4x8x1xf32> to vector<4x8x8xf32>
    %60 = arith.mulf %50, %59 : vector<4x8x8xf32>
    %61 = arith.truncf %60 : vector<4x8x8xf32> to vector<4x8x8xbf16>
    "tpu.trace_start"() <{level = 10 : i32, message = "hqk,khd->qhd"}> : () -> ()
    %cst_24 = arith.constant dense<0.000000e+00> : vector<4x8x8xf32>
    %62 = tpu.matmul %35, %61, %cst_24 {dimension_numbers = #tpu.dot_dimension_numbers<[0], [2], [2], [1], [0, 1, 0, 2, 1, 1], [1], [0]>} : vector<8x4x8xbf16>, vector<4x8x8xbf16>, vector<4x8x8xf32> -> vector<4x8x8xf32>
    %63 = tpu.transpose %62, [2, 0, 1] : vector<4x8x8xf32> -> vector<8x4x8xf32>
    "tpu.trace_stop"() : () -> ()
    %64 = vector.shape_cast %63 : vector<8x4x8xf32> to vector<8x32xf32>
    %65 = vector.extract_strided_slice %27 {offsets = [8, 0], sizes = [8, 32], strides = [1, 1]} : vector<16x32xbf16> to vector<8x32xbf16>
    %66 = vector.shape_cast %65 : vector<8x32xbf16> to vector<8x4x8xbf16>
    %67 = vector.extract_strided_slice %28 {offsets = [8, 0], sizes = [8, 32], strides = [1, 1]} : vector<16x32xbf16> to vector<8x32xbf16>
    %68 = vector.shape_cast %67 : vector<8x32xbf16> to vector<8x4x8xbf16>
    %69 = vector.extract_strided_slice %29 {offsets = [8, 0], sizes = [8, 32], strides = [1, 1]} : vector<16x32xbf16> to vector<8x32xbf16>
    %70 = vector.shape_cast %69 : vector<8x32xbf16> to vector<8x4x8xbf16>
    "tpu.trace_start"() <{level = 10 : i32, message = "qhd,khd->hqk"}> : () -> ()
    %cst_25 = arith.constant dense<0.000000e+00> : vector<4x8x8xf32>
    %71 = tpu.matmul %66, %68, %cst_25 {dimension_numbers = #tpu.dot_dimension_numbers<[2], [2], [0], [0], [0, 1, 0, 0, 1, 0], [1], [1]>} : vector<8x4x8xbf16>, vector<8x4x8xbf16>, vector<4x8x8xf32> -> vector<4x8x8xf32>
    "tpu.trace_stop"() : () -> ()
    %72 = vector.extract_strided_slice %9 {offsets = [1, 0, 0], sizes = [1, 1, 8], strides = [1, 1, 1]} : vector<2x1x8xf32> to vector<1x1x8xf32>
    %73 = vector.shape_cast %72 : vector<1x1x8xf32> to vector<1x8xf32>
    %74 = vector.broadcast %73 : vector<1x8xf32> to vector<8x8xf32>
    %75 = arith.addf %8, %74 : vector<8x8xf32>
    %76 = vector.shape_cast %75 : vector<8x8xf32> to vector<1x8x8xf32>
    %77 = vector.broadcast %76 : vector<1x8x8xf32> to vector<4x8x8xf32>
    %78 = arith.addf %71, %77 : vector<4x8x8xf32>
    %cst_26 = arith.constant dense<0xFF800000> : vector<4x8xf32>
    %79 = vector.multi_reduction <maximumf>, %78, %cst_26 [2] : vector<4x8x8xf32> to vector<4x8xf32>
    %80 = vector.shape_cast %79 : vector<4x8xf32> to vector<4x8x1xf32>
    %cst_27 = arith.constant -1.000000e+30 : f32
    %81 = vector.broadcast %cst_27 : f32 to vector<4x8x1xf32>
    %82 = arith.maximumf %80, %81 : vector<4x8x1xf32>
    %83 = vector.broadcast %82 : vector<4x8x1xf32> to vector<4x8x8xf32>
    %84 = arith.subf %78, %83 : vector<4x8x8xf32>
    %85 = math.exp %84 : vector<4x8x8xf32>
    %cst_28 = arith.constant dense<0.000000e+00> : vector<4x8xf32>
    %86 = vector.multi_reduction <add>, %85, %cst_28 [2] : vector<4x8x8xf32> to vector<4x8xf32>
    %87 = vector.shape_cast %86 : vector<4x8xf32> to vector<4x8x1xf32>
    %cst_29 = arith.constant 0.000000e+00 : f32
    %88 = vector.broadcast %cst_29 : f32 to vector<4x8x1xf32>
    %89 = arith.cmpf oeq, %87, %88 : vector<4x8x1xf32>
    %90 = arith.extui %89 : vector<4x8x1xi1> to vector<4x8x1xi32>
    %91 = arith.sitofp %90 : vector<4x8x1xi32> to vector<4x8x1xf32>
    %92 = arith.addf %87, %91 : vector<4x8x1xf32>
    %93 = tpu.reciprocal %92 {approx = true} : vector<4x8x1xf32> -> vector<4x8x1xf32>
    %94 = vector.broadcast %93 : vector<4x8x1xf32> to vector<4x8x8xf32>
    %95 = arith.mulf %85, %94 : vector<4x8x8xf32>
    %96 = arith.truncf %95 : vector<4x8x8xf32> to vector<4x8x8xbf16>
    "tpu.trace_start"() <{level = 10 : i32, message = "hqk,khd->qhd"}> : () -> ()
    %cst_30 = arith.constant dense<0.000000e+00> : vector<4x8x8xf32>
    %97 = tpu.matmul %70, %96, %cst_30 {dimension_numbers = #tpu.dot_dimension_numbers<[0], [2], [2], [1], [0, 1, 0, 2, 1, 1], [1], [0]>} : vector<8x4x8xbf16>, vector<4x8x8xbf16>, vector<4x8x8xf32> -> vector<4x8x8xf32>
    %98 = tpu.transpose %97, [2, 0, 1] : vector<4x8x8xf32> -> vector<8x4x8xf32>
    "tpu.trace_stop"() : () -> ()
    %99 = vector.shape_cast %98 : vector<8x4x8xf32> to vector<8x32xf32>
    %100 = tpu.concatenate %64, %99 in 0 : vector<8x32xf32>, vector<8x32xf32> -> vector<16x32xf32>
    %101 = arith.truncf %100 : vector<16x32xf32> to vector<16x32xbf16>
    %c0_31 = arith.constant 0 : index
    %c0_32 = arith.constant 0 : index
    %c0_33 = arith.constant 0 : index
    %102 = vector.load %arg8[%c0_31, %c0_32, %c0_33] : memref<1x32x32xbf16, #tpu.memory_space<vmem>>, vector<1x32x32xbf16>
    %103 = vector.shape_cast %102 : vector<1x32x32xbf16> to vector<32x32xbf16>
    %cst_34 = arith.constant dense<0.000000e+00> : vector<16x32xf32>
    %104 = tpu.matmul %101, %103, %cst_34 {dimension_numbers = #tpu.dot_dimension_numbers<[1], [0], [0], [1], [0, 0, 1, 1], [], []>} : vector<16x32xbf16>, vector<32x32xbf16>, vector<16x32xf32> -> vector<16x32xf32>
    %105 = vector.extract_strided_slice %7 {offsets = [3, 0], sizes = [1, 32], strides = [1, 1]} : vector<16x32xf32> to vector<1x32xf32>
    %106 = vector.broadcast %105 : vector<1x32xf32> to vector<16x32xf32>
    %107 = arith.addf %104, %106 : vector<16x32xf32>
    %108 = arith.addf %3, %107 : vector<16x32xf32>
    %109 = vector.extract_strided_slice %7 {offsets = [4, 0], sizes = [1, 32], strides = [1, 1]} : vector<16x32xf32> to vector<1x32xf32>
    %110 = vector.extract_strided_slice %7 {offsets = [5, 0], sizes = [1, 32], strides = [1, 1]} : vector<16x32xf32> to vector<1x32xf32>
    %cst_35 = arith.constant dense<0.000000e+00> : vector<16xf32>
    %111 = vector.multi_reduction <add>, %108, %cst_35 [1] : vector<16x32xf32> to vector<16xf32>
    %112 = vector.shape_cast %111 : vector<16xf32> to vector<16x1xf32>
    %cst_36 = arith.constant 3.200000e+01 : f32
    %113 = vector.broadcast %cst_36 : f32 to vector<16x1xf32>
    %114 = arith.divf %112, %113 : vector<16x1xf32>
    %115 = vector.broadcast %114 : vector<16x1xf32> to vector<16x32xf32>
    %116 = arith.subf %108, %115 : vector<16x32xf32>
    %117 = arith.mulf %116, %116 : vector<16x32xf32>
    %cst_37 = arith.constant dense<0.000000e+00> : vector<16xf32>
    %118 = vector.multi_reduction <add>, %117, %cst_37 [1] : vector<16x32xf32> to vector<16xf32>
    %119 = vector.shape_cast %118 : vector<16xf32> to vector<16x1xf32>
    %cst_38 = arith.constant 3.200000e+01 : f32
    %120 = vector.broadcast %cst_38 : f32 to vector<16x1xf32>
    %121 = arith.divf %119, %120 : vector<16x1xf32>
    %122 = vector.broadcast %114 : vector<16x1xf32> to vector<16x32xf32>
    %123 = arith.subf %108, %122 : vector<16x32xf32>
    %cst_39 = arith.constant 9.99999974E-6 : f32
    %124 = vector.broadcast %cst_39 : f32 to vector<16x1xf32>
    %125 = arith.addf %121, %124 : vector<16x1xf32>
    %126 = math.rsqrt %125 : vector<16x1xf32>
    %127 = vector.broadcast %126 : vector<16x1xf32> to vector<16x32xf32>
    %128 = arith.mulf %123, %127 : vector<16x32xf32>
    %129 = vector.broadcast %109 : vector<1x32xf32> to vector<16x32xf32>
    %130 = arith.mulf %128, %129 : vector<16x32xf32>
    %131 = vector.broadcast %110 : vector<1x32xf32> to vector<16x32xf32>
    %132 = arith.addf %130, %131 : vector<16x32xf32>
    %133 = arith.truncf %132 : vector<16x32xf32> to vector<16x32xbf16>
    %c0_40 = arith.constant 0 : index
    %c0_41 = arith.constant 0 : index
    %c0_42 = arith.constant 0 : index
    %134 = vector.load %arg9[%c0_40, %c0_41, %c0_42] : memref<1x32x32xbf16, #tpu.memory_space<vmem>>, vector<1x32x32xbf16>
    %135 = vector.shape_cast %134 : vector<1x32x32xbf16> to vector<32x32xbf16>
    %cst_43 = arith.constant dense<0.000000e+00> : vector<16x32xf32>
    %136 = tpu.matmul %133, %135, %cst_43 {dimension_numbers = #tpu.dot_dimension_numbers<[1], [0], [0], [1], [0, 0, 1, 1], [], []>} : vector<16x32xbf16>, vector<32x32xbf16>, vector<16x32xf32> -> vector<16x32xf32>
    %137 = vector.extract_strided_slice %7 {offsets = [6, 0], sizes = [1, 32], strides = [1, 1]} : vector<16x32xf32> to vector<1x32xf32>
    %138 = vector.broadcast %137 : vector<1x32xf32> to vector<16x32xf32>
    %139 = arith.addf %136, %138 : vector<16x32xf32>
    %c0_44 = arith.constant 0 : index
    %c0_45 = arith.constant 0 : index
    %c0_46 = arith.constant 0 : index
    %140 = vector.load %arg10[%c0_44, %c0_45, %c0_46] : memref<1x32x64xbf16, #tpu.memory_space<vmem>>, vector<1x32x64xbf16>
    %141 = vector.shape_cast %140 : vector<1x32x64xbf16> to vector<32x64xbf16>
    %cst_47 = arith.constant dense<0.000000e+00> : vector<32x64xf32>
    %142 = tpu.matmul %5, %141, %cst_47 {dimension_numbers = #tpu.dot_dimension_numbers<[1], [0], [0], [1], [0, 0, 1, 1], [], []>} : vector<32x32xbf16>, vector<32x64xbf16>, vector<32x64xf32> -> vector<32x64xf32>
    %143 = vector.extract_strided_slice %142 {offsets = [0, 0], sizes = [32, 32], strides = [1, 1]} : vector<32x64xf32> to vector<32x32xf32>
    %144 = vector.extract_strided_slice %7 {offsets = [7, 0], sizes = [1, 32], strides = [1, 1]} : vector<16x32xf32> to vector<1x32xf32>
    %145 = vector.broadcast %144 : vector<1x32xf32> to vector<32x32xf32>
    %146 = arith.addf %143, %145 : vector<32x32xf32>
    %147 = vector.extract_strided_slice %142 {offsets = [0, 32], sizes = [32, 32], strides = [1, 1]} : vector<32x64xf32> to vector<32x32xf32>
    %148 = vector.extract_strided_slice %7 {offsets = [8, 0], sizes = [1, 32], strides = [1, 1]} : vector<16x32xf32> to vector<1x32xf32>
    %149 = vector.broadcast %148 : vector<1x32xf32> to vector<32x32xf32>
    %150 = arith.addf %147, %149 : vector<32x32xf32>
    %151 = arith.truncf %139 : vector<16x32xf32> to vector<16x32xbf16>
    %152 = arith.truncf %146 : vector<32x32xf32> to vector<32x32xbf16>
    %153 = arith.truncf %150 : vector<32x32xf32> to vector<32x32xbf16>
    %154 = vector.extract_strided_slice %151 {offsets = [0, 0], sizes = [8, 32], strides = [1, 1]} : vector<16x32xbf16> to vector<8x32xbf16>
    %155 = vector.shape_cast %154 : vector<8x32xbf16> to vector<8x4x8xbf16>
    %156 = vector.extract_strided_slice %152 {offsets = [0, 0], sizes = [16, 32], strides = [1, 1]} : vector<32x32xbf16> to vector<16x32xbf16>
    %157 = vector.shape_cast %156 : vector<16x32xbf16> to vector<16x4x8xbf16>
    %158 = vector.extract_strided_slice %153 {offsets = [0, 0], sizes = [16, 32], strides = [1, 1]} : vector<32x32xbf16> to vector<16x32xbf16>
    %159 = vector.shape_cast %158 : vector<16x32xbf16> to vector<16x4x8xbf16>
    "tpu.trace_start"() <{level = 10 : i32, message = "qhd,khd->hqk"}> : () -> ()
    %cst_48 = arith.constant dense<0.000000e+00> : vector<4x8x16xf32>
    %160 = tpu.matmul %155, %157, %cst_48 {dimension_numbers = #tpu.dot_dimension_numbers<[2], [2], [0], [0], [0, 1, 0, 0, 1, 0], [1], [1]>} : vector<8x4x8xbf16>, vector<16x4x8xbf16>, vector<4x8x16xf32> -> vector<4x8x16xf32>
    "tpu.trace_stop"() : () -> ()
    %161 = vector.extract_strided_slice %10 {offsets = [0, 0, 0], sizes = [1, 1, 16], strides = [1, 1, 1]} : vector<2x1x16xf32> to vector<1x1x16xf32>
    %162 = vector.shape_cast %161 : vector<1x1x16xf32> to vector<1x16xf32>
    %163 = vector.shape_cast %162 : vector<1x16xf32> to vector<1x1x16xf32>
    %164 = vector.broadcast %163 : vector<1x1x16xf32> to vector<4x8x16xf32>
    %165 = arith.addf %160, %164 : vector<4x8x16xf32>
    %cst_49 = arith.constant dense<0xFF800000> : vector<4x8xf32>
    %166 = vector.multi_reduction <maximumf>, %165, %cst_49 [2] : vector<4x8x16xf32> to vector<4x8xf32>
    %167 = vector.shape_cast %166 : vector<4x8xf32> to vector<4x8x1xf32>
    %cst_50 = arith.constant -1.000000e+30 : f32
    %168 = vector.broadcast %cst_50 : f32 to vector<4x8x1xf32>
    %169 = arith.maximumf %167, %168 : vector<4x8x1xf32>
    %170 = vector.broadcast %169 : vector<4x8x1xf32> to vector<4x8x16xf32>
    %171 = arith.subf %165, %170 : vector<4x8x16xf32>
    %172 = math.exp %171 : vector<4x8x16xf32>
    %cst_51 = arith.constant dense<0.000000e+00> : vector<4x8xf32>
    %173 = vector.multi_reduction <add>, %172, %cst_51 [2] : vector<4x8x16xf32> to vector<4x8xf32>
    %174 = vector.shape_cast %173 : vector<4x8xf32> to vector<4x8x1xf32>
    %cst_52 = arith.constant 0.000000e+00 : f32
    %175 = vector.broadcast %cst_52 : f32 to vector<4x8x1xf32>
    %176 = arith.cmpf oeq, %174, %175 : vector<4x8x1xf32>
    %177 = arith.extui %176 : vector<4x8x1xi1> to vector<4x8x1xi32>
    %178 = arith.sitofp %177 : vector<4x8x1xi32> to vector<4x8x1xf32>
    %179 = arith.addf %174, %178 : vector<4x8x1xf32>
    %180 = tpu.reciprocal %179 {approx = true} : vector<4x8x1xf32> -> vector<4x8x1xf32>
    %181 = vector.broadcast %180 : vector<4x8x1xf32> to vector<4x8x16xf32>
    %182 = arith.mulf %172, %181 : vector<4x8x16xf32>
    %183 = arith.truncf %182 : vector<4x8x16xf32> to vector<4x8x16xbf16>
    "tpu.trace_start"() <{level = 10 : i32, message = "hqk,khd->qhd"}> : () -> ()
    %cst_53 = arith.constant dense<0.000000e+00> : vector<4x8x8xf32>
    %184 = tpu.matmul %159, %183, %cst_53 {dimension_numbers = #tpu.dot_dimension_numbers<[0], [2], [2], [1], [0, 1, 0, 2, 1, 1], [1], [0]>} : vector<16x4x8xbf16>, vector<4x8x16xbf16>, vector<4x8x8xf32> -> vector<4x8x8xf32>
    %185 = tpu.transpose %184, [2, 0, 1] : vector<4x8x8xf32> -> vector<8x4x8xf32>
    "tpu.trace_stop"() : () -> ()
    %186 = vector.shape_cast %185 : vector<8x4x8xf32> to vector<8x32xf32>
    %187 = vector.extract_strided_slice %151 {offsets = [8, 0], sizes = [8, 32], strides = [1, 1]} : vector<16x32xbf16> to vector<8x32xbf16>
    %188 = vector.shape_cast %187 : vector<8x32xbf16> to vector<8x4x8xbf16>
    %189 = vector.extract_strided_slice %152 {offsets = [16, 0], sizes = [16, 32], strides = [1, 1]} : vector<32x32xbf16> to vector<16x32xbf16>
    %190 = vector.shape_cast %189 : vector<16x32xbf16> to vector<16x4x8xbf16>
    %191 = vector.extract_strided_slice %153 {offsets = [16, 0], sizes = [16, 32], strides = [1, 1]} : vector<32x32xbf16> to vector<16x32xbf16>
    %192 = vector.shape_cast %191 : vector<16x32xbf16> to vector<16x4x8xbf16>
    "tpu.trace_start"() <{level = 10 : i32, message = "qhd,khd->hqk"}> : () -> ()
    %cst_54 = arith.constant dense<0.000000e+00> : vector<4x8x16xf32>
    %193 = tpu.matmul %188, %190, %cst_54 {dimension_numbers = #tpu.dot_dimension_numbers<[2], [2], [0], [0], [0, 1, 0, 0, 1, 0], [1], [1]>} : vector<8x4x8xbf16>, vector<16x4x8xbf16>, vector<4x8x16xf32> -> vector<4x8x16xf32>
    "tpu.trace_stop"() : () -> ()
    %194 = vector.extract_strided_slice %10 {offsets = [1, 0, 0], sizes = [1, 1, 16], strides = [1, 1, 1]} : vector<2x1x16xf32> to vector<1x1x16xf32>
    %195 = vector.shape_cast %194 : vector<1x1x16xf32> to vector<1x16xf32>
    %196 = vector.shape_cast %195 : vector<1x16xf32> to vector<1x1x16xf32>
    %197 = vector.broadcast %196 : vector<1x1x16xf32> to vector<4x8x16xf32>
    %198 = arith.addf %193, %197 : vector<4x8x16xf32>
    %cst_55 = arith.constant dense<0xFF800000> : vector<4x8xf32>
    %199 = vector.multi_reduction <maximumf>, %198, %cst_55 [2] : vector<4x8x16xf32> to vector<4x8xf32>
    %200 = vector.shape_cast %199 : vector<4x8xf32> to vector<4x8x1xf32>
    %cst_56 = arith.constant -1.000000e+30 : f32
    %201 = vector.broadcast %cst_56 : f32 to vector<4x8x1xf32>
    %202 = arith.maximumf %200, %201 : vector<4x8x1xf32>
    %203 = vector.broadcast %202 : vector<4x8x1xf32> to vector<4x8x16xf32>
    %204 = arith.subf %198, %203 : vector<4x8x16xf32>
    %205 = math.exp %204 : vector<4x8x16xf32>
    %cst_57 = arith.constant dense<0.000000e+00> : vector<4x8xf32>
    %206 = vector.multi_reduction <add>, %205, %cst_57 [2] : vector<4x8x16xf32> to vector<4x8xf32>
    %207 = vector.shape_cast %206 : vector<4x8xf32> to vector<4x8x1xf32>
    %cst_58 = arith.constant 0.000000e+00 : f32
    %208 = vector.broadcast %cst_58 : f32 to vector<4x8x1xf32>
    %209 = arith.cmpf oeq, %207, %208 : vector<4x8x1xf32>
    %210 = arith.extui %209 : vector<4x8x1xi1> to vector<4x8x1xi32>
    %211 = arith.sitofp %210 : vector<4x8x1xi32> to vector<4x8x1xf32>
    %212 = arith.addf %207, %211 : vector<4x8x1xf32>
    %213 = tpu.reciprocal %212 {approx = true} : vector<4x8x1xf32> -> vector<4x8x1xf32>
    %214 = vector.broadcast %213 : vector<4x8x1xf32> to vector<4x8x16xf32>
    %215 = arith.mulf %205, %214 : vector<4x8x16xf32>
    %216 = arith.truncf %215 : vector<4x8x16xf32> to vector<4x8x16xbf16>
    "tpu.trace_start"() <{level = 10 : i32, message = "hqk,khd->qhd"}> : () -> ()
    %cst_59 = arith.constant dense<0.000000e+00> : vector<4x8x8xf32>
    %217 = tpu.matmul %192, %216, %cst_59 {dimension_numbers = #tpu.dot_dimension_numbers<[0], [2], [2], [1], [0, 1, 0, 2, 1, 1], [1], [0]>} : vector<16x4x8xbf16>, vector<4x8x16xbf16>, vector<4x8x8xf32> -> vector<4x8x8xf32>
    %218 = tpu.transpose %217, [2, 0, 1] : vector<4x8x8xf32> -> vector<8x4x8xf32>
    "tpu.trace_stop"() : () -> ()
    %219 = vector.shape_cast %218 : vector<8x4x8xf32> to vector<8x32xf32>
    %220 = tpu.concatenate %186, %219 in 0 : vector<8x32xf32>, vector<8x32xf32> -> vector<16x32xf32>
    %221 = arith.truncf %220 : vector<16x32xf32> to vector<16x32xbf16>
    %c0_60 = arith.constant 0 : index
    %c0_61 = arith.constant 0 : index
    %c0_62 = arith.constant 0 : index
    %222 = vector.load %arg11[%c0_60, %c0_61, %c0_62] : memref<1x32x32xbf16, #tpu.memory_space<vmem>>, vector<1x32x32xbf16>
    %223 = vector.shape_cast %222 : vector<1x32x32xbf16> to vector<32x32xbf16>
    %cst_63 = arith.constant dense<0.000000e+00> : vector<16x32xf32>
    %224 = tpu.matmul %221, %223, %cst_63 {dimension_numbers = #tpu.dot_dimension_numbers<[1], [0], [0], [1], [0, 0, 1, 1], [], []>} : vector<16x32xbf16>, vector<32x32xbf16>, vector<16x32xf32> -> vector<16x32xf32>
    %225 = vector.extract_strided_slice %7 {offsets = [9, 0], sizes = [1, 32], strides = [1, 1]} : vector<16x32xf32> to vector<1x32xf32>
    %226 = vector.broadcast %225 : vector<1x32xf32> to vector<16x32xf32>
    %227 = arith.addf %224, %226 : vector<16x32xf32>
    %228 = arith.addf %132, %227 : vector<16x32xf32>
    %229 = vector.extract_strided_slice %7 {offsets = [10, 0], sizes = [1, 32], strides = [1, 1]} : vector<16x32xf32> to vector<1x32xf32>
    %230 = vector.extract_strided_slice %7 {offsets = [11, 0], sizes = [1, 32], strides = [1, 1]} : vector<16x32xf32> to vector<1x32xf32>
    %cst_64 = arith.constant dense<0.000000e+00> : vector<16xf32>
    %231 = vector.multi_reduction <add>, %228, %cst_64 [1] : vector<16x32xf32> to vector<16xf32>
    %232 = vector.shape_cast %231 : vector<16xf32> to vector<16x1xf32>
    %cst_65 = arith.constant 3.200000e+01 : f32
    %233 = vector.broadcast %cst_65 : f32 to vector<16x1xf32>
    %234 = arith.divf %232, %233 : vector<16x1xf32>
    %235 = vector.broadcast %234 : vector<16x1xf32> to vector<16x32xf32>
    %236 = arith.subf %228, %235 : vector<16x32xf32>
    %237 = arith.mulf %236, %236 : vector<16x32xf32>
    %cst_66 = arith.constant dense<0.000000e+00> : vector<16xf32>
    %238 = vector.multi_reduction <add>, %237, %cst_66 [1] : vector<16x32xf32> to vector<16xf32>
    %239 = vector.shape_cast %238 : vector<16xf32> to vector<16x1xf32>
    %cst_67 = arith.constant 3.200000e+01 : f32
    %240 = vector.broadcast %cst_67 : f32 to vector<16x1xf32>
    %241 = arith.divf %239, %240 : vector<16x1xf32>
    %242 = vector.broadcast %234 : vector<16x1xf32> to vector<16x32xf32>
    %243 = arith.subf %228, %242 : vector<16x32xf32>
    %cst_68 = arith.constant 9.99999974E-6 : f32
    %244 = vector.broadcast %cst_68 : f32 to vector<16x1xf32>
    %245 = arith.addf %241, %244 : vector<16x1xf32>
    %246 = math.rsqrt %245 : vector<16x1xf32>
    %247 = vector.broadcast %246 : vector<16x1xf32> to vector<16x32xf32>
    %248 = arith.mulf %243, %247 : vector<16x32xf32>
    %249 = vector.broadcast %229 : vector<1x32xf32> to vector<16x32xf32>
    %250 = arith.mulf %248, %249 : vector<16x32xf32>
    %251 = vector.broadcast %230 : vector<1x32xf32> to vector<16x32xf32>
    %252 = arith.addf %250, %251 : vector<16x32xf32>
    %253 = arith.truncf %252 : vector<16x32xf32> to vector<16x32xbf16>
    %c0_69 = arith.constant 0 : index
    %c0_70 = arith.constant 0 : index
    %c0_71 = arith.constant 0 : index
    %254 = vector.load %arg12[%c0_69, %c0_70, %c0_71] : memref<1x32x64xbf16, #tpu.memory_space<vmem>>, vector<1x32x64xbf16>
    %255 = vector.shape_cast %254 : vector<1x32x64xbf16> to vector<32x64xbf16>
    %cst_72 = arith.constant dense<0.000000e+00> : vector<16x64xf32>
    %256 = tpu.matmul %253, %255, %cst_72 {dimension_numbers = #tpu.dot_dimension_numbers<[1], [0], [0], [1], [0, 0, 1, 1], [], []>} : vector<16x32xbf16>, vector<32x64xbf16>, vector<16x64xf32> -> vector<16x64xf32>
    %c0_73 = arith.constant 0 : index
    %c0_74 = arith.constant 0 : index
    %c0_75 = arith.constant 0 : index
    %257 = vector.load %arg15[%c0_73, %c0_74, %c0_75] : memref<1x1x64xf32, #tpu.memory_space<vmem>>, vector<1x1x64xf32>
    %258 = vector.shape_cast %257 : vector<1x1x64xf32> to vector<1x64xf32>
    %259 = vector.broadcast %258 : vector<1x64xf32> to vector<16x64xf32>
    %260 = arith.addf %256, %259 : vector<16x64xf32>
    %cst_76 = arith.constant 5.000000e-01 : f32
    %261 = vector.broadcast %cst_76 : f32 to vector<16x64xf32>
    %262 = arith.mulf %261, %260 : vector<16x64xf32>
    %cst_77 = arith.constant 4.471500e-02 : f32
    %263 = vector.broadcast %cst_77 : f32 to vector<16x64xf32>
    %264 = arith.mulf %263, %260 : vector<16x64xf32>
    %265 = arith.mulf %264, %260 : vector<16x64xf32>
    %266 = arith.mulf %265, %260 : vector<16x64xf32>
    %267 = arith.addf %260, %266 : vector<16x64xf32>
    %cst_78 = arith.constant 0.797884583 : f32
    %268 = vector.broadcast %cst_78 : f32 to vector<16x64xf32>
    %269 = arith.mulf %268, %267 : vector<16x64xf32>
    %270 = math.tanh %269 : vector<16x64xf32>
    %cst_79 = arith.constant 1.000000e+00 : f32
    %271 = vector.broadcast %cst_79 : f32 to vector<16x64xf32>
    %272 = arith.addf %271, %270 : vector<16x64xf32>
    %273 = arith.mulf %262, %272 : vector<16x64xf32>
    %274 = arith.truncf %273 : vector<16x64xf32> to vector<16x64xbf16>
    %c0_80 = arith.constant 0 : index
    %c0_81 = arith.constant 0 : index
    %c0_82 = arith.constant 0 : index
    %275 = vector.load %arg13[%c0_80, %c0_81, %c0_82] : memref<1x64x32xbf16, #tpu.memory_space<vmem>>, vector<1x64x32xbf16>
    %276 = vector.shape_cast %275 : vector<1x64x32xbf16> to vector<64x32xbf16>
    %cst_83 = arith.constant dense<0.000000e+00> : vector<16x32xf32>
    %277 = tpu.matmul %274, %276, %cst_83 {dimension_numbers = #tpu.dot_dimension_numbers<[1], [0], [0], [1], [0, 0, 1, 1], [], []>} : vector<16x64xbf16>, vector<64x32xbf16>, vector<16x32xf32> -> vector<16x32xf32>
    %278 = vector.extract_strided_slice %7 {offsets = [12, 0], sizes = [1, 32], strides = [1, 1]} : vector<16x32xf32> to vector<1x32xf32>
    %279 = vector.broadcast %278 : vector<1x32xf32> to vector<16x32xf32>
    %280 = arith.addf %277, %279 : vector<16x32xf32>
    %281 = arith.addf %252, %280 : vector<16x32xf32>
    %282 = vector.extract_strided_slice %7 {offsets = [13, 0], sizes = [1, 32], strides = [1, 1]} : vector<16x32xf32> to vector<1x32xf32>
    %283 = vector.extract_strided_slice %7 {offsets = [14, 0], sizes = [1, 32], strides = [1, 1]} : vector<16x32xf32> to vector<1x32xf32>
    %cst_84 = arith.constant dense<0.000000e+00> : vector<16xf32>
    %284 = vector.multi_reduction <add>, %281, %cst_84 [1] : vector<16x32xf32> to vector<16xf32>
    %285 = vector.shape_cast %284 : vector<16xf32> to vector<16x1xf32>
    %cst_85 = arith.constant 3.200000e+01 : f32
    %286 = vector.broadcast %cst_85 : f32 to vector<16x1xf32>
    %287 = arith.divf %285, %286 : vector<16x1xf32>
    %288 = vector.broadcast %287 : vector<16x1xf32> to vector<16x32xf32>
    %289 = arith.subf %281, %288 : vector<16x32xf32>
    %290 = arith.mulf %289, %289 : vector<16x32xf32>
    %cst_86 = arith.constant dense<0.000000e+00> : vector<16xf32>
    %291 = vector.multi_reduction <add>, %290, %cst_86 [1] : vector<16x32xf32> to vector<16xf32>
    %292 = vector.shape_cast %291 : vector<16xf32> to vector<16x1xf32>
    %cst_87 = arith.constant 3.200000e+01 : f32
    %293 = vector.broadcast %cst_87 : f32 to vector<16x1xf32>
    %294 = arith.divf %292, %293 : vector<16x1xf32>
    %295 = vector.broadcast %287 : vector<16x1xf32> to vector<16x32xf32>
    %296 = arith.subf %281, %295 : vector<16x32xf32>
    %cst_88 = arith.constant 9.99999974E-6 : f32
    %297 = vector.broadcast %cst_88 : f32 to vector<16x1xf32>
    %298 = arith.addf %294, %297 : vector<16x1xf32>
    %299 = math.rsqrt %298 : vector<16x1xf32>
    %300 = vector.broadcast %299 : vector<16x1xf32> to vector<16x32xf32>
    %301 = arith.mulf %296, %300 : vector<16x32xf32>
    %302 = vector.broadcast %282 : vector<1x32xf32> to vector<16x32xf32>
    %303 = arith.mulf %301, %302 : vector<16x32xf32>
    %304 = vector.broadcast %283 : vector<1x32xf32> to vector<16x32xf32>
    %305 = arith.addf %303, %304 : vector<16x32xf32>
    %c0_89 = arith.constant 0 : index
    %c0_90 = arith.constant 0 : index
    %306 = vector.load %arg17[%c0_89, %c0_90] : memref<16x32xf32, #tpu.memory_space<vmem>>, vector<16x32xf32>
    tpu.vector_store %arg17[%c0_89, %c0_90], %305 {strides = array<i32>} : memref<16x32xf32, #tpu.memory_space<vmem>>, vector<16x32xf32>,
    %c1_i32 = arith.constant 1 : i32
    %307 = arith.cmpi eq, %arg1, %c1_i32 : i32
    %308 = arith.extui %307 : i1 to i32
    %c0_i32_91 = arith.constant 0 : i32
    %309 = arith.cmpi ne, %308, %c0_i32_91 : i32
    scf.if %309 {
      %310 = vector.shape_cast %305 : vector<16x32xf32> to vector<2x8x32xf32>
      %c0_92 = arith.constant 0 : index
      %c0_93 = arith.constant 0 : index
      %c0_94 = arith.constant 0 : index
      %311 = vector.load %arg16[%c0_92, %c0_93, %c0_94] : memref<2x8x32xf32, #tpu.memory_space<vmem>>, vector<2x8x32xf32>
      tpu.vector_store %arg16[%c0_92, %c0_93, %c0_94], %310 {strides = array<i32>} : memref<2x8x32xf32, #tpu.memory_space<vmem>>, vector<2x8x32xf32>,
    } else {
    }
    return
  }
  func.func @transform_0(%arg0: i32, %arg1: i32) -> (i32, i32, i32) {
    %c0_i32 = arith.constant 0 : i32
    %c0_i32_0 = arith.constant 0 : i32
    %c0_i32_1 = arith.constant 0 : i32
    return %arg0, %c0_i32, %c0_i32_0 : i32, i32, i32
  }
  func.func @transform_1(%arg0: i32, %arg1: i32) -> (i32, i32) {
    %c0_i32 = arith.constant 0 : i32
    %c0_i32_0 = arith.constant 0 : i32
    %c0_i32_1 = arith.constant 0 : i32
    return %c0_i32, %c0_i32_0 : i32, i32
  }
  func.func @transform_2(%arg0: i32, %arg1: i32) -> (i32, i32, i32) {
    %c0_i32 = arith.constant 0 : i32
    %c0_i32_0 = arith.constant 0 : i32
    %c0_i32_1 = arith.constant 0 : i32
    return %arg0, %c0_i32, %c0_i32_0 : i32, i32, i32
  }
  func.func @transform_3(%arg0: i32, %arg1: i32) -> (i32, i32, i32) {
    %c0_i32 = arith.constant 0 : i32
    %c0_i32_0 = arith.constant 0 : i32
    %c0_i32_1 = arith.constant 0 : i32
    return %arg0, %c0_i32, %c0_i32_0 : i32, i32, i32
  }
  func.func @transform_4(%arg0: i32, %arg1: i32) -> (i32, i32, i32) {
    %c0_i32 = arith.constant 0 : i32
    %c0_i32_0 = arith.constant 0 : i32
    %c0_i32_1 = arith.constant 0 : i32
    return %arg0, %c0_i32, %c0_i32_0 : i32, i32, i32
  }
  func.func @transform_5(%arg0: i32, %arg1: i32) -> (i32, i32, i32) {
    %c0_i32 = arith.constant 0 : i32
    %c0_i32_0 = arith.constant 0 : i32
    %c0_i32_1 = arith.constant 0 : i32
    return %arg1, %c0_i32, %c0_i32_0 : i32, i32, i32
  }
  func.func @transform_6(%arg0: i32, %arg1: i32) -> (i32, i32, i32) {
    %c0_i32 = arith.constant 0 : i32
    %c0_i32_0 = arith.constant 0 : i32
    %c0_i32_1 = arith.constant 0 : i32
    return %arg1, %c0_i32, %c0_i32_0 : i32, i32, i32
  }
  func.func @transform_7(%arg0: i32, %arg1: i32) -> (i32, i32, i32) {
    %c0_i32 = arith.constant 0 : i32
    %c0_i32_0 = arith.constant 0 : i32
    %c0_i32_1 = arith.constant 0 : i32
    return %arg1, %c0_i32, %c0_i32_0 : i32, i32, i32
  }
  func.func @transform_8(%arg0: i32, %arg1: i32) -> (i32, i32, i32) {
    %c0_i32 = arith.constant 0 : i32
    %c0_i32_0 = arith.constant 0 : i32
    %c0_i32_1 = arith.constant 0 : i32
    return %arg1, %c0_i32, %c0_i32_0 : i32, i32, i32
  }
  func.func @transform_9(%arg0: i32, %arg1: i32) -> (i32, i32, i32) {
    %c0_i32 = arith.constant 0 : i32
    %c0_i32_0 = arith.constant 0 : i32
    %c0_i32_1 = arith.constant 0 : i32
    return %arg1, %c0_i32, %c0_i32_0 : i32, i32, i32
  }
  func.func @transform_10(%arg0: i32, %arg1: i32) -> (i32, i32, i32) {
    %c0_i32 = arith.constant 0 : i32
    %c0_i32_0 = arith.constant 0 : i32
    %c0_i32_1 = arith.constant 0 : i32
    return %arg1, %c0_i32, %c0_i32_0 : i32, i32, i32
  }
  func.func @transform_11(%arg0: i32, %arg1: i32) -> (i32, i32, i32) {
    %c0_i32 = arith.constant 0 : i32
    %c0_i32_0 = arith.constant 0 : i32
    %c0_i32_1 = arith.constant 0 : i32
    return %arg1, %c0_i32, %c0_i32_0 : i32, i32, i32
  }
  func.func @transform_12(%arg0: i32, %arg1: i32) -> (i32, i32, i32) {
    %c0_i32 = arith.constant 0 : i32
    %c0_i32_0 = arith.constant 0 : i32
    %c0_i32_1 = arith.constant 0 : i32
    return %arg1, %c0_i32, %c0_i32_0 : i32, i32, i32
  }
  func.func @transform_13(%arg0: i32, %arg1: i32) -> (i32, i32, i32) {
    %c0_i32 = arith.constant 0 : i32
    %c0_i32_0 = arith.constant 0 : i32
    %c0_i32_1 = arith.constant 0 : i32
    return %arg1, %c0_i32, %c0_i32_0 : i32, i32, i32
  }
  func.func @transform_14(%arg0: i32, %arg1: i32) -> (i32, i32, i32) {
    %c0_i32 = arith.constant 0 : i32
    %c0_i32_0 = arith.constant 0 : i32
    %c0_i32_1 = arith.constant 0 : i32
    return %arg0, %c0_i32, %c0_i32_0 : i32, i32, i32
  }
}

</mosaic_0001>

<bundles_post_ra>
// kernel: tpu_custom_call.1
= control target key start
LH: loop header
LB: loop body
LE: loop exit
PB: predicated region body
PF: predicated region fallthrough
CT: control target
= control target key end

     0   :  { %s8175_s0 = inlined_call_operand.hbm [shape: f32[2,8,32], index: 0, kind: input, shape index: {}]   ;;  %s8176_s1 = inlined_call_operand.hbm [shape: f32[8,8], index: 1, kind: input, shape index: {}]   ;;  %s8177_s2 = inlined_call_operand.hbm [shape: f32[2,1,8], index: 2, kind: input, shape index: {}]   ;;  %s8178_s3 = inlined_call_operand.hbm [shape: f32[2,1,16], index: 3, kind: input, shape index: {}]   ;;  %s8179_s4 = inlined_call_operand.hbm [shape: bf16[2,16,32], index: 4, kind: input, shape index: {}]   ;;  %s8180_s5 = inlined_call_operand.hbm [shape: bf16[2,32,96], index: 5, kind: input, shape index: {}]   ;;  %s8181_s6 = inlined_call_operand.hbm [shape: bf16[2,32,32], index: 6, kind: input, shape index: {}]   ;;  %s8182_s7 = inlined_call_operand.hbm [shape: bf16[2,32,32], index: 7, kind: input, shape index: {}]   ;;  %s8183_s8 = inlined_call_operand.hbm [shape: bf16[2,32,64], index: 8, kind: input, shape index: {}]   ;;  %s8184_s9 = inlined_call_operand.hbm [shape: bf16[2,32,32], index: 9, kind: input, shape index: {}]   ;;  %s8185_s10 = inlined_call_operand.hbm [shape: bf16[2,32,64], index: 10, kind: input, shape index: {}]   ;;  %s8186_s11 = inlined_call_operand.hbm [shape: bf16[2,64,32], index: 11, kind: input, shape index: {}]   ;;  %s8187_s12 = inlined_call_operand.hbm [shape: f32[2,16,32], index: 12, kind: input, shape index: {}]   ;;  %s8188_s13 = inlined_call_operand.hbm [shape: f32[2,1,64], index: 13, kind: input, shape index: {}]   ;;  %s8189_s14 = inlined_call_operand.hbm [shape: f32[2,8,32], index: 14, kind: output, shape index: {}]  }
   0x1   :  { %8225 = sst [smem:[#allocation45_spill]] %s8176_s1 }
   0x2   :  { %8226 = sst [smem:[#allocation46_spill]] %s8178_s3 }
   0x3   :  { %8227 = sst [smem:[#allocation47_spill]] %s8180_s5 }
   0x4   :  { %8228 = sst [smem:[#allocation48_spill]] %s8182_s7 }
   0x5   :  { %8229 = sst [smem:[#allocation49_spill]] %s8184_s9 }
   0x6   :  { %8230 = sst [smem:[#allocation50_spill]] %s8188_s13 }
   0x7   :  { %8231 = sst [smem:[#allocation51_spill]] %s8189_s14 }
   0x8   :  { %19 = vsyncpa [#allocation4], 0 }
   0x9   :  { %20 = vsyncpa [#allocation7], 0 }
   0xa   :  { %21 = vsyncpa [#allocation10], 0 }
   0xb   :  { %22 = vsyncpa [#allocation13], 0 }
   0xc   :  { %24 = vsyncpa [#allocation13 + $0x1], 0 }
   0xd   :  { %25 = vsyncpa [#allocation16], 0 }
   0xe   :  { %27 = vsyncpa [#allocation16 + $0x1], 0 }
   0xf   :  { %28 = vsyncpa [#allocation19], 0 }
  0x10   :  { %30 = vsyncpa [#allocation19 + $0x1], 0 }
  0x11   :  { %31 = vsyncpa [#allocation22], 0 }
  0x12   :  { %33 = vsyncpa [#allocation22 + $0x1], 0 }
  0x13   :  { %34 = vsyncpa [#allocation25], 0 }
  0x14   :  { %36 = vsyncpa [#allocation25 + $0x1], 0 }
  0x15   :  { %37 = vsyncpa [#allocation5], 0  ;;  %s6890_s29 = smov 0   ;;  %s6892_s30 = smov 0  }
  0x16   :  { %s6894_s15 = smov 0   ;;  %s6896_s16 = smov 0  }
  0x17   :  { %s6898_s17 = smov 0   ;;  %s6900_s18 = smov 0  }
  0x18 LB: > { %8232 = sst [smem:[#allocation36_spill]] %s6762_s30  ;;  %s6919_s19 = sadd.s32 4294967295, %s6778_s18   ;;  %s6778_s18 = sphi %s6900_s18, %s43_s18   ;;  %s6774_s17 = sphi %s6898_s17, %s8294_s17   ;;  %s6770_s16 = sphi %s6896_s16, %s8293_s16   ;;  %s6766_s15 = sphi %s6894_s15, %s8291_s15   ;;  %s6762_s30 = sphi %s6892_s30, %s8290_s30   ;;  %s6758_s29 = sphi %s6890_s29, %s8289_s29  }
  0x19   : > { %8233 = sst [smem:[#allocation37_spill]] %s6766_s15  ;;  %p194_p0 = scmp.ne.s32.totalorder %s6766_s15, %s6762_s30 }
  0x1a   : > { %8234 = sst [smem:[#allocation38_spill]] %s6770_s16  ;;  %p195_p1 = scmp.eq.s32.totalorder %s6778_s18, 0 }
  0x1b   : > { %8235 = sst [smem:[#allocation39_spill]] %s6778_s18  ;;  %p200_p2 = scmp.ne.s32.totalorder %s6762_s30, %s6758_s29 }
  0x1c   : > { %8236 = sst [smem:[#allocation40_spill]] %s6919_s19  ;;  %p8193_p3 = scmp.eq.s32.totalorder %s6919_s19, 0 }
  0x1d   : > { %p196_p4 = por %p195_p1, %p194_p0  ;;  %p5467_p5 = scmp.ge.s32.totalorder %s6778_s18, 1 }
  0x1e   : > { %p6930_p6 = por %p8193_p3, %p200_p2  ;;  %p445_p7 = scmp.lt.s32.totalorder %s6778_s18, 3 }
  0x1f   : > { %s6780_s23 = smov [#allocation6]   ;;  %p6045_p10 = scmp.lt.s32.totalorder %s6778_s18, 2 }
  0x20   : > { %s8237_s21 = scalar_select %p6930_p6, 1, 0 }
  0x21   : > { %p6935_p8 = pnand %p5467_p5, %p445_p7  ;;  %s474_s24 = sshll.u32 %s6780_s23, 4  ;;  %s475_s24 = int_to_ptr.vmem [resolvable:$true] %s474_s24 }
  0x22   : > { %8238 = sst [smem:[#allocation41_spill]] %s8237_s21  ;;  %p6948_p12 = pnand %p6045_p10, %p196_p4 }
  0x23   : > { %s8239_s22 = scalar_select %p6935_p8, 1, 0 }
  0x24   : > { %p5996_p9 = pneg %p6935_p8  ;;  %s8243_s1 = sld [smem:[#allocation45_spill]] }
  0x25   : > { %8240 = sst [smem:[#allocation42_spill]] %s8239_s22 }
  0x26   : > { %p6944_p11 = pnand %p5996_p9, %p8193_p3 }
  0x27   : > { %s8242_s26 = scalar_select %p6948_p12, 1, 0 }
  0x28   : > { %s8241_s25 = scalar_select %p6944_p11, 1, 0 }
  0x29   : > { %p6960_p0 = pneg %p6944_p11 }
  0x2a   : > { %s6260_s29 = scalar_lea.hbm %s8243_s1, 128 }
  0x2b   : > { %p6261_p13 = scmp.ne.s32.totalorder %s8243_s1, %s6260_s29  ;;  %p6267_p4 = scmp.lt.u32.totalorder %s6260_s29, %s8243_s1 }
  0x2c   : > { %s8244_s14 = scalar_select %p6960_p0, 1, 0 }
  0x2d   : > { %p6263_p1 = pnand %p6960_p0, %p6261_p13 }
  0x2f   : > { %p6264_p2 = pneg %p6263_p1 }
  0x31   : > { %p6269_p5 = pnand %p6267_p4, %p6264_p2 }
  0x33   : > { %6272 = shalt.err (!%p6269_p5)
}
  0x34   : > { %s6273_s27 = scalar_lea.vmem %s475_s24, 128  ;;  %p6281_p3 = scmp.lt.s32.totalorder %s475_s24, %s475_s24 }
  0x35   : > { %p6274_p7 = scmp.ne.s32.totalorder %s475_s24, %s6273_s27  ;;  %p6282_p6 = scmp.lt.s32.totalorder %s6273_s27, %s6273_s27 }
  0x37   : > { %p6276_p9 = pnand %p6274_p7, %p6960_p0  ;;  %p6283_p8 = por %p6282_p6, %p6281_p3 }
  0x39   : > { %p6277_p10 = pneg %p6276_p9 }
  0x3b   : > { %p6284_p12 = pnand %p6283_p8, %p6277_p10 }
  0x3d   : > { %6287 = shalt.err (!%p6284_p12)
}
  0x3e   : > { %6002 = dma.hbm_to_vmem [thread:$0]  (!%p6944_p11), %s8243_s1, 128, %s475_s24, [#allocation7]  }
  0x3f   : > { %s6781_s16 = smov [#allocation9]   ;;  %s52_s29 = sadd.s32 1, %s6774_s17 }
  0x40   : > { %s503_s21 = sshll.u32 %s6781_s16, 4  ;;  %s8245_s3 = sld [smem:[#allocation46_spill]]  ;;  %s504_s21 = int_to_ptr.vmem [resolvable:$true] %s503_s21 }
  0x46   : > { %s6288_s19 = scalar_lea.hbm %s8245_s3, 32 }
  0x47   : > { %p6289_p3 = scmp.ne.s32.totalorder %s8245_s3, %s6288_s19  ;;  %p6295_p12 = scmp.lt.u32.totalorder %s6288_s19, %s8245_s3 }
  0x49   : > { %p6291_p6 = pnand %p6289_p3, %p6960_p0 }
  0x4b   : > { %p6292_p8 = pneg %p6291_p6 }
  0x4d   : > { %p6297_p13 = pnand %p6295_p12, %p6292_p8 }
  0x4f   : > { %6300 = shalt.err (!%p6297_p13)
}
  0x50   : > { %s6301_s24 = scalar_lea.vmem %s504_s21, 32  ;;  %p6309_p5 = scmp.lt.s32.totalorder %s504_s21, %s504_s21 }
  0x51   : > { %p6302_p1 = scmp.ne.s32.totalorder %s504_s21, %s6301_s24  ;;  %p6310_p7 = scmp.lt.s32.totalorder %s6301_s24, %s6301_s24 }
  0x53   : > { %p6304_p2 = pnand %p6302_p1, %p6960_p0  ;;  %p6311_p9 = por %p6310_p7, %p6309_p5 }
  0x55   : > { %p6305_p4 = pneg %p6304_p2 }
  0x57   : > { %p6312_p10 = pnand %p6311_p9, %p6305_p4 }
  0x59   : > { %6315 = shalt.err (!%p6312_p10)
}
  0x5a   : > { %s8203_s30 = smov 16   ;;  %s8204_s13 = smov 1  }
  0x5b   : > { %6008 = dma.hbm_to_vmem [thread:$0]  (!%p6944_p11), %s8245_s3, 32, %s504_s21, [#allocation10], %s8203_s30, %s8203_s30, %s8204_s13  }
  0x5c   : > { %p53_p3 = scmp.ge.s32.totalorder %s52_s29, 2  ;;  %s6999_s28 = sand.u32 1, %s6778_s18  }
  0x5d   : > { %s7004_s16 = sand.u32 1, %s6766_s15   ;;  %s7012_s20 = sshll.u32 %s6774_s17, 8 }
  0x5e   : > { %s8296_s29 = smov (%p53_p3, %s52_s29), 0  ;;  %s7009_s27 = sshll.u32 %s7004_s16, 4 }
  0x5f   : > { %8246 = sst [smem:[#allocation43_spill]] %s8296_s29  ;;  %s184_s23 = ssub.s32 %s6774_s17, %s8296_s29 }
  0x60   : > { %p185_p6 = scmp.eq.s32.totalorder %s184_s23, 0  ;;  %s538_s21 = scalar_lea.vmem [#allocation12], %s7009_s27 }
  0x61   : > { %s545_s24 = sshll.u32 %s538_s21, 4  ;;  %s8247_s19 = sadd.s32 1, %s6766_s15  ;;  %s7026_s24 = int_to_ptr.vmem [resolvable:$true] %s545_s24 }
  0x62   : > { %s7018_s22 = scalar_select %p185_p6, %s6766_s15, %s8247_s19  }
  0x63   : > { %s8249_s5 = sld [smem:[#allocation47_spill]]  ;;  %p8250_p12 = scmp.ne.s32.totalorder %s8242_s26, 0 }
  0x64   : > { %8248 = sst [smem:[#allocation44_spill]] %s7018_s22 }
  0x65   : > { %p7033_p13 = pneg %p8250_p12 }
  0x67   : > { %s8251_s21 = scalar_select %p7033_p13, 1, 0 }
  0x69   : > { %s7024_s1 = scalar_lea.hbm %s8249_s5, %s7012_s20  ;;  %s6321_s19 = scalar_lea.hbm %s8249_s5, 512 }
  0x6a   : > { %s6316_s3 = scalar_lea.hbm %s7024_s1, 256  ;;  %p6322_p4 = scmp.lt.u32.totalorder %s7024_s1, %s8249_s5 }
  0x6b   : > { %p6317_p8 = scmp.ne.s32.totalorder %s7024_s1, %s6316_s3  ;;  %p6323_p5 = scmp.lt.u32.totalorder %s6321_s19, %s6316_s3 }
  0x6c   : > { %p6325_p9 = scmp.lt.u32.totalorder %s6316_s3, %s7024_s1 }
  0x6d   : > { %p6319_p1 = pnand %p7033_p13, %p6317_p8  ;;  %p6324_p7 = por %p6323_p5, %p6322_p4 }
  0x6f   : > { %p6320_p2 = pneg %p6319_p1  ;;  %p6326_p10 = por %p6325_p9, %p6324_p7 }
  0x71   : > { %p6327_p3 = pnand %p6326_p10, %p6320_p2 }
  0x73   : > { %6330 = shalt.err (!%p6327_p3)
}
  0x74   : > { %s6331_s23 = scalar_lea.vmem %s7026_s24, 256  ;;  %s6784_s30 = smov [#allocation12]  }
  0x75   : > { %p6332_p6 = scmp.ne.s32.totalorder %s7026_s24, %s6331_s23  ;;  %s6336_s13 = sshll.u32 %s6784_s30, 4  ;;  %s6337_s13 = int_to_ptr.vmem [resolvable:$false] %s6336_s13 }
  0x76   : > { %s6338_s29 = scalar_lea.vmem %s6337_s13, 512  ;;  %p6339_p11 = scmp.lt.s32.totalorder %s7026_s24, %s6337_s13 }
  0x77   : > { %p6334_p8 = pnand %p6332_p6, %p7033_p13  ;;  %p6340_p0 = scmp.lt.s32.totalorder %s6338_s29, %s6331_s23 }
  0x79   : > { %p6335_p1 = pneg %p6334_p8  ;;  %p6341_p4 = por %p6340_p0, %p6339_p11 }
  0x7b   : > { %p6342_p5 = pnand %p6341_p4, %p6335_p1 }
  0x7d   : > { %6345 = shalt.err (!%p6342_p5)
}
  0x7e   : > { %s8216_s3 = smov 64   ;;  %s8218_s22 = smov 4  }
  0x7f   : > { %s8252_s19 = scalar_lea.sflag [#allocation13], %s6999_s28  ;;  %s8253_s7 = sld [smem:[#allocation48_spill]] }
  0x80   : > { %6015 = dma.hbm_to_vmem [thread:$0]  (!%p8250_p12), %s7024_s1, 256, %s7026_s24, %s8252_s19, %s8216_s3, %s8216_s3, %s8218_s22  }
  0x81   : > { %s580_s29 = scalar_lea.vmem [#allocation15], %s7009_s27  ;;  %s8212_s15 = scalar_lea.sflag [#allocation16], %s6999_s28 }
  0x82   : > { %s587_s5 = sshll.u32 %s580_s29, 4  ;;  %s7068_s5 = int_to_ptr.vmem [resolvable:$true] %s587_s5 }
  0x85   : > { %s7065_s13 = scalar_lea.hbm %s8253_s7, %s7012_s20  ;;  %s6351_s19 = scalar_lea.hbm %s8253_s7, 512 }
  0x86   : > { %s6346_s18 = scalar_lea.hbm %s7065_s13, 256  ;;  %p6352_p7 = scmp.lt.u32.totalorder %s7065_s13, %s8253_s7 }
  0x87   : > { %p6347_p11 = scmp.ne.s32.totalorder %s7065_s13, %s6346_s18  ;;  %p6353_p9 = scmp.lt.u32.totalorder %s6351_s19, %s6346_s18 }
  0x88   : > { %p6355_p3 = scmp.lt.u32.totalorder %s6346_s18, %s7065_s13 }
  0x89   : > { %p6349_p0 = pnand %p6347_p11, %p7033_p13  ;;  %p6354_p10 = por %p6353_p9, %p6352_p7 }
  0x8b   : > { %p6350_p2 = pneg %p6349_p0  ;;  %p6356_p6 = por %p6355_p3, %p6354_p10 }
  0x8d   : > { %p6357_p8 = pnand %p6356_p6, %p6350_p2 }
  0x8f   : > { %6360 = shalt.err (!%p6357_p8)
}
  0x90   : > { %s6361_s29 = scalar_lea.vmem %s7068_s5, 256  ;;  %s6787_s1 = smov [#allocation15]  }
  0x91   : > { %p6362_p1 = scmp.ne.s32.totalorder %s7068_s5, %s6361_s29  ;;  %s6366_s24 = sshll.u32 %s6787_s1, 4  ;;  %s6367_s24 = int_to_ptr.vmem [resolvable:$false] %s6366_s24 }
  0x92   : > { %s6368_s23 = scalar_lea.vmem %s6367_s24, 512  ;;  %p6369_p11 = scmp.lt.s32.totalorder %s7068_s5, %s6367_s24 }
  0x93   : > { %p6364_p4 = pnand %p6362_p1, %p7033_p13  ;;  %p6370_p0 = scmp.lt.s32.totalorder %s6368_s23, %s6361_s29 }
  0x95   : > { %p6365_p5 = pneg %p6364_p4  ;;  %p6371_p7 = por %p6370_p0, %p6369_p11 }
  0x97   : > { %p6372_p9 = pnand %p6371_p7, %p6365_p5 }
  0x99   : > { %6375 = shalt.err (!%p6372_p9)
}
  0x9a   : > { %6021 = dma.hbm_to_vmem [thread:$0]  (!%p8250_p12), %s7065_s13, 256, %s7068_s5, %s8212_s15, %s8216_s3, %s8216_s3, %s8218_s22  }
  0x9b   : > { %s8254_s9 = sld [smem:[#allocation49_spill]]  ;;  %s622_s29 = scalar_lea.vmem [#allocation18], %s7009_s27 }
  0x9c   : > { %s629_s1 = sshll.u32 %s622_s29, 4  ;;  %s5492_s24 = sshll.u32 %s7004_s16, 5  ;;  %s7104_s1 = int_to_ptr.vmem [resolvable:$true] %s629_s1 }
  0x9d   : > { %s8213_s23 = scalar_lea.sflag [#allocation19], %s6999_s28 }
  0xa1   : > { %s7101_s30 = scalar_lea.hbm %s8254_s9, %s7012_s20  ;;  %s6381_s18 = scalar_lea.hbm %s8254_s9, 512 }
  0xa2   : > { %s6376_s7 = scalar_lea.hbm %s7101_s30, 256  ;;  %p6382_p6 = scmp.lt.u32.totalorder %s7101_s30, %s8254_s9 }
  0xa3   : > { %p6377_p2 = scmp.ne.s32.totalorder %s7101_s30, %s6376_s7  ;;  %p6383_p8 = scmp.lt.u32.totalorder %s6381_s18, %s6376_s7 }
  0xa4   : > { %p6385_p4 = scmp.lt.u32.totalorder %s6376_s7, %s7101_s30 }
  0xa5   : > { %p6379_p10 = pnand %p6377_p2, %p7033_p13  ;;  %p6384_p1 = por %p6383_p8, %p6382_p6 }
  0xa7   : > { %p6380_p3 = pneg %p6379_p10  ;;  %p6386_p5 = por %p6385_p4, %p6384_p1 }
  0xa9   : > { %p6387_p11 = pnand %p6386_p5, %p6380_p3 }
  0xab   : > { %6390 = shalt.err (!%p6387_p11)
}
  0xac   : > { %s6391_s29 = scalar_lea.vmem %s7104_s1, 256  ;;  %s6788_s5 = smov [#allocation18]  }
  0xad   : > { %p6392_p0 = scmp.ne.s32.totalorder %s7104_s1, %s6391_s29  ;;  %s6396_s13 = sshll.u32 %s6788_s5, 4  ;;  %s6397_s13 = int_to_ptr.vmem [resolvable:$false] %s6396_s13 }
  0xae   : > { %s6398_s15 = scalar_lea.vmem %s6397_s13, 512  ;;  %p6399_p2 = scmp.lt.s32.totalorder %s7104_s1, %s6397_s13 }
  0xaf   : > { %p6394_p7 = pnand %p6392_p0, %p7033_p13  ;;  %p6400_p10 = scmp.lt.s32.totalorder %s6398_s15, %s6391_s29 }
  0xb1   : > { %p6395_p9 = pneg %p6394_p7  ;;  %p6401_p6 = por %p6400_p10, %p6399_p2 }
  0xb3   : > { %p6402_p8 = pnand %p6401_p6, %p6395_p9 }
  0xb5   : > { %6405 = shalt.err (!%p6402_p8)
}
  0xb6   : > { %6027 = dma.hbm_to_vmem [thread:$0]  (!%p8250_p12), %s7101_s30, 256, %s7104_s1, %s8213_s23, %s8216_s3, %s8216_s3, %s8218_s22  }
  0xb7   : > { %s5612_s7 = sshll.u32 %s6774_s17, 9  ;;  %s664_s5 = scalar_lea.vmem [#allocation21], %s5492_s24 }
  0xb8   : > { %s7138_s29 = scalar_lea.hbm %s8186_s11, %s5612_s7  ;;  %s671_s13 = sshll.u32 %s664_s5, 4  ;;  %s7142_s13 = int_to_ptr.vmem [resolvable:$true] %s671_s13 }
  0xb9   : > { %s8215_s15 = scalar_lea.sflag [#allocation22], %s6999_s28  ;;  %s6406_s9 = scalar_lea.hbm %s7138_s29, 512 }
  0xba   : > { %p6407_p3 = scmp.ne.s32.totalorder %s7138_s29, %s6406_s9  ;;  %s6411_s7 = scalar_lea.hbm %s8186_s11, 1024 }
  0xbb   : > { %p6412_p5 = scmp.lt.u32.totalorder %s7138_s29, %s8186_s11  ;;  %p6413_p11 = scmp.lt.u32.totalorder %s6411_s7, %s6406_s9 }
  0xbc   : > { %p6409_p1 = pnand %p6407_p3, %p7033_p13  ;;  %p6415_p7 = scmp.lt.u32.totalorder %s6406_s9, %s7138_s29 }
  0xbd   : > { %p6414_p0 = por %p6413_p11, %p6412_p5 }
  0xbe   : > { %p6410_p4 = pneg %p6409_p1 }
  0xbf   : > { %p6416_p9 = por %p6415_p7, %p6414_p0 }
  0xc1   : > { %p6417_p2 = pnand %p6416_p9, %p6410_p4 }
  0xc3   : > { %6420 = shalt.err (!%p6417_p2)
}
  0xc4   : > { %s6421_s24 = scalar_lea.vmem %s7142_s13, 512  ;;  %s6789_s5 = smov [#allocation21]  }
  0xc5   : > { %p6422_p10 = scmp.ne.s32.totalorder %s7142_s13, %s6421_s24  ;;  %s6426_s30 = sshll.u32 %s6789_s5, 4  ;;  %s6427_s30 = int_to_ptr.vmem [resolvable:$false] %s6426_s30 }
  0xc6   : > { %s6428_s1 = scalar_lea.vmem %s6427_s30, 1024  ;;  %p6429_p3 = scmp.lt.s32.totalorder %s7142_s13, %s6427_s30 }
  0xc7   : > { %p6424_p6 = pnand %p6422_p10, %p7033_p13  ;;  %p6430_p1 = scmp.lt.s32.totalorder %s6428_s1, %s6421_s24 }
  0xc9   : > { %p6425_p8 = pneg %p6424_p6  ;;  %p6431_p5 = por %p6430_p1, %p6429_p3 }
  0xcb   : > { %p6432_p11 = pnand %p6431_p5, %p6425_p8 }
  0xcd   : > { %6435 = shalt.err (!%p6432_p11)
}
  0xce   : > { %6033 = dma.hbm_to_vmem [thread:$0]  (!%p8250_p12), %s7138_s29, 512, %s7142_s13, %s8215_s15, %s8216_s3, %s8216_s3, %s8218_s22  }
  0xcf   : > { %s6790_s9 = smov [#allocation3]   ;;  %s6436_s24 = scalar_lea.hbm %s8175_s0, 256 }
  0xd0   : > { %s460_s7 = sshll.u32 %s6790_s9, 4  ;;  %p6437_p4 = scmp.ne.s32.totalorder %s8175_s0, %s6436_s24  ;;  %s461_s7 = int_to_ptr.vmem [resolvable:$true] %s460_s7 }
  0xd1   : > { %p8255_p0 = scmp.ne.s32.totalorder %s8244_s14, 0  ;;  %p6443_p2 = scmp.lt.u32.totalorder %s6436_s24, %s8175_s0 }
  0xd3   : > { %p6439_p7 = pnand %p6437_p4, %p8255_p0 }
  0xd5   : > { %p6440_p9 = pneg %p6439_p7 }
  0xd7   : > { %p6445_p10 = pnand %p6443_p2, %p6440_p9 }
  0xd9   : > { %6448 = shalt.err (!%p6445_p10)
}
  0xda   : > { %s6449_s29 = scalar_lea.vmem %s461_s7, 256  ;;  %p6457_p1 = scmp.lt.s32.totalorder %s461_s7, %s461_s7 }
  0xdb   : > { %p6450_p6 = scmp.ne.s32.totalorder %s461_s7, %s6449_s29  ;;  %p6458_p5 = scmp.lt.s32.totalorder %s6449_s29, %s6449_s29 }
  0xdd   : > { %p6452_p8 = pnand %p6450_p6, %p8255_p0  ;;  %p6459_p11 = por %p6458_p5, %p6457_p1 }
  0xdf   : > { %p6453_p3 = pneg %p6452_p8 }
  0xe1   : > { %p6460_p12 = pnand %p6459_p11, %p6453_p3 }
  0xe3   : > { %6463 = shalt.err (!%p6460_p12)
}
  0xe4   : > { %s8222_s13 = smov 128   ;;  %s8223_s9 = smov 8  }
  0xe5   : > { %p8256_p4 = scmp.ne.s32.totalorder %s8241_s25, 0  ;;  %s6793_s19 = smov [#allocation8]  }
  0xe6   : > { %s487_s24 = sshll.u32 %s6793_s19, 4  ;;  %s6794_s5 = smov [#allocation11]   ;;  %s488_s24 = int_to_ptr.vmem [resolvable:$true] %s487_s24 }
  0xe7   : > { %5999 = dma.hbm_to_vmem [thread:$0]  (!%p8256_p4), %s8175_s0, 256, %s461_s7, [#allocation4], %s8222_s13, %s8222_s13, %s8223_s9  }
  0xe8   : > { %s520_s30 = sshll.u32 %s6794_s5, 4  ;;  %s6464_s15 = scalar_lea.hbm %s8177_s2, 32  ;;  %s7192_s30 = int_to_ptr.vmem [resolvable:$true] %s520_s30 }
  0xe9   : > { %p6465_p12 = scmp.ne.s32.totalorder %s8177_s2, %s6464_s15  ;;  %p6471_p2 = scmp.lt.u32.totalorder %s6464_s15, %s8177_s2 }
  0xeb   : > { %p6467_p7 = pnand %p6465_p12, %p8255_p0 }
  0xed   : > { %p6468_p9 = pneg %p6467_p7 }
  0xef   : > { %p6473_p10 = pnand %p6471_p2, %p6468_p9 }
  0xf1   : > { %6476 = shalt.err (!%p6473_p10)
}
  0xf2   : > { %s6477_s18 = scalar_lea.vmem %s488_s24, 32  ;;  %p6485_p1 = scmp.lt.s32.totalorder %s488_s24, %s488_s24 }
  0xf3   : > { %p6478_p6 = scmp.ne.s32.totalorder %s488_s24, %s6477_s18  ;;  %p6486_p5 = scmp.lt.s32.totalorder %s6477_s18, %s6477_s18 }
  0xf5   : > { %p6480_p8 = pnand %p6478_p6, %p8255_p0  ;;  %p6487_p11 = por %p6486_p5, %p6485_p1 }
  0xf7   : > { %p6481_p3 = pneg %p6480_p8 }
  0xf9   : > { %p6488_p13 = pnand %p6487_p11, %p6481_p3 }
  0xfb   : > { %6491 = shalt.err (!%p6488_p13)
}
  0xfc   : > { %s8257_s3 = smov 1   ;;  %s8258_s22 = smov 16  }
  0xfd   : > { %6005 = dma.hbm_to_vmem [thread:$0]  (!%p8256_p4), %s8177_s2, 32, %s488_s24, [#allocation7], %s8258_s22, %s8258_s22, %s8257_s3  }
  0xfe   : > { %s6492_s29 = scalar_lea.hbm %s8179_s4, 256 }
  0xff   : > { %p6493_p12 = scmp.ne.s32.totalorder %s8179_s4, %s6492_s29  ;;  %p6499_p9 = scmp.lt.u32.totalorder %s6492_s29, %s8179_s4 }
 0x101   : > { %p6495_p13 = pnand %p6493_p12, %p8255_p0 }
 0x103   : > { %p6496_p7 = pneg %p6495_p13 }
 0x105   : > { %p6501_p2 = pnand %p6499_p9, %p6496_p7 }
 0x107   : > { %6504 = shalt.err (!%p6501_p2)
}
 0x108   : > { %s6505_s24 = scalar_lea.vmem %s7192_s30, 256  ;;  %p6513_p3 = scmp.lt.s32.totalorder %s7192_s30, %s7192_s30 }
 0x109   : > { %p6506_p10 = scmp.ne.s32.totalorder %s7192_s30, %s6505_s24  ;;  %p6514_p1 = scmp.lt.s32.totalorder %s6505_s24, %s6505_s24 }
 0x10b   : > { %p6508_p6 = pnand %p6506_p10, %p8255_p0  ;;  %p6515_p5 = por %p6514_p1, %p6513_p3 }
 0x10d   : > { %p6509_p8 = pneg %p6508_p6 }
 0x10f   : > { %p6516_p11 = pnand %p6515_p5, %p6509_p8 }
 0x111   : > { %6519 = shalt.err (!%p6516_p11)
}
 0x112   : > { %s8259_s13 = smov 4   ;;  %s8260_s3 = smov 64  }
 0x113   : > { %6011 = dma.hbm_to_vmem [thread:$0]  (!%p8256_p4), %s8179_s4, 256, %s7192_s30, [#allocation10], %s8260_s3, %s8260_s3, %s8259_s13  }
 0x114   : > { %s7245_s5 = scalar_lea.hbm %s8181_s6, %s7012_s20  ;;  %s559_s25 = scalar_lea.vmem [#allocation14], %s7009_s27 }
 0x115   : > { %s566_s1 = sshll.u32 %s559_s25, 4  ;;  %s7254_s7 = scalar_lea.hbm %s8183_s8, %s7012_s20  ;;  %s7248_s1 = int_to_ptr.vmem [resolvable:$true] %s566_s1 }
 0x116   : > { %s6520_s18 = scalar_lea.hbm %s7245_s5, 256  ;;  %p8261_p4 = scmp.ne.s32.totalorder %s8251_s21, 0 }
 0x117   : > { %p6521_p0 = scmp.ne.s32.totalorder %s7245_s5, %s6520_s18  ;;  %s6525_s22 = scalar_lea.hbm %s8181_s6, 512 }
 0x118   : > { %p6526_p7 = scmp.lt.u32.totalorder %s7245_s5, %s8181_s6  ;;  %p6527_p9 = scmp.lt.u32.totalorder %s6525_s22, %s6520_s18 }
 0x119   : > { %p6523_p12 = pnand %p6521_p0, %p8261_p4  ;;  %p6529_p10 = scmp.lt.u32.totalorder %s6520_s18, %s7245_s5 }
 0x11a   : > { %p6528_p2 = por %p6527_p9, %p6526_p7 }
 0x11b   : > { %p6524_p13 = pneg %p6523_p12 }
 0x11c   : > { %p6530_p6 = por %p6529_p10, %p6528_p2 }
 0x11e   : > { %p6531_p8 = pnand %p6530_p6, %p6524_p13 }
 0x120   : > { %6534 = shalt.err (!%p6531_p8)
}
 0x121   : > { %s6535_s15 = scalar_lea.vmem %s7248_s1, 256  ;;  %s6795_s25 = smov [#allocation14]  }
 0x122   : > { %p6536_p3 = scmp.ne.s32.totalorder %s7248_s1, %s6535_s15  ;;  %s6540_s29 = sshll.u32 %s6795_s25, 4  ;;  %s6541_s29 = int_to_ptr.vmem [resolvable:$false] %s6540_s29 }
 0x123   : > { %s6542_s23 = scalar_lea.vmem %s6541_s29, 512  ;;  %p6543_p11 = scmp.lt.s32.totalorder %s7248_s1, %s6541_s29 }
 0x124   : > { %p6538_p1 = pnand %p6536_p3, %p8261_p4  ;;  %p6544_p0 = scmp.lt.s32.totalorder %s6542_s23, %s6535_s15 }
 0x126   : > { %p6539_p5 = pneg %p6538_p1  ;;  %p6545_p12 = por %p6544_p0, %p6543_p11 }
 0x128   : > { %p6546_p7 = pnand %p6545_p12, %p6539_p5 }
 0x12a   : > { %6549 = shalt.err (!%p6546_p7)
}
 0x12b   : > { %p8262_p13 = scmp.ne.s32.totalorder %s8242_s26, 0  ;;  %s8263_s18 = scalar_lea.sflag [#allocation13], %s6999_s28 }
 0x12c   : > { %s601_s30 = scalar_lea.vmem [#allocation17], %s7009_s27  ;;  %s7289_s14 = scalar_lea.hbm %s8185_s10, %s7012_s20 }
 0x12d   : > { %6018 = dma.hbm_to_vmem [thread:$0]  (!%p8262_p13), %s7245_s5, 256, %s7248_s1, %s8263_s18, %s8260_s3, %s8260_s3, %s8259_s13  }
 0x12e   : > { %s608_s24 = sshll.u32 %s601_s30, 4  ;;  %s6550_s15 = scalar_lea.hbm %s7254_s7, 256  ;;  %s7283_s24 = int_to_ptr.vmem [resolvable:$true] %s608_s24 }
 0x12f   : > { %p6551_p9 = scmp.ne.s32.totalorder %s7254_s7, %s6550_s15  ;;  %s6555_s23 = scalar_lea.hbm %s8183_s8, 512 }
 0x130   : > { %p6556_p6 = scmp.lt.u32.totalorder %s7254_s7, %s8183_s8  ;;  %p6557_p8 = scmp.lt.u32.totalorder %s6555_s23, %s6550_s15 }
 0x131   : > { %p6553_p2 = pnand %p6551_p9, %p8261_p4  ;;  %p6559_p1 = scmp.lt.u32.totalorder %s6550_s15, %s7254_s7 }
 0x132   : > { %p6558_p3 = por %p6557_p8, %p6556_p6 }
 0x133   : > { %p6554_p10 = pneg %p6553_p2 }
 0x134   : > { %p6560_p5 = por %p6559_p1, %p6558_p3 }
 0x136   : > { %p6561_p11 = pnand %p6560_p5, %p6554_p10 }
 0x138   : > { %6564 = shalt.err (!%p6561_p11)
}
 0x139   : > { %s6565_s1 = scalar_lea.vmem %s7283_s24, 256  ;;  %s6796_s18 = smov [#allocation17]  }
 0x13a   : > { %p6566_p0 = scmp.ne.s32.totalorder %s7283_s24, %s6565_s1  ;;  %s6570_s30 = sshll.u32 %s6796_s18, 4  ;;  %s6571_s30 = int_to_ptr.vmem [resolvable:$false] %s6570_s30 }
 0x13b   : > { %s6572_s9 = scalar_lea.vmem %s6571_s30, 512  ;;  %p6573_p9 = scmp.lt.s32.totalorder %s7283_s24, %s6571_s30 }
 0x13c   : > { %p6568_p12 = pnand %p6566_p0, %p8261_p4  ;;  %p6574_p2 = scmp.lt.s32.totalorder %s6572_s9, %s6565_s1 }
 0x13e   : > { %p6569_p7 = pneg %p6568_p12  ;;  %p6575_p6 = por %p6574_p2, %p6573_p9 }
 0x140   : > { %p6576_p8 = pnand %p6575_p6, %p6569_p7 }
 0x142   : > { %6579 = shalt.err (!%p6576_p8)
}
 0x143   : > { %s8264_s22 = scalar_lea.sflag [#allocation16], %s6999_s28  ;;  %s643_s19 = scalar_lea.vmem [#allocation20], %s7009_s27 }
 0x144   : > { %6024 = dma.hbm_to_vmem [thread:$0]  (!%p8262_p13), %s7254_s7, 256, %s7283_s24, %s8264_s22, %s8260_s3, %s8260_s3, %s8259_s13  }
 0x145   : > { %s650_s15 = sshll.u32 %s643_s19, 4  ;;  %s7324_s23 = scalar_lea.hbm %s8187_s12, %s7012_s20  ;;  %s7318_s15 = int_to_ptr.vmem [resolvable:$true] %s650_s15 }
 0x146   : > { %s6580_s5 = scalar_lea.hbm %s7289_s14, 256  ;;  %s6585_s30 = scalar_lea.hbm %s8185_s10, 512 }
 0x147   : > { %p6581_p10 = scmp.ne.s32.totalorder %s7289_s14, %s6580_s5  ;;  %p6586_p5 = scmp.lt.u32.totalorder %s7289_s14, %s8185_s10 }
 0x148   : > { %p6587_p11 = scmp.lt.u32.totalorder %s6585_s30, %s6580_s5  ;;  %p6589_p12 = scmp.lt.u32.totalorder %s6580_s5, %s7289_s14 }
 0x149   : > { %p6583_p3 = pnand %p6581_p10, %p8261_p4 }
 0x14a   : > { %p6588_p0 = por %p6587_p11, %p6586_p5 }
 0x14b   : > { %p6584_p1 = pneg %p6583_p3 }
 0x14c   : > { %p6590_p7 = por %p6589_p12, %p6588_p0 }
 0x14e   : > { %p6591_p9 = pnand %p6590_p7, %p6584_p1 }
 0x150   : > { %6594 = shalt.err (!%p6591_p9)
}
 0x151   : > { %s6595_s20 = scalar_lea.vmem %s7318_s15, 256  ;;  %s6797_s24 = smov [#allocation20]  }
 0x152   : > { %p6596_p2 = scmp.ne.s32.totalorder %s7318_s15, %s6595_s20  ;;  %s6600_s22 = sshll.u32 %s6797_s24, 4  ;;  %s6601_s22 = int_to_ptr.vmem [resolvable:$false] %s6600_s22 }
 0x153   : > { %s6602_s19 = scalar_lea.vmem %s6601_s22, 512  ;;  %p6603_p10 = scmp.lt.s32.totalorder %s7318_s15, %s6601_s22 }
 0x154   : > { %p6598_p6 = pnand %p6596_p2, %p8261_p4  ;;  %p6604_p3 = scmp.lt.s32.totalorder %s6602_s19, %s6595_s20 }
 0x156   : > { %p6599_p8 = pneg %p6598_p6  ;;  %p6605_p5 = por %p6604_p3, %p6603_p10 }
 0x158   : > { %p6606_p11 = pnand %p6605_p5, %p6599_p8 }
 0x15a   : > { %6609 = shalt.err (!%p6606_p11)
}
 0x15b   : > { %s8265_s25 = scalar_lea.sflag [#allocation19], %s6999_s28  ;;  %s685_s29 = scalar_lea.vmem [#allocation23], %s7009_s27 }
 0x15c   : > { %6030 = dma.hbm_to_vmem [thread:$0]  (!%p8262_p13), %s7289_s14, 256, %s7318_s15, %s8265_s25, %s8260_s3, %s8260_s3, %s8259_s13  }
 0x15d   : > { %s692_s5 = sshll.u32 %s685_s29, 4  ;;  %s6610_s1 = scalar_lea.hbm %s7324_s23, 256  ;;  %s7353_s5 = int_to_ptr.vmem [resolvable:$true] %s692_s5 }
 0x15e   : > { %p6611_p1 = scmp.ne.s32.totalorder %s7324_s23, %s6610_s1  ;;  %s6615_s9 = scalar_lea.hbm %s8187_s12, 512 }
 0x15f   : > { %p6616_p7 = scmp.lt.u32.totalorder %s7324_s23, %s8187_s12  ;;  %p6617_p9 = scmp.lt.u32.totalorder %s6615_s9, %s6610_s1 }
 0x160   : > { %p6613_p0 = pnand %p6611_p1, %p8261_p4  ;;  %p6619_p6 = scmp.lt.u32.totalorder %s6610_s1, %s7324_s23 }
 0x161   : > { %p6618_p2 = por %p6617_p9, %p6616_p7 }
 0x162   : > { %p6614_p12 = pneg %p6613_p0 }
 0x163   : > { %p6620_p8 = por %p6619_p6, %p6618_p2 }
 0x165   : > { %p6621_p10 = pnand %p6620_p8, %p6614_p12 }
 0x167   : > { %6624 = shalt.err (!%p6621_p10)
}
 0x168   : > { %s6625_s27 = scalar_lea.vmem %s7353_s5, 256  ;;  %s6798_s13 = smov [#allocation23]  }
 0x169   : > { %p6626_p3 = scmp.ne.s32.totalorder %s7353_s5, %s6625_s27  ;;  %s6630_s3 = sshll.u32 %s6798_s13, 4  ;;  %s6631_s3 = int_to_ptr.vmem [resolvable:$false] %s6630_s3 }
 0x16a   : > { %s6632_s14 = scalar_lea.vmem %s6631_s3, 512  ;;  %p6633_p1 = scmp.lt.s32.totalorder %s7353_s5, %s6631_s3 }
 0x16b   : > { %p6628_p5 = pnand %p6626_p3, %p8261_p4  ;;  %p6634_p0 = scmp.lt.s32.totalorder %s6632_s14, %s6625_s27 }
 0x16d   : > { %p6629_p11 = pneg %p6628_p5  ;;  %p6635_p7 = por %p6634_p0, %p6633_p1 }
 0x16f   : > { %p6636_p9 = pnand %p6635_p7, %p6629_p11 }
 0x171   : > { %6639 = shalt.err (!%p6636_p9)
}
 0x172   : > { %s8266_s15 = smov 8   ;;  %s8267_s24 = smov 128  }
 0x173   : > { %s8268_s22 = scalar_lea.sflag [#allocation22], %s6999_s28  ;;  %s5498_s19 = sshll.u32 %s6774_s17, 4 }
 0x174   : > { %6036 = dma.hbm_to_vmem [thread:$0]  (!%p8262_p13), %s7324_s23, 256, %s7353_s5, %s8268_s22, %s8267_s24, %s8267_s24, %s8266_s15  }
 0x175   : > { %s705_s25 = scalar_lea.vmem [#allocation24], %s7004_s16  ;;  %s8269_s30 = sld [smem:[#allocation50_spill]] }
 0x176   : > { %s712_s29 = sshll.u32 %s705_s25, 4  ;;  %s703_s28 = scalar_lea.sflag [#allocation25], %s7004_s16  ;;  %s713_s29 = int_to_ptr.vmem [resolvable:$true] %s712_s29 }
 0x17b   : > { %s8270_s9 = smov %s8269_s30  ;;  %s7386_s7 = scalar_lea.hbm %s8269_s30, %s5498_s19 }
 0x17c   : > { %s6640_s20 = scalar_lea.hbm %s7386_s7, 16  ;;  %s6645_s27 = scalar_lea.hbm %s8270_s9, 32 }
 0x17d   : > { %p6641_p12 = scmp.ne.s32.totalorder %s7386_s7, %s6640_s20  ;;  %p6646_p8 = scmp.lt.u32.totalorder %s7386_s7, %s8270_s9 }
 0x17e   : > { %p6647_p10 = scmp.lt.u32.totalorder %s6645_s27, %s6640_s20  ;;  %p6649_p5 = scmp.lt.u32.totalorder %s6640_s20, %s7386_s7 }
 0x17f   : > { %p6643_p2 = pnand %p6641_p12, %p8261_p4 }
 0x180   : > { %p6648_p3 = por %p6647_p10, %p6646_p8 }
 0x181   : > { %p6644_p6 = pneg %p6643_p2 }
 0x182   : > { %p6650_p11 = por %p6649_p5, %p6648_p3 }
 0x184   : > { %p6651_p1 = pnand %p6650_p11, %p6644_p6 }
 0x186   : > { %6654 = shalt.err (!%p6651_p1)
}
 0x187   : > { %s6655_s16 = scalar_lea.vmem %s713_s29, 16  ;;  %s6799_s14 = smov [#allocation24]  }
 0x188   : > { %p6656_p0 = scmp.ne.s32.totalorder %s713_s29, %s6655_s16  ;;  %s6660_s15 = sshll.u32 %s6799_s14, 4  ;;  %s6661_s15 = int_to_ptr.vmem [resolvable:$false] %s6660_s15 }
 0x189   : > { %s6662_s24 = scalar_lea.vmem %s6661_s15, 32  ;;  %p6663_p12 = scmp.lt.s32.totalorder %s713_s29, %s6661_s15 }
 0x18a   : > { %p6658_p7 = pnand %p6656_p0, %p8261_p4  ;;  %p6664_p2 = scmp.lt.s32.totalorder %s6662_s24, %s6655_s16 }
 0x18c   : > { %p6659_p9 = pneg %p6658_p7  ;;  %p6665_p13 = por %p6664_p2, %p6663_p12 }
 0x18e   : > { %p6666_p8 = pnand %p6665_p13, %p6659_p9 }
 0x190   : > { %6669 = shalt.err (!%p6666_p8)
}
 0x191   : > { %p8271_p10 = scmp.ne.s32.totalorder %s8242_s26, 0  ;;  %s8272_s22 = sld [smem:[#allocation42_spill]] }
 0x193   : > { %6039 = dma.hbm_to_vmem [thread:$0]  (!%p8271_p10), %s7386_s7, 16, %s713_s29, %s703_s28  }
 0x197   : > { %p8273_p6 = scmp.ne.s32.totalorder %s8272_s22, 0 }
 0x198   : > { %s8274_s19 = sld [smem:[#allocation40_spill]] (!%p8273_p6) }
 0x199   : > { %721 = sbr.rel (%p8273_p6) target bundleno = 6854 (0x1ac6), region = 76 }
 0x19e   : > { %p8275_p3 = scmp.eq.s32.totalorder (!%p8273_p6), %s8274_s19, 0 }
 0x1a0   : > { %6721 = dma.done.wait (%p8275_p3), [#allocation4], 256   ;;  %p8276_p4 = pmov %p8275_p3 }
 0x1a1   : > { %p8277_p5 = pmov %p8275_p3 }
 0x1a2   : > { %6723 = vsyncadd (%p8276_p4), [#allocation4], 4294967040 }
 0x1a3   : > { %6725 = dma.done.wait (%p8277_p5), [#allocation7], 160   ;;  %p8278_p11 = pmov %p8275_p3 }
 0x1a4   : > { %p8279_p13 = pmov %p8275_p3 }
 0x1a5   : > { %6727 = vsyncadd (%p8278_p11), [#allocation7], 4294967136 }
 0x1a6   : > { %6729 = dma.done.wait (%p8279_p13), [#allocation10], 288   ;;  %p8280_p1 = pmov %p8275_p3 }
 0x1a7   : > { %s8281_s26 = sld [smem:[#allocation36_spill]]  ;;  %s8282_s21 = sld [smem:[#allocation41_spill]] }
 0x1a8   : > { %6731 = vsyncadd (%p8280_p1), [#allocation10], 4294967008  ;;  %s743_s25 = sand.u32 1, %s8274_s19  }
 0x1a9   : > { %s744_s18 = scalar_lea.sflag [#allocation13], %s743_s25 }
 0x1ad   : > { %s7422_s29 = sand.u32 1, %s8281_s26   ;;  %p8283_p0 = scmp.ne.s32.totalorder %s8282_s21, 0 }
 0x1ae   : > { %s7425_s1 = sshll.u32 %s7422_s29, 4 }
 0x1af   : > { %s747_s30 = scalar_lea.vmem [#allocation12], %s7425_s1 }
 0x1b0   : > { %6733 = dma.done.wait (%p8283_p0), %s744_s18, 512  }
 0x1b1   : > { %6735 = vsyncadd (%p8283_p0), %s744_s18, 4294966784  ;;  %s756_s7 = scalar_lea.vmem [#allocation14], %s7425_s1  ;;  %s762_s28 = scalar_lea.sflag [#allocation16], %s743_s25 }
 0x1b2   : > { %s765_s20 = scalar_lea.vmem [#allocation15], %s7425_s1 }
 0x1b3   : > { %6737 = dma.done.wait (%p8283_p0), %s762_s28, 512  }
 0x1b4   : > { %6739 = vsyncadd (%p8283_p0), %s762_s28, 4294966784  ;;  %s774_s23 = scalar_lea.vmem [#allocation17], %s7425_s1  ;;  %s780_s5 = scalar_lea.sflag [#allocation19], %s743_s25 }
 0x1b5   : > { %s783_s27 = scalar_lea.vmem [#allocation18], %s7425_s1 }
 0x1b6   : > { %6741 = dma.done.wait (%p8283_p0), %s780_s5, 512  }
 0x1b7   : > { %6743 = vsyncadd (%p8283_p0), %s780_s5, 4294966784  ;;  %s5511_s13 = sshll.u32 %s7422_s29, 5  ;;  %s792_s3 = scalar_lea.vmem [#allocation20], %s7425_s1 }
 0x1b8   : > { %s798_s16 = scalar_lea.sflag [#allocation22], %s743_s25  ;;  %s7446_s14 = scalar_lea.vmem [#allocation21], %s5511_s13 }
 0x1b9   : > { %6745 = dma.done.wait (%p8283_p0), %s798_s16, 768  }
 0x1ba   : > { %6747 = vsyncadd (%p8283_p0), %s798_s16, 4294966528  ;;  %s7453_s15 = scalar_lea.vmem [#allocation23], %s7425_s1  ;;  %s816_s24 = scalar_lea.sflag [#allocation25], %s7422_s29 }
 0x1bb   : > { %s818_s22 = scalar_lea.vmem [#allocation24], %s7422_s29 }
 0x1bc   : > { %6749 = dma.done.wait (%p8283_p0), %s816_s24, 16  }
 0x1bd   : > { %6751 = vsyncadd (%p8283_p0), %s816_s24, 4294967280  ;;  %s8284_s19 = sld [smem:[#allocation38_spill]] }
 0x1c3   : > { %p5513_p7 = scmp.ne.s32.totalorder %s8284_s19, 0 }
 0x1c4   : > { %v907_v0 = vld [vmem:[#allocation3] sm:$0xff] (!%p5513_p7)  ;;  %vm909_vm0 = vcmask (!%p5513_p7), 261120   ;;  %v908_v1 = vld [vmem:[#allocation3 + $0x8] sm:$0xff] (!%p5513_p7) }
 0x1c5   : > { %906 = sbr.rel (%p5513_p7) target bundleno = 460 (0x1cc), region = 136  ;;  %910 = vst.msk [vmem:[#allocation2] sm:$0xff] (!%p5513_p7), %vm909_vm0, %v907_v0  ;;  %911 = vst.msk [vmem:[#allocation2 + $0x8] sm:$0xff] (!%p5513_p7), %vm909_vm0, %v908_v1 }
 0x1cc PF: > { %v6158_v2 = vld [vmem:[%s747_s30] sm:$0xff]   ;;  %v987_v3 = vlaneseq  ;;  %v6800_v4 = vmov 0.0   ;;  %v6159_v5 = vld [vmem:[%s747_s30 + $0x8] sm:$0xff]   ;;  %vm6801_vm1 = vmmov 0   ;;  %vm942_vm2 = vcmask 261120   ;;  %s6802_s26 = smov 32  }
 0x1cd   : > { %5702 = vmatprep.subr.bf16.mxu0 %v6800_v4  ;;  %5716 = vmatprep.subr.bf16.mxu1 %v6800_v4  ;;  %v912_v6 = vld [vmem:[#allocation2] sm:$0xff]  ;;  %v913_v7 = vld [vmem:[#allocation2 + $0x8] sm:$0xff]  ;;  %s6803_s21 = smov 112   ;;  %s6804_s25 = smov 120   ;;  %vm1124_vm3 = vcmask 1043456   ;;  %vm1120_vm4 = vcmask 64512  }
 0x1ce   : > { %5703 = vmatpush3.bf16.msra.mxu0 %v6158_v2  ;;  %5706 = vmatprep.mubr.msk.bf16.mxu0 %vm6801_vm1, %v6800_v4  ;;  %v7470_v8 = vshrl.u32 %v987_v3, 7  ;;  %v918_v9 = vld [vmem:[%s7453_s15] sm:$0xff]  ;;  %v925_v11 = vpack.c.bf16 %v913_v7, %v912_v6  ;;  %s6805_s18 = smov 104   ;;  %s6806_s30 = smov 96   ;;  %v5517_v51 = vld [vmem:[#allocation8] ss:$0 sm:$0xff] }
 0x1cf   : > { %5704 = vmatprep.subr.bf16.mxu0 %v6800_v4  ;;  %5718 = vmatprep.mubr.msk.bf16.mxu1 %vm6801_vm1, %v6800_v4  ;;  %s6807_s28 = smov 64   ;;  %v7563_v50 = vld [vmem:[#allocation6] sm:$0xff]  ;;  %s6811_s5 = smov 8   ;;  %vm1911_vm13 = vcmask 130048   ;;  %vm1913_vm14 = vcmask 195584  }
 0x1d0   : > { %v995_v10 = vsub.s32 1, %v7470_v8  ;;  %v989_v13 = vsub.s32 0, %v7470_v8  ;;  %v1005_v33 = vsub.s32 2, %v7470_v8  ;;  %v1043_v52 = vadd.f32 %v5517_v51, %v7563_v50  ;;  %s6812_s13 = smov 24   ;;  %s8285_s29 = sld [smem:[#allocation38_spill]] }
 0x1d2   : > { %5705 = vmatpush3.bf16.msra.mxu0 %v6159_v5  ;;  %v996_v12 = vrot.slane %v918_v9, %v995_v10  ;;  %v990_v14 = vrot.slane %v918_v9, %v989_v13  ;;  %v1006_v34 = vrot.slane %v918_v9, %v1005_v33 }
 0x1d3   : > { %5710 = vmatprep.subr.bf16.mxu0 %v6800_v4 }
 0x1d4   : > { %998 = vrot.lane.b32.xlu0 %v996_v12, %s6802_s26 }
 0x1d5   : > { %5707 = vmatmul.mubr.msk.bf16.vlgmr.msra.gmra.mrb[0].mxu0 %vm942_vm2, %v925_v11 }
 0x1d6   : > { %5712 = vmatprep.mubr.msk.bf16.mxu0 %vm6801_vm1, %v6800_v4  ;;  %p5601_p9 = scmp.ne.s32.totalorder %s8285_s29, 1 }
 0x246   : > { %v999_v15 = vpop.permute.xlu0 %998 }
 0x2a8   : > { %v7487_v16 = vpop.f32.mrb[0].mxu0 }
 0x2a9   : > { %v5708_v17 = vpop.f32.mrb[1].mxu0  ;;  %v991_v19 = vadd.f32 %v990_v14, %v7487_v16  ;;  %v1001_v20 = vadd.f32 %v999_v15, %v7487_v16 }
 0x2aa   : > { %v7489_v18 = vpop.f32.mrb[2].mxu0 }
 0x2ab   : > { %v992_v21 = vadd.f32 %v990_v14, %v7489_v18  ;;  %v1002_v22 = vadd.f32 %v999_v15, %v7489_v18  ;;  %v5709_v23 = vpop.f32.mrb[3].mxu0 }
 0x2ad   : > { %v7495_v24 = vpack.c.bf16 %v992_v21, %v991_v19  ;;  %v7497_v25 = vpack.c.bf16 %v1002_v22, %v1001_v20 }
 0x2af   : > { %1026 = vrot.lane.b32.xlu1 %v7497_v25, %s6803_s21  ;;  %1024 = vrot.lane.b32.xlu0 %v7497_v25, %s6804_s25 }
 0x2b3   : > { %1028 = vrot.lane.b32.xlu1 %v7497_v25, %s6805_s18  ;;  %1044 = vrot.lane.b32.xlu0 %v7497_v25, %s6806_s30 }
 0x321   : > { %v7507_v26 = vpop.permute.xlu1 %1026  ;;  %v7509_v27 = vpop.permute.xlu0 %1024 }
 0x322   : > { %1048 = vrot.lane.b32.xlu0 %v7507_v26, %s6806_s30  ;;  %1046 = vrot.lane.b32.xlu1 %v7509_v27, %s6806_s30 }
 0x325   : > { %v7515_v28 = vpop.permute.xlu1 %1028  ;;  %v1045_v29 = vpop.permute.xlu0 %1044 }
 0x326   : > { %1050 = vrot.lane.b32.xlu1 %v7515_v28, %s6806_s30  ;;  %1017 = vrot.lane.b32.xlu0 %v7495_v24, %s6804_s25 }
 0x32a   : > { %1019 = vrot.lane.b32.xlu1 %v7495_v24, %s6803_s21  ;;  %1021 = vrot.lane.b32.xlu0 %v7495_v24, %s6805_s18 }
 0x34d   : > { %1056 = vxpose.xlu1.c.b16.start.end [1/1] (short) (narrow) %v1045_v29, 16 }
 0x394   : > { %v1047_v30 = vpop.permute.xlu1 %1046  ;;  %v1049_v31 = vpop.permute.xlu0 %1048 }
 0x395   : > { %1072 = vxpose.xlu0.c.b16.start.end [1/1] (short) (narrow) %v1047_v30, 16 }
 0x398   : > { %v1051_v32 = vpop.permute.xlu1 %1050  ;;  %v7537_v38 = vpop.permute.xlu0 %1017 }
 0x399   : > { %1104 = vxpose.xlu1.c.b16.start.end [1/1] (short) (narrow) %v1051_v32, 16  ;;  %1088 = vxpose.xlu0.c.b16.start.end [1/1] (short) (narrow) %v1049_v31, 16 }
 0x39c   : > { %v7529_v35 = vpop.permute.xlu1 %1019  ;;  %v7539_v39 = vpop.permute.xlu0 %1021 }
 0x3a2   : > { %1008 = vrot.lane.b32.xlu0 %v1006_v34, %s6807_s28 }
 0x3b3   : > { %v1064_v36 = vpop.trf.xlu1 }
 0x3b4   : > { %v1126_v37 = vsel %vm1124_vm3, %v1064_v36, 0 }
 0x3b5   : > { %5711 = vmatpush3.bf16.msra.mxu0 %v1126_v37 }
 0x3b6   : > { %5722 = vmatprep.subr.bf16.mxu0 %v6800_v4 }
 0x3b8   : > { %5713 = vmatmul.mubr.msk.bf16.vlgmr.msra.gmra.mrb[4].mxu0 %vm1120_vm4, %v7495_v24 }
 0x3b9   : > { %5724 = vmatprep.mubr.msk.bf16.mxu0 %vm6801_vm1, %v6800_v4 }
 0x3fb   : > { %v1080_v40 = vpop.trf.xlu0 }
 0x3fc   : > { %v1172_v41 = vsel %vm1124_vm3, %v1080_v40, 0 }
 0x3fd   : > { %5717 = vmatpush3.bf16.msra.mxu1 %v1172_v41 }
 0x3fe   : > { %5728 = vmatprep.subr.bf16.mxu1 %v6800_v4 }
 0x3ff   : > { %v1096_v42 = vpop.trf.xlu0  ;;  %v1112_v43 = vpop.trf.xlu1 }
 0x400   : > { %v1218_v44 = vsel %vm1124_vm3, %v1096_v42, 0  ;;  %5719 = vmatmul.mubr.msk.bf16.vlgmr.msra.gmra.mrb[0].mxu1 %vm1120_vm4, %v7537_v38  ;;  %v1264_v45 = vsel %vm1124_vm3, %v1112_v43, 0 }
 0x401   : > { %5723 = vmatpush3.bf16.msra.mxu0 %v1218_v44  ;;  %5729 = vmatpush3.bf16.msra.mxu1 %v1264_v45 }
 0x402   : > { %5730 = vmatprep.mubr.msk.bf16.mxu1 %vm6801_vm1, %v6800_v4  ;;  %5734 = vmatprep.subr.bf16.mxu0 %v6800_v4 }
 0x403   : > { %5740 = vmatprep.subr.bf16.mxu1 %v6800_v4 }
 0x404   : > { %5725 = vmatmul.mubr.msk.bf16.vlgmr.msra.gmra.mrb[8].mxu0 %vm1120_vm4, %v7529_v35 }
 0x405   : > { %5736 = vmatprep.mubr.msk.bf16.mxu0 %vm6801_vm1, %v6800_v4 }
 0x408   : > { %5731 = vmatmul.mubr.msk.bf16.vlgmr.msra.gmra.mrb[4].mxu1 %vm1120_vm4, %v7539_v39 }
 0x409   : > { %5742 = vmatprep.mubr.msk.bf16.mxu1 %vm6801_vm1, %v6800_v4 }
 0x414   : > { %v1009_v46 = vpop.permute.xlu0 %1008 }
 0x415   : > { %v1011_v47 = vadd.f32 %v1009_v46, %v7487_v16  ;;  %v1012_v48 = vadd.f32 %v1009_v46, %v7489_v18 }
 0x417   : > { %v7561_v49 = vpack.c.bf16 %v1012_v48, %v1011_v47 }
 0x48b   : > { %v1162_v53 = vpop.f32.mrb[4].mxu0 }
 0x48c   : > { %v1163_v54 = vadd.f32 %v1162_v53, %v1043_v52  ;;  %v5714_v55 = vpop.f32.mrb[5].mxu0 }
 0x48d   : > { %v1165_v56 = vpop.f32.mrb[6].mxu0  ;;  %v1922_v55 = vrot.slane %v7497_v25, 4 }
 0x48e   : > { %v5715_v57 = vpop.f32.mrb[7].mxu0  ;;  %v1306_v58 = vsel %vm1120_vm4, %v1163_v54, -inf  ;;  %v1923_v56 = vrot.slane %v7509_v27, 4 }
 0x48f   : > { %1307 = vmax.xlane.f32.xlu1 %v1306_v58  ;;  %v1924_v57 = vrot.slane %v7507_v26, 4 }
 0x4a0   : > { %1031 = vrot.lane.b32.xlu1 %v7561_v49, %s6804_s25 }
 0x4a4   : > { %1033 = vrot.lane.b32.xlu1 %v7561_v49, %s6803_s21 }
 0x4a8   : > { %1374 = vrot.lane.b32.xlu1 %v7561_v49, %s6807_s28 }
 0x4d3   : > { %v1208_v59 = vpop.f32.mrb[0].mxu1 }
 0x4d4   : > { %v1209_v60 = vadd.f32 %v1208_v59, %v1043_v52  ;;  %v5720_v61 = vpop.f32.mrb[1].mxu1  ;;  %v1925_v59 = vrot.slane %v7515_v28, 4 }
 0x4d5   : > { %v1211_v62 = vpop.f32.mrb[2].mxu1 }
 0x4d6   : > { %v5721_v63 = vpop.f32.mrb[3].mxu1  ;;  %v1309_v0 = vsel %vm1120_vm4, %v1209_v60, -inf }
 0x4d7   : > { %1310 = vmax.xlane.f32.xlu0 %v1309_v0  ;;  %v1254_v1 = vpop.f32.mrb[8].mxu0 }
 0x4d8   : > { %v1255_v2 = vadd.f32 %v1254_v1, %v1043_v52  ;;  %v5726_v3 = vpop.f32.mrb[9].mxu0 }
 0x4d9   : > { %v1257_v5 = vpop.f32.mrb[10].mxu0 }
 0x4da   : > { %v5727_v6 = vpop.f32.mrb[11].mxu0  ;;  %v1312_v7 = vsel %vm1120_vm4, %v1255_v2, -inf }
 0x4db   : > { %v1300_v9 = vpop.f32.mrb[4].mxu1  ;;  %1313 = vmax.xlane.f32.xlu1 %v1312_v7 }
 0x4dc   : > { %v1301_v11 = vadd.f32 %v1300_v9, %v1043_v52  ;;  %v5732_v12 = vpop.f32.mrb[5].mxu1 }
 0x4dd   : > { %v1303_v14 = vpop.f32.mrb[6].mxu1 }
 0x4de   : > { %v5733_v15 = vpop.f32.mrb[7].mxu1  ;;  %v1315_v16 = vsel %vm1120_vm4, %v1301_v11, -inf }
 0x4df   : > { %1316 = vmax.xlane.f32.xlu1 %v1315_v16 }
 0x4ed   : > { %1035 = vrot.lane.b32.xlu0 %v7561_v49, %s6805_s18 }
 0x51c   : > { %v1308_v17 = vpop.xlane.xlu1 %1307 }
 0x51d   : > { %v1318_v20 = vmax.f32 %v1308_v17, -1e+30 }
 0x51f   : > { %v1322_v21 = vsub.f32 %v1163_v54, %v1318_v20 }
 0x520   : > { %v7578_v18 = vpop.permute.xlu1 %1031 }
 0x521   : > { %1376 = vrot.lane.b32.xlu0 %v7578_v18, %s6807_s28  ;;  %v1326_v22 = vmul.f32 1.442695, %v1322_v21 }
 0x523   : > { %6176 = vpow2.f32 %v1326_v22 }
 0x524   : > { %v7582_v19 = vpop.permute.xlu1 %1033 }
 0x525   : > { %1378 = vrot.lane.b32.xlu1 %v7582_v19, %s6807_s28 }
 0x528   : > { %v1375_v30 = vpop.permute.xlu1 %1374 }
 0x52d   : > { %v6177_v23 = vpop.eup %6176 }
 0x52e   : > { %v1334_v29 = vsel %vm1120_vm4, %v6177_v23, 0.0 }
 0x549   : > { %1335 = vadd.xlane.f32.xlu1 %v1334_v29 }
 0x564   : > { %v1311_v31 = vpop.xlane.xlu0 %1310 }
 0x565   : > { %v1319_v32 = vmax.f32 %v1311_v31, -1e+30 }
 0x567   : > { %v1323_v34 = vsub.f32 %v1209_v60, %v1319_v32 }
 0x568   : > { %v1314_v36 = vpop.xlane.xlu1 %1313  ;;  %v7601_v58 = vpop.permute.xlu0 %1035 }
 0x569   : > { %v1328_v37 = vmul.f32 1.442695, %v1323_v34  ;;  %v1320_v40 = vmax.f32 %v1314_v36, -1e+30 }
 0x56b   : > { %6178 = vpow2.f32 %v1328_v37  ;;  %v1324_v41 = vsub.f32 %v1255_v2, %v1320_v40 }
 0x56c   : > { %v1317_v42 = vpop.xlane.xlu1 %1316 }
 0x56d   : > { %v1330_v43 = vmul.f32 1.442695, %v1324_v41  ;;  %v1321_v44 = vmax.f32 %v1317_v42, -1e+30 }
 0x56f   : > { %6180 = vpow2.f32 %v1330_v43  ;;  %v1325_v45 = vsub.f32 %v1301_v11, %v1321_v44 }
 0x571   : > { %v1332_v46 = vmul.f32 1.442695, %v1325_v45 }
 0x573   : > { %6182 = vpow2.f32 %v1332_v46 }
 0x575   : > { %v6179_v47 = vpop.eup %6178 }
 0x576   : > { %v1337_v48 = vsel %vm1120_vm4, %v6179_v47, 0.0 }
 0x577   : > { %1338 = vadd.xlane.f32.xlu0 %v1337_v48 }
 0x579   : > { %v7588_v51 = vpop.eup %6180 }
 0x57a   : > { %v1340_v52 = vsel %vm1120_vm4, %v7588_v51, 0.0 }
 0x57b   : > { %1341 = vadd.xlane.f32.xlu1 %v1340_v52 }
 0x57d   : > { %v7592_v53 = vpop.eup %6182 }
 0x57e   : > { %v1343_v54 = vsel %vm1120_vm4, %v7592_v53, 0.0 }
 0x57f   : > { %1344 = vadd.xlane.f32.xlu0 %v1343_v54 }
 0x58c   : > { %1926 = vrot.lane.b32.xlu1 %v1922_v55, %s6806_s30  ;;  %v2096_v55 = vrot.slane %v7529_v35, 4  ;;  %v2143_v35 = vrot.slane %v7539_v39, 4 }
 0x590   : > { %1928 = vrot.lane.b32.xlu1 %v1923_v56, %s6806_s30 }
 0x593   : > { %v1377_v25 = vpop.permute.xlu0 %1376 }
 0x594   : > { %1930 = vrot.lane.b32.xlu1 %v1924_v57, %s6806_s30 }
 0x595   : > { %1380 = vrot.lane.b32.xlu0 %v7601_v58, %s6807_s28 }
 0x597   : > { %v1379_v60 = vpop.permute.xlu1 %1378 }
 0x598   : > { %1932 = vrot.lane.b32.xlu1 %v1925_v59, %s6806_s30 }
 0x5b3   : > { %1402 = vxpose.xlu0.c.b16.start.end [1/1] (short) (narrow) %v1377_v25, 16 }
 0x5b7   : > { %1418 = vxpose.xlu0.c.b16.start.end [1/1] (short) (narrow) %v1379_v60, 16 }
 0x5bb   : > { %1386 = vxpose.xlu1.c.b16.start.end [1/1] (short) (narrow) %v1375_v30, 16 }
 0x5d6   : > { %v1336_v27 = vpop.xlane.xlu1 %1335 }
 0x5d7   : > { %vm1346_vm5 = vcmp.eq.f32.partialorder %v1336_v27, 0.0 }
 0x5d8   : > { %v5522_v26 = vsel %vm1346_vm5, 1.0, %v6800_v4 }
 0x5d9   : > { %v1358_v61 = vadd.f32 %v5522_v26, %v1336_v27 }
 0x5db   : > { %6184 = vrcp.f32 %v1358_v61 }
 0x5e5   : > { %v6185_v62 = vpop.eup %6184 }
 0x5e6   : > { %v1366_v63 = vmul.f32 %v6185_v62, %v6177_v23 }
 0x5e8   : > { %v1370_v0 = vpack.c.bf16 %v1366_v63, %v1366_v63 }
 0x5ea   : > { %v1454_v1 = vsel %vm1120_vm4, %v1370_v0, 0 }
 0x5eb   : > { %5735 = vmatpush3.bf16.xpose.msra.mxu0 %v1454_v1 }
 0x5ec   : > { %5746 = vmatprep.subr.bf16.mxu0 %v6800_v4 }
 0x604   : > { %v1339_v28 = vpop.xlane.xlu0 %1338 }
 0x605   : > { %vm1347_vm6 = vcmp.eq.f32.partialorder %v1339_v28, 0.0 }
 0x606   : > { %v5523_v2 = vsel %vm1347_vm6, 1.0, %v6800_v4 }
 0x607   : > { %v1359_v3 = vadd.f32 %v5523_v2, %v1339_v28  ;;  %v5532_v28 = vld [vmem:[#allocation8 + $0x1] ss:$0 sm:$0xff] }
 0x608   : > { %v1342_v5 = vpop.xlane.xlu1 %1341  ;;  %v1921_v2 = vadd.f32 %v5532_v28, %v7563_v50 }
 0x609   : > { %6186 = vrcp.f32 %v1359_v3  ;;  %vm1348_vm7 = vcmp.eq.f32.partialorder %v1342_v5, 0.0 }
 0x60a   : > { %v5524_v6 = vsel %vm1348_vm7, 1.0, %v6800_v4 }
 0x60b   : > { %v1360_v7 = vadd.f32 %v5524_v6, %v1342_v5 }
 0x60c   : > { %v1345_v9 = vpop.xlane.xlu0 %1344  ;;  %v1927_v11 = vpop.permute.xlu1 %1926 }
 0x60d   : > { %6188 = vrcp.f32 %v1360_v7  ;;  %vm1349_vm8 = vcmp.eq.f32.partialorder %v1345_v9, 0.0  ;;  %1938 = vxpose.xlu0.c.b16.start.end [1/1] (short) (narrow) %v1927_v11, 16 }
 0x60e   : > { %v5525_v12 = vsel %vm1349_vm8, 1.0, %v6800_v4 }
 0x60f   : > { %v1361_v14 = vadd.f32 %v5525_v12, %v1345_v9 }
 0x610   : > { %v1381_v15 = vpop.permute.xlu0 %1380  ;;  %v1929_v16 = vpop.permute.xlu1 %1928 }
 0x611   : > { %6190 = vrcp.f32 %v1361_v14  ;;  %1434 = vxpose.xlu1.c.b16.start.end [1/1] (short) (narrow) %v1381_v15, 16 }
 0x613   : > { %v6187_v17 = vpop.eup %6186 }
 0x614   : > { %v1931_v20 = vpop.permute.xlu1 %1930  ;;  %v1367_v21 = vmul.f32 %v6187_v17, %v6179_v47  ;;  %v2002_v47 = vrot.slane %v7495_v24, 4  ;;  %v2049_v24 = vrot.slane %v7537_v38, 4 }
 0x615   : > { %1954 = vxpose.xlu1.c.b16.start.end [1/1] (short) (narrow) %v1929_v16, 16  ;;  %1970 = vxpose.xlu0.c.b16.start.end [1/1] (short) (narrow) %v1931_v20, 16 }
 0x616   : > { %v1371_v22 = vpack.c.bf16 %v1367_v21, %v1367_v21 }
 0x617   : > { %v6189_v23 = vpop.eup %6188 }
 0x618   : > { %v1933_v29 = vpop.permute.xlu1 %1932  ;;  %v1500_v30 = vsel %vm1120_vm4, %v1371_v22, 0  ;;  %v1368_v31 = vmul.f32 %v6189_v23, %v7588_v51 }
 0x619   : > { %5741 = vmatpush3.bf16.xpose.msra.mxu1 %v1500_v30  ;;  %1986 = vxpose.xlu1.c.b16.start.end [1/1] (short) (narrow) %v1933_v29, 16  ;;  %v1410_v36 = vpop.trf.xlu0 }
 0x61a   : > { %5752 = vmatprep.subr.bf16.mxu1 %v6800_v4  ;;  %v1372_v40 = vpack.c.bf16 %v1368_v31, %v1368_v31 }
 0x61b   : > { %v6191_v32 = vpop.eup %6190 }
 0x61c   : > { %v1369_v34 = vmul.f32 %v6191_v32, %v7592_v53  ;;  %v1546_v43 = vsel %vm1120_vm4, %v1372_v40, 0 }
 0x61d   : > { %v1426_v44 = vpop.trf.xlu0 }
 0x61e   : > { %v1373_v37 = vpack.c.bf16 %v1369_v34, %v1369_v34 }
 0x620   : > { %5743 = vmatmul.mubr.msk.bf16.vlgmr.msra.gmra.mrb[8].mxu1 %vm1120_vm4, %v1410_v36  ;;  %v1592_v41 = vsel %vm1120_vm4, %v1373_v37, 0 }
 0x621   : > { %5753 = vmatpush3.bf16.xpose.msra.mxu1 %v1592_v41  ;;  %v1394_v42 = vpop.trf.xlu1  ;;  %5754 = vmatprep.mubr.msk.bf16.mxu1 %vm6801_vm1, %v6800_v4 }
 0x622   : > { %5737 = vmatmul.mubr.msk.bf16.vlgmr.msra.gmra.mrb[12].mxu0 %vm1120_vm4, %v1394_v42  ;;  %5764 = vmatprep.subr.bf16.mxu1 %v6800_v4 }
 0x623   : > { %5747 = vmatpush3.bf16.xpose.msra.mxu0 %v1546_v43  ;;  %5748 = vmatprep.mubr.msk.bf16.mxu0 %vm6801_vm1, %v6800_v4 }
 0x624   : > { %5758 = vmatprep.subr.bf16.mxu0 %v6800_v4 }
 0x62a   : > { %5749 = vmatmul.mubr.msk.bf16.vlgmr.msra.gmra.mrb[16].mxu0 %vm1120_vm4, %v1426_v44 }
 0x62b   : > { %5760 = vmatprep.mubr.msk.bf16.mxu0 %vm6801_vm1, %v6800_v4 }
 0x673   : > { %v1946_v45 = vpop.trf.xlu0 }
 0x674   : > { %v2007_v46 = vsel %vm1124_vm3, %v1946_v45, 0  ;;  %v2258_v45 = vrot.slane %v7561_v49, 4 }
 0x675   : > { %5759 = vmatpush3.bf16.msra.mxu0 %v2007_v46  ;;  %v2259_v46 = vrot.slane %v7578_v18, 4 }
 0x676   : > { %5770 = vmatprep.subr.bf16.mxu0 %v6800_v4 }
 0x677   : > { %v1442_v48 = vpop.trf.xlu1 }
 0x678   : > { %5755 = vmatmul.mubr.msk.bf16.vlgmr.msra.gmra.mrb[12].mxu1 %vm1120_vm4, %v1442_v48  ;;  %5761 = vmatmul.mubr.msk.bf16.vlgmr.msra.gmra.mrb[20].mxu0 %vm1120_vm4, %v2002_v47 }
 0x679   : > { %5766 = vmatprep.mubr.msk.bf16.mxu1 %vm6801_vm1, %v6800_v4  ;;  %5772 = vmatprep.mubr.msk.bf16.mxu0 %vm6801_vm1, %v6800_v4 }
 0x67b   : > { %v1978_v51 = vpop.trf.xlu0  ;;  %v1962_v52 = vpop.trf.xlu1 }
 0x67c   : > { %v2101_v53 = vsel %vm1124_vm3, %v1978_v51, 0  ;;  %v2054_v54 = vsel %vm1124_vm3, %v1962_v52, 0 }
 0x67d   : > { %5765 = vmatpush3.bf16.msra.mxu1 %v2054_v54  ;;  %5771 = vmatpush3.bf16.msra.mxu0 %v2101_v53 }
 0x67e   : > { %5776 = vmatprep.subr.bf16.mxu1 %v6800_v4  ;;  %5782 = vmatprep.subr.bf16.mxu0 %v6800_v4 }
 0x67f   : > { %v1994_v56 = vpop.trf.xlu1 }
 0x680   : > { %5767 = vmatmul.mubr.msk.bf16.vlgmr.msra.gmra.mrb[16].mxu1 %vm1120_vm4, %v2049_v24  ;;  %5773 = vmatmul.mubr.msk.bf16.vlgmr.msra.gmra.mrb[24].mxu0 %vm1120_vm4, %v2096_v55  ;;  %v2148_v57 = vsel %vm1124_vm3, %v1994_v56, 0 }
 0x681   : > { %5777 = vmatpush3.bf16.msra.mxu1 %v2148_v57  ;;  %5778 = vmatprep.mubr.msk.bf16.mxu1 %vm6801_vm1, %v6800_v4 }
 0x682   : > { %5788 = vmatprep.subr.bf16.mxu1 %v6800_v4  ;;  %5784 = vmatprep.mubr.msk.bf16.mxu0 %vm6801_vm1, %v6800_v4 }
 0x688   : > { %5779 = vmatmul.mubr.msk.bf16.vlgmr.msra.gmra.mrb[20].mxu1 %vm1120_vm4, %v2143_v35 }
 0x689   : > { %5790 = vmatprep.mubr.msk.bf16.mxu1 %vm6801_vm1, %v6800_v4 }
 0x6f3   : > { %v7658_v38 = vpop.f32.mrb[8].mxu1 }
 0x6f4   : > { %v5744_v59 = vpop.f32.mrb[9].mxu1 }
 0x6f5   : > { %v7660_v25 = vpop.f32.mrb[12].mxu0  ;;  %v1539_v60 = vpop.f32.mrb[10].mxu1 }
 0x6f6   : > { %v5738_v27 = vpop.f32.mrb[13].mxu0  ;;  %v5745_v26 = vpop.f32.mrb[11].mxu1 }
 0x6f7   : > { %v1493_v61 = vpop.f32.mrb[14].mxu0 }
 0x6f8   : > { %v5739_v62 = vpop.f32.mrb[15].mxu0 }
 0x6fd   : > { %v7662_v63 = vpop.f32.mrb[16].mxu0 }
 0x6fe   : > { %v5750_v0 = vpop.f32.mrb[17].mxu0 }
 0x6ff   : > { %v1585_v1 = vpop.f32.mrb[18].mxu0 }
 0x700   : > { %v5751_v39 = vpop.f32.mrb[19].mxu0 }
 0x74b   : > { %v7665_v3 = vpop.f32.mrb[12].mxu1  ;;  %v2043_v5 = vpop.f32.mrb[20].mxu0 }
 0x74c   : > { %v2044_v6 = vadd.f32 %v2043_v5, %v1921_v2  ;;  %v5756_v7 = vpop.f32.mrb[13].mxu1  ;;  %v5762_v9 = vpop.f32.mrb[21].mxu0  ;;  %v2261_v5 = vrot.slane %v7601_v58, 4 }
 0x74d   : > { %v1631_v11 = vpop.f32.mrb[14].mxu1  ;;  %v2046_v12 = vpop.f32.mrb[22].mxu0 }
 0x74e   : > { %v5757_v14 = vpop.f32.mrb[15].mxu1  ;;  %v5763_v15 = vpop.f32.mrb[23].mxu0  ;;  %v2190_v16 = vsel %vm1120_vm4, %v2044_v6, -inf }
 0x74f   : > { %2191 = vmax.xlane.f32.xlu0 %v2190_v16 }
 0x753   : > { %v2090_v17 = vpop.f32.mrb[16].mxu1  ;;  %v2137_v20 = vpop.f32.mrb[24].mxu0 }
 0x754   : > { %v2091_v21 = vadd.f32 %v2090_v17, %v1921_v2  ;;  %v2138_v22 = vadd.f32 %v2137_v20, %v1921_v2  ;;  %v5768_v23 = vpop.f32.mrb[17].mxu1  ;;  %v5774_v29 = vpop.f32.mrb[25].mxu0 }
 0x755   : > { %v2093_v50 = vpop.f32.mrb[18].mxu1  ;;  %v2140_v30 = vpop.f32.mrb[26].mxu0 }
 0x756   : > { %v5769_v31 = vpop.f32.mrb[19].mxu1  ;;  %v5775_v32 = vpop.f32.mrb[27].mxu0  ;;  %v2193_v34 = vsel %vm1120_vm4, %v2091_v21, -inf  ;;  %v2196_v36 = vsel %vm1120_vm4, %v2138_v22, -inf }
 0x757   : > { %2194 = vmax.xlane.f32.xlu1 %v2193_v34  ;;  %2197 = vmax.xlane.f32.xlu0 %v2196_v36 }
 0x75b   : > { %v2184_v37 = vpop.f32.mrb[20].mxu1 }
 0x75c   : > { %v2185_v40 = vadd.f32 %v2184_v37, %v1921_v2  ;;  %v5780_v41 = vpop.f32.mrb[21].mxu1 }
 0x75d   : > { %v2187_v42 = vpop.f32.mrb[22].mxu1 }
 0x75e   : > { %v5781_v43 = vpop.f32.mrb[23].mxu1  ;;  %v2199_v44 = vsel %vm1120_vm4, %v2185_v40, -inf }
 0x75f   : > { %2200 = vmax.xlane.f32.xlu1 %v2199_v44 }
 0x76d   : > { %2262 = vrot.lane.b32.xlu0 %v2258_v45, %s6807_s28 }
 0x770   : > { %2264 = vrot.lane.b32.xlu1 %v2259_v46, %s6807_s28 }
 0x7dc   : > { %v2192_v47 = vpop.xlane.xlu0 %2191 }
 0x7dd   : > { %v2202_v48 = vmax.f32 %v2192_v47, -1e+30 }
 0x7df   : > { %v2206_v51 = vsub.f32 %v2044_v6, %v2202_v48  ;;  %v2260_v6 = vrot.slane %v7582_v19, 4 }
 0x7e1   : > { %v2210_v52 = vmul.f32 1.442695, %v2206_v51 }
 0x7e3   : > { %6192 = vpow2.f32 %v2210_v52 }
 0x7e4   : > { %v2195_v53 = vpop.xlane.xlu1 %2194  ;;  %v2198_v54 = vpop.xlane.xlu0 %2197 }
 0x7e5   : > { %v2203_v24 = vmax.f32 %v2195_v53, -1e+30  ;;  %v2204_v55 = vmax.f32 %v2198_v54, -1e+30 }
 0x7e7   : > { %v2207_v56 = vsub.f32 %v2091_v21, %v2203_v24  ;;  %v2208_v57 = vsub.f32 %v2138_v22, %v2204_v55 }
 0x7e8   : > { %v2263_v7 = vpop.permute.xlu0 %2262 }
 0x7e9   : > { %v2212_v35 = vmul.f32 1.442695, %v2207_v56  ;;  %v2214_v59 = vmul.f32 1.442695, %v2208_v57 }
 0x7eb   : > { %6194 = vpow2.f32 %v2212_v35 }
 0x7ec   : > { %v2201_v49 = vpop.xlane.xlu1 %2200  ;;  %6196 = vpow2.f32 %v2214_v59 }
 0x7ed   : > { %v6193_v60 = vpop.eup %6192  ;;  %v2205_v18 = vmax.f32 %v2201_v49, -1e+30  ;;  %v6808_v49 = vmov 1983009808  }
 0x7ee   : > { %v2218_v27 = vsel %vm1120_vm4, %v6193_v60, 0.0 }
 0x7ef   : > { %v2209_v26 = vsub.f32 %v2185_v40, %v2205_v18  ;;  %2219 = vadd.xlane.f32.xlu0 %v2218_v27 }
 0x7f0   : > { %v2265_v9 = vpop.permute.xlu1 %2264 }
 0x7f1   : > { %v2216_v61 = vmul.f32 1.442695, %v2209_v26 }
 0x7f3   : > { %6198 = vpow2.f32 %v2216_v61 }
 0x7f5   : > { %v6195_v62 = vpop.eup %6194 }
 0x7f6   : > { %v2221_v0 = vsel %vm1120_vm4, %v6195_v62, 0.0  ;;  %v6197_v1 = vpop.eup %6196 }
 0x7f7   : > { %2222 = vadd.xlane.f32.xlu1 %v2221_v0  ;;  %v2224_v39 = vsel %vm1120_vm4, %v6197_v1, 0.0  ;;  %v6809_v0 = vmov 1934713408  }
 0x7fb   : > { %2225 = vadd.xlane.f32.xlu1 %v2224_v39 }
 0x7fd   : > { %v6199_v28 = vpop.eup %6198 }
 0x7fe   : > { %v2227_v2 = vsel %vm1120_vm4, %v6199_v28, 0.0 }
 0x7ff   : > { %2228 = vadd.xlane.f32.xlu0 %v2227_v2 }
 0x80c   : > { %2268 = vrot.lane.b32.xlu1 %v2261_v5, %s6807_s28 }
 0x815   : > { %2266 = vrot.lane.b32.xlu0 %v2260_v6, %s6807_s28 }
 0x82f   : > { %2274 = vxpose.xlu1.c.b16.start.end [1/1] (short) (narrow) %v2263_v7, 16 }
 0x833   : > { %2290 = vxpose.xlu0.c.b16.start.end [1/1] (short) (narrow) %v2265_v9, 16 }
 0x87c   : > { %v2220_v11 = vpop.xlane.xlu0 %2219 }
 0x87d   : > { %vm2230_vm9 = vcmp.eq.f32.partialorder %v2220_v11, 0.0 }
 0x87e   : > { %v5537_v12 = vsel %vm2230_vm9, 1.0, %v6800_v4 }
 0x87f   : > { %v2242_v14 = vadd.f32 %v5537_v12, %v2220_v11 }
 0x881   : > { %6200 = vrcp.f32 %v2242_v14 }
 0x884   : > { %v2223_v15 = vpop.xlane.xlu1 %2222 }
 0x885   : > { %vm2231_vm10 = vcmp.eq.f32.partialorder %v2223_v15, 0.0 }
 0x886   : > { %v5538_v58 = vsel %vm2231_vm10, 1.0, %v6800_v4 }
 0x887   : > { %v2243_v16 = vadd.f32 %v5538_v58, %v2223_v15 }
 0x888   : > { %v2226_v17 = vpop.xlane.xlu1 %2225 }
 0x889   : > { %6202 = vrcp.f32 %v2243_v16  ;;  %vm2232_vm11 = vcmp.eq.f32.partialorder %v2226_v17, 0.0 }
 0x88a   : > { %v5539_v19 = vsel %vm2232_vm11, 1.0, %v6800_v4 }
 0x88b   : > { %v6201_v20 = vpop.eup %6200  ;;  %v2244_v21 = vadd.f32 %v5539_v19, %v2226_v17 }
 0x88c   : > { %v2269_v22 = vpop.permute.xlu1 %2268  ;;  %v2229_v23 = vpop.xlane.xlu0 %2228  ;;  %v2250_v29 = vmul.f32 %v6201_v20, %v6193_v60  ;;  %v1765_v60 = vunpack.c.l.s4 %v6808_v49 }
 0x88d   : > { %6204 = vrcp.f32 %v2244_v21  ;;  %vm2233_vm12 = vcmp.eq.f32.partialorder %v2229_v23, 0.0  ;;  %2322 = vxpose.xlu1.c.b16.start.end [1/1] (short) (narrow) %v2269_v22, 16 }
 0x88e   : > { %v5540_v50 = vsel %vm2233_vm12, 1.0, %v6800_v4  ;;  %v2254_v30 = vpack.c.bf16 %v2250_v29, %v2250_v29  ;;  %v1766_v27 = vunpack.c.0.s8 %v1765_v60 }
 0x88f   : > { %v2245_v31 = vadd.f32 %v5540_v50, %v2229_v23 }
 0x890   : > { %v2267_v32 = vpop.permute.xlu0 %2266  ;;  %v2342_v34 = vsel %vm1120_vm4, %v2254_v30, 0 }
 0x891   : > { %6206 = vrcp.f32 %v2245_v31  ;;  %5783 = vmatpush3.bf16.xpose.msra.mxu0 %v2342_v34  ;;  %2306 = vxpose.xlu0.c.b16.start.end [1/1] (short) (narrow) %v2267_v32, 16 }
 0x892   : > { %5794 = vmatprep.subr.bf16.mxu0 %v6800_v4 }
 0x893   : > { %v6203_v36 = vpop.eup %6202 }
 0x894   : > { %v2251_v37 = vmul.f32 %v6203_v36, %v6195_v62  ;;  %v7712_v62 = vsub.s32 %v1766_v27, %v7470_v8 }
 0x895   : > { %1634 = vxpose.xlu0.b32.start.end [1/1] (short) (narrow) %v7660_v25, 8  ;;  %v2282_v40 = vpop.trf.xlu1 }
 0x896   : > { %v2255_v41 = vpack.c.bf16 %v2251_v37, %v2251_v37 }
 0x897   : > { %v6205_v42 = vpop.eup %6204  ;;  %1666 = vxpose.xlu1.b32.start.end [1/1] (short) (narrow) %v7658_v38, 8 }
 0x898   : > { %v2388_v43 = vsel %vm1120_vm4, %v2255_v41, 0  ;;  %5785 = vmatmul.mubr.msk.bf16.vlgmr.msra.gmra.mrb[28].mxu0 %vm1120_vm4, %v2282_v40  ;;  %v2252_v44 = vmul.f32 %v6205_v42, %v6197_v1  ;;  %v1797_v1 = vunpack.c.l.s4 %v6809_v0 }
 0x899   : > { %5789 = vmatpush3.bf16.xpose.msra.mxu1 %v2388_v43  ;;  %1698 = vxpose.xlu0.b32.start.end [1/1] (short) (narrow) %v7662_v63, 8  ;;  %v2298_v38 = vpop.trf.xlu0 }
 0x89a   : > { %v2256_v45 = vpack.c.bf16 %v2252_v44, %v2252_v44  ;;  %5800 = vmatprep.subr.bf16.mxu1 %v6800_v4  ;;  %5796 = vmatprep.mubr.msk.bf16.mxu0 %vm6801_vm1, %v6800_v4  ;;  %v1798_v6 = vunpack.c.0.s8 %v1797_v1 }
 0x89b   : > { %v6207_v25 = vpop.eup %6206 }
 0x89c   : > { %v2434_v46 = vsel %vm1120_vm4, %v2256_v45, 0  ;;  %v2253_v47 = vmul.f32 %v6207_v25, %v6199_v28  ;;  %v7719_v14 = vsub.s32 %v1798_v6, %v7470_v8 }
 0x89d   : > { %5795 = vmatpush3.bf16.xpose.msra.mxu0 %v2434_v46  ;;  %1730 = vxpose.xlu0.b32.start.end [1/1] (short) (narrow) %v7665_v3, 8 }
 0x89e   : > { %v2257_v48 = vpack.c.bf16 %v2253_v47, %v2253_v47  ;;  %5806 = vmatprep.subr.bf16.mxu0 %v6800_v4 }
 0x8a0   : > { %5791 = vmatmul.mubr.msk.bf16.vlgmr.msra.gmra.mrb[24].mxu1 %vm1120_vm4, %v2298_v38  ;;  %v2480_v63 = vsel %vm1120_vm4, %v2257_v48, 0 }
 0x8a1   : > { %5801 = vmatpush3.bf16.xpose.msra.mxu1 %v2480_v63  ;;  %5802 = vmatprep.mubr.msk.bf16.mxu1 %vm6801_vm1, %v6800_v4 }
 0x8a2   : > { %5814 = vmatprep.subr.bf16.mxu1 %v6800_v4 }
 0x8f3   : > { %v2330_v51 = vpop.trf.xlu1 }
 0x8f4   : > { %5803 = vmatmul.mubr.msk.bf16.vlgmr.msra.gmra.mrb[28].mxu1 %vm1120_vm4, %v2330_v51 }
 0x8f5   : > { %5818 = vmatprep.mubr.msk.bf16.mxu1 %vm6801_vm1, %v6800_v4 }
 0x8f7   : > { %v2314_v3 = vpop.trf.xlu0 }
 0x8f8   : > { %5797 = vmatmul.mubr.msk.bf16.vlgmr.msra.gmra.mrb[32].mxu0 %vm1120_vm4, %v2314_v3 }
 0x8f9   : > { %5810 = vmatprep.mubr.msk.bf16.mxu0 %vm6801_vm1, %v6800_v4 }
 0x915   : > { %v1650_v59 = vpop.trf.xlu0 }
 0x917   : > { %v1682_v26 = vpop.trf.xlu1 }
 0x919   : > { %v1714_v18 = vpop.trf.xlu0 }
 0x91a   : > { %v1762_v39 = vcombine.low %v1650_v59, %v1714_v18  ;;  %v1763_v28 = vcombine.high %v1650_v59, %v1714_v18 }
 0x91c   : > { %v1770_v7 = vrot.slane %v1762_v39, %v7712_v62  ;;  %v1777_v9 = vrot.slane %v1763_v28, %v7712_v62 }
 0x91d   : > { %v1746_v61 = vpop.trf.xlu0 }
 0x91e   : > { %v1778_v2 = vcombine.low %v1682_v26, %v1746_v61  ;;  %v1779_v5 = vcombine.high %v1682_v26, %v1746_v61 }
 0x920   : > { %v1786_v11 = vrot.slane %v1778_v2, %v7712_v62  ;;  %v1793_v12 = vrot.slane %v1779_v5, %v7712_v62 }
 0x922   : > { %v1794_v15 = vcombine.low %v1770_v7, %v1786_v11  ;;  %v1795_v58 = vcombine.high %v1770_v7, %v1786_v11  ;;  %v1810_v16 = vcombine.low %v1777_v9, %v1793_v12  ;;  %v1811_v17 = vcombine.high %v1777_v9, %v1793_v12  ;;  %v6160_v11 = vld [vmem:[%s756_s7] sm:$0xff]  }
 0x923   : > { %5807 = vmatpush3.bf16.msra.mxu0 %v6160_v11  ;;  %v6162_v11 = vld [vmem:[%s774_s23] sm:$0xff]  }
 0x924   : > { %v1802_v19 = vrot.slane %v1794_v15, %v7719_v14  ;;  %v1809_v20 = vrot.slane %v1795_v58, %v7719_v14  ;;  %v1818_v21 = vrot.slane %v1810_v16, %v7719_v14  ;;  %v1825_v22 = vrot.slane %v1811_v17, %v7719_v14  ;;  %5808 = vmatprep.subr.bf16.mxu0 %v6800_v4 }
 0x926   : > { %v1830_v23 = vcombine.low %v1802_v19, %v1809_v20  ;;  %v5530_v29 = vcombine.high %v1802_v19, %v1809_v20  ;;  %v1846_v50 = vcombine.low %v1818_v21, %v1825_v22  ;;  %v5531_v30 = vcombine.high %v1818_v21, %v1825_v22 }
 0x928   : > { %v1837_v31 = vrot.slane %v1830_v23, %v7712_v62  ;;  %v1845_v32 = vrot.slane %v5530_v29, %v7712_v62  ;;  %v1853_v34 = vrot.slane %v1846_v50, %v7712_v62  ;;  %v1861_v36 = vrot.slane %v5531_v30, %v7712_v62  ;;  %v6161_v29 = vld [vmem:[%s756_s7 + $0x8] sm:$0xff]   ;;  %s6810_s7 = smov 16  }
 0x929   : > { %5809 = vmatpush3.bf16.msra.mxu0 %v6161_v29 }
 0x92a   : > { %v1862_v43 = vcombine.low %v1837_v31, %v1845_v32  ;;  %v1878_v44 = vcombine.low %v1853_v34, %v1861_v36  ;;  %v1863_v28 = vcombine.high %v1837_v31, %v1845_v32  ;;  %v1879_v2 = vcombine.high %v1853_v34, %v1861_v36  ;;  %5822 = vmatprep.subr.bf16.mxu0 %v6162_v11 }
 0x92c   : > { %v7730_v46 = vrot.slane %v1862_v43, %v7719_v14  ;;  %v7733_v47 = vrot.slane %v1878_v44, %v7719_v14  ;;  %v1877_v17 = vrot.slane %v1863_v28, %v7719_v14  ;;  %v1893_v19 = vrot.slane %v1879_v2, %v7719_v14  ;;  %v6257_v28 = vld [vmem:[#allocation2] sm:$0xff] }
 0x92e   : > { %v1894_v63 = vcombine.low %v7730_v46, %v7733_v47  ;;  %v1896_v34 = vcombine.low %v1877_v17, %v1893_v19 }
 0x96b   : > { %v2378_v52 = vpop.f32.mrb[28].mxu0 }
 0x96c   : > { %v5786_v53 = vpop.f32.mrb[29].mxu0  ;;  %2522 = vxpose.xlu0.b32.start.end [1/1] (short) (narrow) %v2378_v52, 8 }
 0x96d   : > { %v2381_v54 = vpop.f32.mrb[30].mxu0 }
 0x96e   : > { %v5787_v24 = vpop.f32.mrb[31].mxu0 }
 0x973   : > { %v2424_v55 = vpop.f32.mrb[24].mxu1 }
 0x974   : > { %v5792_v56 = vpop.f32.mrb[25].mxu1  ;;  %2554 = vxpose.xlu1.b32.start.end [1/1] (short) (narrow) %v2424_v55, 8 }
 0x975   : > { %v2427_v57 = vpop.f32.mrb[26].mxu1 }
 0x976   : > { %v5793_v35 = vpop.f32.mrb[27].mxu1 }
 0x9c7   : > { %v2516_v37 = vpop.f32.mrb[28].mxu1 }
 0x9c8   : > { %2618 = vxpose.xlu1.b32.start.end [1/1] (short) (narrow) %v2516_v37, 8  ;;  %v5804_v40 = vpop.f32.mrb[29].mxu1  ;;  %v1895_v37 = vcombine.high %v7730_v46, %v7733_v47  ;;  %v2808_v46 = vsub.s32 3, %v7470_v8  ;;  %v7777_v47 = vld [vmem:[%s7453_s15] sm:$0xff] }
 0x9c9   : > { %v2519_v41 = vpop.f32.mrb[30].mxu1 }
 0x9ca   : > { %v5805_v42 = vpop.f32.mrb[31].mxu1 }
 0x9cb   : > { %v2470_v45 = vpop.f32.mrb[32].mxu0 }
 0x9cc   : > { %2586 = vxpose.xlu0.b32.start.end [1/1] (short) (narrow) %v2470_v45, 8  ;;  %v5798_v25 = vpop.f32.mrb[33].mxu0  ;;  %v1897_v45 = vcombine.high %v1877_v17, %v1893_v19 }
 0x9cd   : > { %v2473_v38 = vpop.f32.mrb[34].mxu0 }
 0x9ce   : > { %v5799_v48 = vpop.f32.mrb[35].mxu0 }
 0x9ec   : > { %v2538_v3 = vpop.trf.xlu0 }
 0x9f4   : > { %v2570_v51 = vpop.trf.xlu1 }
 0xa48   : > { %v2634_v52 = vpop.trf.xlu1 }
 0xa49   : > { %v2666_v53 = vcombine.low %v2570_v51, %v2634_v52  ;;  %v2667_v54 = vcombine.high %v2570_v51, %v2634_v52 }
 0xa4b   : > { %v2674_v57 = vrot.slane %v2666_v53, %v7712_v62  ;;  %v2681_v35 = vrot.slane %v2667_v54, %v7712_v62 }
 0xa4c   : > { %v2602_v24 = vpop.trf.xlu0 }
 0xa4d   : > { %v2650_v55 = vcombine.low %v2538_v3, %v2602_v24  ;;  %v2651_v56 = vcombine.high %v2538_v3, %v2602_v24 }
 0xa4f   : > { %v2658_v59 = vrot.slane %v2650_v55, %v7712_v62  ;;  %v2665_v49 = vrot.slane %v2651_v56, %v7712_v62 }
 0xa51   : > { %v2682_v60 = vcombine.low %v2658_v59, %v2674_v57  ;;  %v2683_v18 = vcombine.high %v2658_v59, %v2674_v57  ;;  %v2698_v27 = vcombine.low %v2665_v49, %v2681_v35  ;;  %v2699_v26 = vcombine.high %v2665_v49, %v2681_v35 }
 0xa53   : > { %v2690_v61 = vrot.slane %v2682_v60, %v7719_v14  ;;  %v2697_v0 = vrot.slane %v2683_v18, %v7719_v14  ;;  %v2706_v1 = vrot.slane %v2698_v27, %v7719_v14  ;;  %v2713_v39 = vrot.slane %v2699_v26, %v7719_v14 }
 0xa55   : > { %v2718_v5 = vcombine.low %v2690_v61, %v2697_v0  ;;  %v5545_v6 = vcombine.high %v2690_v61, %v2697_v0  ;;  %v2734_v7 = vcombine.low %v2706_v1, %v2713_v39  ;;  %v5546_v9 = vcombine.high %v2706_v1, %v2713_v39 }
 0xa57   : > { %v2725_v12 = vrot.slane %v2718_v5, %v7712_v62  ;;  %v2733_v15 = vrot.slane %v5545_v6, %v7712_v62  ;;  %v2741_v58 = vrot.slane %v2734_v7, %v7712_v62  ;;  %v2749_v16 = vrot.slane %v5546_v9, %v7712_v62  ;;  %v6258_v6 = vld [vmem:[#allocation2 + $0x8] sm:$0xff] }
 0xa59   : > { %v2751_v20 = vcombine.high %v2725_v12, %v2733_v15  ;;  %v2767_v21 = vcombine.high %v2741_v58, %v2749_v16  ;;  %v2750_v22 = vcombine.low %v2725_v12, %v2733_v15  ;;  %v2766_v23 = vcombine.low %v2741_v58, %v2749_v16  ;;  %v6163_v12 = vld [vmem:[%s774_s23 + $0x8] sm:$0xff]   ;;  %v6164_v15 = vld [vmem:[#allocation11] sm:$0xff]  }
 0xa5a   : > { %v6165_v58 = vld [vmem:[#allocation11 + $0x8] sm:$0xff]  }
 0xa5b   : > { %v2765_v50 = vrot.slane %v2751_v20, %v7719_v14  ;;  %v2781_v30 = vrot.slane %v2767_v21, %v7719_v14  ;;  %v2758_v31 = vrot.slane %v2750_v22, %v7719_v14  ;;  %v2774_v32 = vrot.slane %v2766_v23, %v7719_v14 }
 0xa5d   : > { %v2784_v36 = vcombine.low %v2765_v50, %v2781_v30  ;;  %v2783_v40 = vcombine.high %v2758_v31, %v2774_v32  ;;  %v2782_v41 = vcombine.low %v2758_v31, %v2774_v32  ;;  %v2785_v44 = vcombine.high %v2765_v50, %v2781_v30  ;;  %v6166_v31 = vld [vmem:[%s765_s20] sm:$0xff]   ;;  %v6167_v32 = vld [vmem:[%s765_s20 + $0x8] sm:$0xff]  }
 0xa5e   : > { %5815 = vmatpush3.bf16.msra.mxu1 %v6166_v31 }
 0xa5f   : > { %v6133_v42 = vpack.i.bf16 %v2784_v36, %v1896_v34  ;;  %v6128_v43 = vpack.i.bf16 %v2783_v40, %v1895_v37  ;;  %v6138_v25 = vpack.i.bf16 %v2785_v44, %v1897_v45  ;;  %5816 = vmatprep.subr.bf16.mxu1 %v6800_v4  ;;  %v3055_v34 = vsub.s32 7, %v7470_v8 }
 0xa61   : > { %6134 = vrot.lane.b32.xlu1 %v6133_v42, %s6810_s7  ;;  %6129 = vrot.lane.b32.xlu0 %v6128_v43, %s6811_s5  ;;  %v3056_v36 = vrot.slane %v7777_v47, %v3055_v34 }
 0xa62   : > { %5817 = vmatpush3.bf16.msra.mxu1 %v6167_v32 }
 0xa63   : > { %5830 = vmatprep.subr.bf16.mxu1 %v6800_v4 }
 0xa65   : > { %6139 = vrot.lane.b32.xlu1 %v6138_v25, %s6812_s13 }
 0xad3   : > { %v6135_v38 = vpop.permute.xlu1 %6134  ;;  %v6130_v48 = vpop.permute.xlu0 %6129 }
 0xad4   : > { %v6132_v51 = vunpack.i.h.bf16 %v6130_v48  ;;  %v6131_v3 = vunpack.i.l.bf16 %v6130_v48  ;;  %v6137_v52 = vunpack.i.h.bf16 %v6135_v38  ;;  %v6136_v53 = vunpack.i.l.bf16 %v6135_v38 }
 0xad6   : > { %v1910_v54 = vsel %vm1120_vm4, %v1894_v63, %v6131_v3  ;;  %v2798_v24 = vsel %vm1120_vm4, %v2782_v41, %v6132_v51  ;;  %v2809_v63 = vrot.slane %v7777_v47, %v2808_v46 }
 0xad7   : > { %v6140_v55 = vpop.permute.xlu1 %6139  ;;  %v1912_v35 = vsel %vm1911_vm13, %v1910_v54, %v6136_v53  ;;  %v2799_v59 = vsel %vm1911_vm13, %v2798_v24, %v6137_v52 }
 0xad8   : > { %v6142_v56 = vunpack.i.h.bf16 %v6140_v55  ;;  %v6141_v57 = vunpack.i.l.bf16 %v6140_v55  ;;  %v2897_v55 = vsub.s32 4, %v7470_v8 }
 0xada   : > { %v1914_v49 = vsel %vm1913_vm14, %v1912_v35, %v6141_v57  ;;  %v2800_v60 = vsel %vm1913_vm14, %v2799_v59, %v6142_v56  ;;  %v2898_v56 = vrot.slane %v7777_v47, %v2897_v55  ;;  %v2903_v57 = vsub.s32 5, %v7470_v8 }
 0xadb   : > { %v2801_v18 = vpack.c.bf16 %v2800_v60, %v1914_v49 }
 0xadd   : > { %5811 = vmatmul.mubr.msk.bf16.vlgmr.msra.gmra.mrb[36].mxu0 %vm942_vm2, %v2801_v18 }
 0xade   : > { %5826 = vmatprep.mubr.msk.bf16.mxu0 %vm942_vm2, %v6164_v15  ;;  %5823 = vmatpush3.bf16.msra.mxu0 %v6162_v11 }
 0xadf   : > { %5824 = vmatprep.subr.bf16.mxu0 %v6163_v12 }
 0xae2   : > { %5825 = vmatpush3.bf16.msra.mxu0 %v6163_v12 }
 0xae3   : > { %5836 = vmatprep.subr.bf16.mxu0 %v6800_v4 }
 0xae5   : > { %5827 = vmatmul.mubr.msk.bf16.vlgmr.msra.gmra.mrb[40].mxu0 %vm942_vm2, %v6165_v58 }
 0xae6   : > { %5838 = vmatprep.mubr.msk.bf16.mxu0 %vm6801_vm1, %v6800_v4 }
 0xbb0   : > { %v2859_v27 = vpop.f32.mrb[36].mxu0 }
 0xbb1   : > { %v2860_v26 = vadd.f32 %v2859_v27, %v2809_v63  ;;  %v5812_v61 = vpop.f32.mrb[37].mxu0 }
 0xbb2   : > { %v2862_v0 = vpop.f32.mrb[38].mxu0 }
 0xbb3   : > { %v2863_v1 = vadd.f32 %v2862_v0, %v2809_v63  ;;  %v5813_v39 = vpop.f32.mrb[39].mxu0  ;;  %v2866_v2 = vadd.f32 %v6257_v28, %v2860_v26  ;;  %v2904_v63 = vrot.slane %v7777_v47, %v2903_v57 }
 0xbb5   : > { %v2868_v5 = vsel %vm942_vm2, %v2866_v2, 0.0  ;;  %v2867_v7 = vadd.f32 %v6258_v6, %v2863_v1 }
 0xbb6   : > { %2869 = vadd.xlane.f32.xlu1 %v2868_v5 }
 0xbb7   : > { %v2871_v9 = vsel %vm942_vm2, %v2867_v7, 0.0 }
 0xbb8   : > { %2872 = vadd.xlane.f32.xlu0 %v2871_v9  ;;  %v7803_v37 = vpop.f32.mrb[40].mxu0 }
 0xbb9   : > { %v3059_v40 = vadd.f32 %v7803_v37, %v3056_v36  ;;  %v7806_v41 = vpop.f32.mrb[41].mxu0 }
 0xbba   : > { %v3057_v42 = vadd.f32 %v3056_v36, %v7806_v41  ;;  %v7809_v43 = vpop.f32.mrb[42].mxu0 }
 0xbbb   : > { %v3060_v44 = vadd.f32 %v7809_v43, %v3056_v36  ;;  %v7812_v45 = vpop.f32.mrb[43].mxu0 }
 0xbbc   : > { %v3058_v25 = vadd.f32 %v3056_v36, %v7812_v45 }
 0xbbd   : > { %v7815_v38 = vpack.c.bf16 %v3060_v44, %v3059_v40 }
 0xbbe   : > { %v3074_v48 = vpack.c.bf16 %v3058_v25, %v3057_v42 }
 0xc43   : > { %v2870_v16 = vpop.xlane.xlu1 %2869 }
 0xc44   : > { %v2875_v17 = vmul.f32 0.03125, %v2870_v16 }
 0xc45   : > { %v2873_v19 = vpop.xlane.xlu0 %2872 }
 0xc46   : > { %v2877_v20 = vsub.f32 %v2866_v2, %v2875_v17  ;;  %v2876_v21 = vmul.f32 0.03125, %v2873_v19  ;;  %v2914_v2 = vsub.s32 6, %v7470_v8  ;;  %v7856_v17 = vld [vmem:[%s7453_s15 + $0x8] sm:$0xff] }
 0xc47   : > { %v3064_v19 = vrot.slane %v7856_v17, %v989_v13 }
 0xc48   : > { %v2878_v22 = vsub.f32 %v2867_v7, %v2876_v21  ;;  %v2879_v23 = vmul.f32 %v2877_v20, %v2877_v20  ;;  %v2915_v5 = vrot.slane %v7777_v47, %v2914_v2 }
 0xc4a   : > { %v2881_v29 = vsel %vm942_vm2, %v2879_v23, 0.0  ;;  %v2880_v50 = vmul.f32 %v2878_v22, %v2878_v22 }
 0xc4b   : > { %2882 = vadd.xlane.f32.xlu1 %v2881_v29 }
 0xc4c   : > { %v2884_v30 = vsel %vm942_vm2, %v2880_v50, 0.0 }
 0xc4d   : > { %2885 = vadd.xlane.f32.xlu0 %v2884_v30 }
 0xc5c   : > { %3086 = vrot.lane.b32.xlu1 %v3074_v48, %s6804_s25 }
 0xc60   : > { %3092 = vrot.lane.b32.xlu1 %v3074_v48, %s6805_s18 }
 0xc63   : > { %3089 = vrot.lane.b32.xlu0 %v3074_v48, %s6803_s21 }
 0xc81   : > { %3108 = vxpose.xlu0.c.b16.start.end [1/1] (short) (narrow) %v3074_v48, 16  ;;  %v5559_v48 = vld [vmem:[#allocation9] ss:$0 sm:$0xff] }
 0xcd8   : > { %v2883_v51 = vpop.xlane.xlu1 %2882 }
 0xcd9   : > { %v2887_v3 = vmul.f32 0.03125, %v2883_v51 }
 0xcda   : > { %v2886_v52 = vpop.xlane.xlu0 %2885 }
 0xcdb   : > { %v2889_v53 = vadd.f32 1e-05, %v2887_v3  ;;  %v2888_v54 = vmul.f32 0.03125, %v2886_v52 }
 0xcdc   : > { %v3087_v47 = vpop.permute.xlu1 %3086 }
 0xcdd   : > { %6208 = vrsqrt.f32 %v2889_v53  ;;  %v2890_v24 = vadd.f32 1e-05, %v2888_v54 }
 0xcde   : > { %v3090_v1 = vpop.permute.xlu0 %3089 }
 0xcdf   : > { %6210 = vrsqrt.f32 %v2890_v24 }
 0xce0   : > { %v3093_v16 = vpop.permute.xlu1 %3092 }
 0xce7   : > { %v6209_v35 = vpop.eup %6208  ;;  %v3116_v39 = vpop.trf.xlu0 }
 0xce8   : > { %v2893_v59 = vmul.f32 %v6209_v35, %v2877_v20  ;;  %v3176_v28 = vsel %vm1124_vm3, %v3116_v39, 0 }
 0xce9   : > { %v6211_v49 = vpop.eup %6210 }
 0xcea   : > { %v2899_v60 = vmul.f32 %v2898_v56, %v2893_v59  ;;  %v2894_v18 = vmul.f32 %v6211_v49, %v2878_v22 }
 0xcec   : > { %v2900_v27 = vmul.f32 %v2898_v56, %v2894_v18  ;;  %v7828_v26 = vadd.f32 %v2904_v63, %v2899_v60 }
 0xcee   : > { %v7830_v61 = vadd.f32 %v2904_v63, %v2900_v27 }
 0xcf0   : > { %v2907_v0 = vpack.c.bf16 %v7830_v61, %v7828_v26 }
 0xcf2   : > { %5819 = vmatmul.mubr.msk.bf16.vlgmr.msra.gmra.mrb[32].mxu1 %vm942_vm2, %v2907_v0 }
 0xcf3   : > { %5832 = vmatprep.mubr.msk.bf16.mxu1 %vm6801_vm1, %v6800_v4  ;;  %5831 = vmatpush3.bf16.msra.mxu1 %v3176_v28 }
 0xcf4   : > { %5842 = vmatprep.subr.bf16.mxu1 %v6800_v4 }
 0xdc5   : > { %v2965_v6 = vpop.f32.mrb[32].mxu1 }
 0xdc6   : > { %v5820_v7 = vpop.f32.mrb[33].mxu1  ;;  %v2966_v11 = vadd.f32 %v2965_v6, %v2915_v5 }
 0xdc7   : > { %v2968_v9 = vpop.f32.mrb[34].mxu1 }
 0xdc8   : > { %v2969_v12 = vadd.f32 %v2968_v9, %v2915_v5  ;;  %v5821_v15 = vpop.f32.mrb[35].mxu1 }
 0xdca   : > { %v7843_v58 = vpack.c.bf16 %v2969_v12, %v2966_v11 }
 0xdcc   : > { %3081 = vrot.lane.b32.xlu0 %v7843_v58, %s6803_s21  ;;  %5833 = vmatmul.mubr.msk.bf16.vlgmr.msra.gmra.mrb[36].mxu1 %vm1120_vm4, %v7843_v58 }
 0xdcd   : > { %3079 = vrot.lane.b32.xlu1 %v7843_v58, %s6804_s25  ;;  %5844 = vmatprep.mubr.msk.bf16.mxu1 %vm6801_vm1, %v6800_v4 }
 0xdd1   : > { %3083 = vrot.lane.b32.xlu1 %v7843_v58, %s6805_s18 }
 0xdea   : > { %3140 = vxpose.xlu0.c.b16.start.end [1/1] (short) (narrow) %v3090_v1, 16 }
 0xdee   : > { %3156 = vxpose.xlu0.c.b16.start.end [1/1] (short) (narrow) %v3093_v16, 16 }
 0xdf4   : > { %3124 = vxpose.xlu1.c.b16.start.end [1/1] (short) (narrow) %v3087_v47, 16 }
 0xdf8   : > { %3066 = vrot.lane.b32.xlu1 %v3064_v19, %s6802_s26 }
 0xe3e   : > { %v7862_v20 = vpop.permute.xlu0 %3081 }
 0xe3f   : > { %v7864_v21 = vpop.permute.xlu1 %3079 }
 0xe43   : > { %v7870_v29 = vpop.permute.xlu1 %3083 }
 0xe50   : > { %v3148_v22 = vpop.trf.xlu0 }
 0xe51   : > { %v3268_v23 = vsel %vm1124_vm3, %v3148_v22, 0 }
 0xe52   : > { %5843 = vmatpush3.bf16.msra.mxu1 %v3268_v23 }
 0xe53   : > { %5854 = vmatprep.subr.bf16.mxu1 %v6800_v4 }
 0xe54   : > { %v3164_v50 = vpop.trf.xlu0 }
 0xe55   : > { %5845 = vmatmul.mubr.msk.bf16.vlgmr.msra.gmra.mrb[40].mxu1 %vm1120_vm4, %v7862_v20  ;;  %v3314_v31 = vsel %vm1124_vm3, %v3164_v50, 0 }
 0xe56   : > { %5856 = vmatprep.mubr.msk.bf16.mxu1 %vm6801_vm1, %v6800_v4 }
 0xe5a   : > { %v3132_v13 = vpop.trf.xlu1 }
 0xe5b   : > { %v3222_v30 = vsel %vm1124_vm3, %v3132_v13, 0 }
 0xe5c   : > { %5837 = vmatpush3.bf16.msra.mxu0 %v3222_v30 }
 0xe5d   : > { %5848 = vmatprep.subr.bf16.mxu0 %v6800_v4 }
 0xe5f   : > { %5839 = vmatmul.mubr.msk.bf16.vlgmr.msra.gmra.mrb[44].mxu0 %vm1120_vm4, %v7864_v21 }
 0xe60   : > { %5849 = vmatpush3.bf16.msra.mxu0 %v3314_v31  ;;  %5850 = vmatprep.mubr.msk.bf16.mxu0 %vm6801_vm1, %v6800_v4 }
 0xe61   : > { %5860 = vmatprep.subr.bf16.mxu0 %v6800_v4 }
 0xe67   : > { %5851 = vmatmul.mubr.msk.bf16.vlgmr.msra.gmra.mrb[48].mxu0 %vm1120_vm4, %v7870_v29 }
 0xe68   : > { %5862 = vmatprep.mubr.msk.bf16.mxu0 %vm6801_vm1, %v6800_v4 }
 0xe6a   : > { %v3067_v32 = vpop.permute.xlu1 %3066 }
 0xe6b   : > { %v3069_v34 = vadd.f32 %v3067_v32, %v7806_v41  ;;  %v3070_v36 = vadd.f32 %v3067_v32, %v7812_v45  ;;  %v3071_v40 = vadd.f32 %v7803_v37, %v3067_v32  ;;  %v3072_v42 = vadd.f32 %v7809_v43, %v3067_v32 }
 0xe6d   : > { %v3076_v44 = vpack.c.bf16 %v3070_v36, %v3069_v34  ;;  %v7890_v25 = vpack.c.bf16 %v3072_v42, %v3071_v40 }
 0xe9f   : > { %v3212_v51 = vpop.f32.mrb[36].mxu1 }
 0xea0   : > { %v3213_v3 = vadd.f32 %v5559_v48, %v3212_v51  ;;  %v5834_v52 = vpop.f32.mrb[37].mxu1 }
 0xea1   : > { %v3215_v53 = vpop.f32.mrb[38].mxu1 }
 0xea2   : > { %v5835_v54 = vpop.f32.mrb[39].mxu1  ;;  %v3356_v24 = vsel %vm1911_vm13, %v3213_v3, -inf }
 0xea3   : > { %3357 = vmax.xlane.f32.xlu0 %v3356_v24 }
 0xf28   : > { %v3304_v56 = vpop.f32.mrb[40].mxu1 }
 0xf29   : > { %v3305_v41 = vadd.f32 %v5559_v48, %v3304_v56  ;;  %v5846_v35 = vpop.f32.mrb[41].mxu1 }
 0xf2a   : > { %v3307_v45 = vpop.f32.mrb[42].mxu1 }
 0xf2b   : > { %v5847_v59 = vpop.f32.mrb[43].mxu1  ;;  %v3362_v37 = vsel %vm1911_vm13, %v3305_v41, -inf }
 0xf2c   : > { %3363 = vmax.xlane.f32.xlu0 %v3362_v37 }
 0xf30   : > { %v3358_v7 = vpop.xlane.xlu0 %3357 }
 0xf31   : > { %v3368_v47 = vmax.f32 %v3358_v7, -1e+30 }
 0xf32   : > { %v3258_v43 = vpop.f32.mrb[44].mxu0 }
 0xf33   : > { %v3259_v49 = vadd.f32 %v5559_v48, %v3258_v43  ;;  %v5840_v60 = vpop.f32.mrb[45].mxu0  ;;  %v3372_v19 = vsub.f32 %v3213_v3, %v3368_v47 }
 0xf34   : > { %v3261_v18 = vpop.f32.mrb[46].mxu0 }
 0xf35   : > { %v5841_v63 = vpop.f32.mrb[47].mxu0  ;;  %v3359_v27 = vsel %vm1911_vm13, %v3259_v49, -inf  ;;  %v3376_v23 = vmul.f32 1.442695, %v3372_v19 }
 0xf36   : > { %3360 = vmax.xlane.f32.xlu1 %v3359_v27 }
 0xf37   : > { %6212 = vpow2.f32 %v3376_v23 }
 0xf3a   : > { %v3350_v0 = vpop.f32.mrb[48].mxu0 }
 0xf3b   : > { %v3351_v1 = vadd.f32 %v5559_v48, %v3350_v0  ;;  %v5852_v39 = vpop.f32.mrb[49].mxu0 }
 0xf3c   : > { %v3353_v28 = vpop.f32.mrb[50].mxu0 }
 0xf3d   : > { %v5853_v5 = vpop.f32.mrb[51].mxu0  ;;  %v3365_v6 = vsel %vm1911_vm13, %v3351_v1, -inf }
 0xf3e   : > { %3366 = vmax.xlane.f32.xlu0 %v3365_v6 }
 0xf41   : > { %v6213_v40 = vpop.eup %6212 }
 0xf47   : > { %3098 = vrot.lane.b32.xlu1 %v3076_v44, %s6803_s21 }
 0xf54   : > { %3096 = vrot.lane.b32.xlu0 %v3076_v44, %s6804_s25 }
 0xf58   : > { %3100 = vrot.lane.b32.xlu0 %v3076_v44, %s6805_s18 }
 0xf5c   : > { %3424 = vrot.lane.b32.xlu0 %v3076_v44, %s6806_s30  ;;  %v3384_v44 = vsel %vm1911_vm13, %v6213_v40, 0.0 }
 0xfb9   : > { %v3364_v11 = vpop.xlane.xlu0 %3363 }
 0xfba   : > { %v3370_v22 = vmax.f32 %v3364_v11, -1e+30 }
 0xfbc   : > { %v3374_v13 = vsub.f32 %v3305_v41, %v3370_v22 }
 0xfbe   : > { %v3380_v50 = vmul.f32 1.442695, %v3374_v13 }
 0xfc0   : > { %6214 = vpow2.f32 %v3380_v50 }
 0xfc3   : > { %v3361_v9 = vpop.xlane.xlu1 %3360 }
 0xfc4   : > { %v3369_v30 = vmax.f32 %v3361_v9, -1e+30 }
 0xfc6   : > { %v3373_v31 = vsub.f32 %v3259_v49, %v3369_v30 }
 0xfc7   : > { %v3099_v12 = vpop.permute.xlu1 %3098 }
 0xfc8   : > { %3428 = vrot.lane.b32.xlu0 %v3099_v12, %s6806_s30  ;;  %v3378_v34 = vmul.f32 1.442695, %v3373_v31 }
 0xfca   : > { %6216 = vpow2.f32 %v3378_v34  ;;  %v6215_v48 = vpop.eup %6214 }
 0xfcb   : > { %v3367_v15 = vpop.xlane.xlu0 %3366  ;;  %v3390_v51 = vsel %vm1911_vm13, %v6215_v48, 0.0 }
 0xfcc   : > { %v3371_v32 = vmax.f32 %v3367_v15, -1e+30 }
 0xfce   : > { %v3375_v36 = vsub.f32 %v3351_v1, %v3371_v32 }
 0xfcf   : > { %v3097_v16 = vpop.permute.xlu0 %3096 }
 0xfd0   : > { %3426 = vrot.lane.b32.xlu1 %v3097_v16, %s6806_s30  ;;  %v3382_v42 = vmul.f32 1.442695, %v3375_v36 }
 0xfd2   : > { %6218 = vpow2.f32 %v3382_v42 }
 0xfd3   : > { %v3101_v24 = vpop.permute.xlu0 %3100 }
 0xfd4   : > { %v6217_v3 = vpop.eup %6216 }
 0xfd5   : > { %v3387_v52 = vsel %vm1911_vm13, %v6217_v3, 0.0 }
 0xfd7   : > { %v3425_v56 = vpop.permute.xlu0 %3424 }
 0xfdc   : > { %v7905_v53 = vpop.eup %6218 }
 0xfdd   : > { %v3393_v54 = vsel %vm1911_vm13, %v7905_v53, 0.0 }
 0xfe7   : > { %3385 = vadd.xlane.f32.xlu0 %v3384_v44 }
 0xfeb   : > { %3391 = vadd.xlane.f32.xlu0 %v3390_v51  ;;  %v4050_v51 = vrot.slane %v7843_v58, 4 }
 0xff4   : > { %3388 = vadd.xlane.f32.xlu1 %v3387_v52 }
 0xff8   : > { %3394 = vadd.xlane.f32.xlu1 %v3393_v54 }
0x1001   : > { %3964 = vrot.lane.b32.xlu0 %v7815_v38, %s6804_s25 }
0x1005   : > { %3967 = vrot.lane.b32.xlu0 %v7815_v38, %s6803_s21 }
0x1009   : > { %3430 = vrot.lane.b32.xlu1 %v3101_v24, %s6806_s30  ;;  %3970 = vrot.lane.b32.xlu0 %v7815_v38, %s6805_s18 }
0x102c   : > { %3436 = vxpose.xlu1.c.b16.start.end [1/1] (short) (narrow) %v3425_v56, 16  ;;  %v4097_v56 = vrot.slane %v7864_v21, 4 }
0x103a   : > { %v3429_v35 = vpop.permute.xlu0 %3428 }
0x1042   : > { %v3427_v41 = vpop.permute.xlu1 %3426 }
0x1043   : > { %3452 = vxpose.xlu0.c.b16.start.end [1/1] (short) (narrow) %v3427_v41, 16 }
0x1047   : > { %3468 = vxpose.xlu0.c.b16.start.end [1/1] (short) (narrow) %v3429_v35, 16  ;;  %v4191_v35 = vrot.slane %v7870_v29, 4 }
0x104b   : > { %3986 = vxpose.xlu0.c.b16.start.end [1/1] (short) (narrow) %v7815_v38, 16 }
0x1074   : > { %v3386_v45 = vpop.xlane.xlu0 %3385 }
0x1075   : > { %vm3396_vm15 = vcmp.eq.f32.partialorder %v3386_v45, 0.0 }
0x1076   : > { %v5564_v59 = vsel %vm3396_vm15, 1.0, %v6800_v4 }
0x1077   : > { %v3408_v37 = vadd.f32 %v5564_v59, %v3386_v45 }
0x1078   : > { %v3392_v43 = vpop.xlane.xlu0 %3391 }
0x1079   : > { %6220 = vrcp.f32 %v3408_v37  ;;  %vm3398_vm0 = vcmp.eq.f32.partialorder %v3392_v43, 0.0 }
0x107a   : > { %v5566_v49 = vsel %vm3398_vm0, 1.0, %v6800_v4 }
0x107b   : > { %v3410_v60 = vadd.f32 %v5566_v49, %v3392_v43 }
0x107c   : > { %v3965_v18 = vpop.permute.xlu0 %3964 }
0x107d   : > { %6222 = vrcp.f32 %v3410_v60 }
0x1080   : > { %v3968_v63 = vpop.permute.xlu0 %3967 }
0x1081   : > { %4018 = vxpose.xlu0.c.b16.start.end [1/1] (short) (narrow) %v3968_v63, 16  ;;  %v3389_v27 = vpop.xlane.xlu1 %3388 }
0x1082   : > { %vm3397_vm5 = vcmp.eq.f32.partialorder %v3389_v27, 0.0 }
0x1083   : > { %v6221_v0 = vpop.eup %6220  ;;  %v5565_v38 = vsel %vm3397_vm5, 1.0, %v6800_v4 }
0x1084   : > { %v3409_v1 = vadd.f32 %v5565_v38, %v3389_v27  ;;  %v3416_v39 = vmul.f32 %v6221_v0, %v6213_v40  ;;  %v3971_v16 = vpop.permute.xlu0 %3970  ;;  %v5574_v38 = vld [vmem:[#allocation9 + $0x1] ss:$0 sm:$0xff] }
0x1085   : > { %v3395_v28 = vpop.xlane.xlu1 %3394 }
0x1086   : > { %6224 = vrcp.f32 %v3409_v1  ;;  %v3420_v5 = vpack.c.bf16 %v3416_v39, %v3416_v39  ;;  %vm3399_vm6 = vcmp.eq.f32.partialorder %v3395_v28, 0.0 }
0x1087   : > { %v6223_v6 = vpop.eup %6222  ;;  %v5567_v12 = vsel %vm3399_vm6, 1.0, %v6800_v4 }
0x1088   : > { %v3504_v7 = vsel %vm1911_vm13, %v3420_v5, 0  ;;  %v3418_v11 = vmul.f32 %v6223_v6, %v6215_v48  ;;  %v3411_v19 = vadd.f32 %v5567_v12, %v3395_v28 }
0x1089   : > { %5855 = vmatpush3.bf16.xpose.msra.mxu1 %v3504_v7  ;;  %v3431_v9 = vpop.permute.xlu1 %3430 }
0x108a   : > { %3484 = vxpose.xlu1.c.b16.start.end [1/1] (short) (narrow) %v3431_v9, 16  ;;  %5866 = vmatprep.subr.bf16.mxu1 %v6800_v4  ;;  %v3422_v15 = vpack.c.bf16 %v3418_v11, %v3418_v11  ;;  %6226 = vrcp.f32 %v3411_v19 }
0x108c   : > { %v3596_v13 = vsel %vm1911_vm13, %v3422_v15, 0 }
0x108e   : > { %4002 = vxpose.xlu1.c.b16.start.end [1/1] (short) (narrow) %v3965_v18, 16 }
0x1090   : > { %v6225_v47 = vpop.eup %6224 }
0x1091   : > { %v3417_v22 = vmul.f32 %v6225_v47, %v6217_v3 }
0x1092   : > { %4034 = vxpose.xlu1.c.b16.start.end [1/1] (short) (narrow) %v3971_v16, 16  ;;  %v3444_v23 = vpop.trf.xlu1 }
0x1093   : > { %5857 = vmatmul.mubr.msk.bf16.vlgmr.msra.gmra.mrb[44].mxu1 %vm1911_vm13, %v3444_v23  ;;  %v3421_v50 = vpack.c.bf16 %v3417_v22, %v3417_v22 }
0x1094   : > { %5867 = vmatpush3.bf16.xpose.msra.mxu1 %v3596_v13  ;;  %5868 = vmatprep.mubr.msk.bf16.mxu1 %vm6801_vm1, %v6800_v4  ;;  %v6227_v31 = vpop.eup %6226 }
0x1095   : > { %v3550_v30 = vsel %vm1911_vm13, %v3421_v50, 0  ;;  %5878 = vmatprep.subr.bf16.mxu1 %v6800_v4  ;;  %v3419_v32 = vmul.f32 %v6227_v31, %v7905_v53  ;;  %v4144_v53 = vrot.slane %v7862_v20, 4 }
0x1096   : > { %5861 = vmatpush3.bf16.xpose.msra.mxu0 %v3550_v30 }
0x1097   : > { %5872 = vmatprep.subr.bf16.mxu0 %v6800_v4  ;;  %v3423_v34 = vpack.c.bf16 %v3419_v32, %v3419_v32 }
0x1099   : > { %v3642_v40 = vsel %vm1911_vm13, %v3423_v34, 0 }
0x10a9   : > { %v3460_v36 = vpop.trf.xlu0 }
0x10aa   : > { %5863 = vmatmul.mubr.msk.bf16.vlgmr.msra.gmra.mrb[52].mxu0 %vm1911_vm13, %v3460_v36 }
0x10ab   : > { %5873 = vmatpush3.bf16.xpose.msra.mxu0 %v3642_v40  ;;  %5874 = vmatprep.mubr.msk.bf16.mxu0 %vm6801_vm1, %v6800_v4 }
0x10ac   : > { %5884 = vmatprep.subr.bf16.mxu0 %v6800_v4 }
0x10ad   : > { %v3476_v42 = vpop.trf.xlu0 }
0x10ae   : > { %5869 = vmatmul.mubr.msk.bf16.vlgmr.msra.gmra.mrb[48].mxu1 %vm1911_vm13, %v3476_v42 }
0x10af   : > { %5880 = vmatprep.mubr.msk.bf16.mxu1 %vm6801_vm1, %v6800_v4 }
0x10b1   : > { %v3994_v44 = vpop.trf.xlu0 }
0x10b2   : > { %v4055_v48 = vsel %vm1124_vm3, %v3994_v44, 0 }
0x10b3   : > { %5879 = vmatpush3.bf16.msra.mxu1 %v4055_v48 }
0x10b4   : > { %5890 = vmatprep.subr.bf16.mxu1 %v6800_v4 }
0x10b6   : > { %5881 = vmatmul.mubr.msk.bf16.vlgmr.msra.gmra.mrb[52].mxu1 %vm1120_vm4, %v4050_v51 }
0x10b7   : > { %5892 = vmatprep.mubr.msk.bf16.mxu1 %vm6801_vm1, %v6800_v4 }
0x10e7   : > { %v4026_v3 = vpop.trf.xlu0 }
0x10e8   : > { %v4149_v52 = vsel %vm1124_vm3, %v4026_v3, 0 }
0x10e9   : > { %5891 = vmatpush3.bf16.msra.mxu1 %v4149_v52 }
0x10ea   : > { %5902 = vmatprep.subr.bf16.mxu1 %v6800_v4 }
0x10ec   : > { %5893 = vmatmul.mubr.msk.bf16.vlgmr.msra.gmra.mrb[56].mxu1 %vm1120_vm4, %v4144_v53 }
0x10ed   : > { %5904 = vmatprep.mubr.msk.bf16.mxu1 %vm6801_vm1, %v6800_v4 }
0x10f0   : > { %v3492_v58 = vpop.trf.xlu1 }
0x10f1   : > { %5875 = vmatmul.mubr.msk.bf16.vlgmr.msra.gmra.mrb[56].mxu0 %vm1911_vm13, %v3492_v58 }
0x10f2   : > { %5886 = vmatprep.mubr.msk.bf16.mxu0 %vm6801_vm1, %v6800_v4 }
0x10f4   : > { %v4010_v54 = vpop.trf.xlu1 }
0x10f5   : > { %v4102_v24 = vsel %vm1124_vm3, %v4010_v54, 0 }
0x10f6   : > { %5885 = vmatpush3.bf16.msra.mxu0 %v4102_v24 }
0x10f7   : > { %5896 = vmatprep.subr.bf16.mxu0 %v6800_v4 }
0x10f8   : > { %v4042_v20 = vpop.trf.xlu1 }
0x10f9   : > { %5887 = vmatmul.mubr.msk.bf16.vlgmr.msra.gmra.mrb[60].mxu0 %vm1120_vm4, %v4097_v56  ;;  %v4196_v41 = vsel %vm1124_vm3, %v4042_v20, 0 }
0x10fa   : > { %5897 = vmatpush3.bf16.msra.mxu0 %v4196_v41  ;;  %5898 = vmatprep.mubr.msk.bf16.mxu0 %vm6801_vm1, %v6800_v4 }
0x10fb   : > { %5908 = vmatprep.subr.bf16.mxu0 %v6800_v4 }
0x1101   : > { %5899 = vmatmul.mubr.msk.bf16.vlgmr.msra.gmra.mrb[64].mxu0 %vm1120_vm4, %v4191_v35 }
0x1102   : > { %5910 = vmatprep.mubr.msk.bf16.mxu0 %vm6801_vm1, %v6800_v4 }
0x1166   : > { %v7966_v21 = vpop.f32.mrb[44].mxu1 }
0x1167   : > { %v5858_v45 = vpop.f32.mrb[45].mxu1 }
0x1168   : > { %v3543_v59 = vpop.f32.mrb[46].mxu1 }
0x1169   : > { %v5859_v37 = vpop.f32.mrb[47].mxu1 }
0x117d   : > { %v7968_v43 = vpop.f32.mrb[52].mxu0 }
0x117e   : > { %v5864_v49 = vpop.f32.mrb[53].mxu0 }
0x117f   : > { %v3589_v60 = vpop.f32.mrb[54].mxu0 }
0x1180   : > { %v5865_v18 = vpop.f32.mrb[55].mxu0 }
0x1181   : > { %v7970_v63 = vpop.f32.mrb[48].mxu1 }
0x1182   : > { %v5870_v27 = vpop.f32.mrb[49].mxu1 }
0x1183   : > { %v3635_v0 = vpop.f32.mrb[50].mxu1 }
0x1184   : > { %v5871_v29 = vpop.f32.mrb[51].mxu1 }
0x1189   : > { %v4091_v1 = vpop.f32.mrb[52].mxu1 }
0x118a   : > { %v4092_v39 = vadd.f32 %v5574_v38, %v4091_v1  ;;  %v5882_v28 = vpop.f32.mrb[53].mxu1 }
0x118b   : > { %v4094_v5 = vpop.f32.mrb[54].mxu1 }
0x118c   : > { %v5883_v6 = vpop.f32.mrb[55].mxu1  ;;  %v4238_v7 = vsel %vm1911_vm13, %v4092_v39, -inf }
0x118d   : > { %4239 = vmax.xlane.f32.xlu0 %v4238_v7 }
0x11bf   : > { %v4185_v9 = vpop.f32.mrb[56].mxu1 }
0x11c0   : > { %v4186_v11 = vadd.f32 %v5574_v38, %v4185_v9  ;;  %v5894_v12 = vpop.f32.mrb[57].mxu1 }
0x11c1   : > { %v4188_v15 = vpop.f32.mrb[58].mxu1 }
0x11c2   : > { %v5895_v47 = vpop.f32.mrb[59].mxu1  ;;  %v4244_v16 = vsel %vm1911_vm13, %v4186_v11, -inf }
0x11c3   : > { %4245 = vmax.xlane.f32.xlu0 %v4244_v16 }
0x11c4   : > { %v7974_v19 = vpop.f32.mrb[56].mxu0 }
0x11c5   : > { %v5876_v22 = vpop.f32.mrb[57].mxu0 }
0x11c6   : > { %v3681_v23 = vpop.f32.mrb[58].mxu0 }
0x11c7   : > { %v5877_v13 = vpop.f32.mrb[59].mxu0 }
0x11cc   : > { %v4138_v50 = vpop.f32.mrb[60].mxu0 }
0x11cd   : > { %v4139_v30 = vadd.f32 %v5574_v38, %v4138_v50  ;;  %v5888_v31 = vpop.f32.mrb[61].mxu0 }
0x11ce   : > { %v4141_v32 = vpop.f32.mrb[62].mxu0 }
0x11cf   : > { %v5889_v34 = vpop.f32.mrb[63].mxu0  ;;  %v4241_v36 = vsel %vm1911_vm13, %v4139_v30, -inf }
0x11d0   : > { %4242 = vmax.xlane.f32.xlu1 %v4241_v36 }
0x11d4   : > { %v4232_v40 = vpop.f32.mrb[64].mxu0 }
0x11d5   : > { %v5900_v42 = vpop.f32.mrb[65].mxu0  ;;  %v4233_v51 = vadd.f32 %v5574_v38, %v4232_v40 }
0x11d6   : > { %v4235_v44 = vpop.f32.mrb[66].mxu0 }
0x11d7   : > { %v5901_v48 = vpop.f32.mrb[67].mxu0  ;;  %v4247_v3 = vsel %vm1911_vm13, %v4233_v51, -inf }
0x11d9   : > { %3974 = vrot.lane.b32.xlu0 %v7890_v25, %s6804_s25 }
0x11dd   : > { %4306 = vrot.lane.b32.xlu0 %v7890_v25, %s6806_s30 }
0x11e1   : > { %3976 = vrot.lane.b32.xlu1 %v7890_v25, %s6803_s21 }
0x11e5   : > { %3978 = vrot.lane.b32.xlu1 %v7890_v25, %s6805_s18 }
0x1209   : > { %4248 = vmax.xlane.f32.xlu1 %v4247_v3 }
0x121a   : > { %v4240_v52 = vpop.xlane.xlu0 %4239 }
0x121b   : > { %v4250_v53 = vmax.f32 %v4240_v52, -1e+30 }
0x121d   : > { %v4254_v58 = vsub.f32 %v4092_v39, %v4250_v53 }
0x121f   : > { %v4258_v54 = vmul.f32 1.442695, %v4254_v58 }
0x1221   : > { %6228 = vpow2.f32 %v4258_v54 }
0x122b   : > { %v6229_v24 = vpop.eup %6228 }
0x122c   : > { %v4266_v56 = vsel %vm1911_vm13, %v6229_v24, 0.0 }
0x122d   : > { %4267 = vadd.xlane.f32.xlu0 %v4266_v56 }
0x1250   : > { %v4246_v20 = vpop.xlane.xlu0 %4245 }
0x1251   : > { %v4252_v41 = vmax.f32 %v4246_v20, -1e+30 }
0x1253   : > { %v4256_v35 = vsub.f32 %v4186_v11, %v4252_v41 }
0x1254   : > { %v3975_v45 = vpop.permute.xlu0 %3974 }
0x1255   : > { %v4262_v59 = vmul.f32 1.442695, %v4256_v35  ;;  %4308 = vrot.lane.b32.xlu1 %v3975_v45, %s6806_s30 }
0x1257   : > { %6230 = vpow2.f32 %v4262_v59 }
0x1258   : > { %v4307_v39 = vpop.permute.xlu0 %4306 }
0x125d   : > { %v4243_v25 = vpop.xlane.xlu1 %4242 }
0x125e   : > { %v4251_v37 = vmax.f32 %v4243_v25, -1e+30 }
0x1260   : > { %v4255_v18 = vsub.f32 %v4139_v30, %v4251_v37 }
0x1261   : > { %v6231_v49 = vpop.eup %6230  ;;  %v3977_v29 = vpop.permute.xlu1 %3976 }
0x1262   : > { %v4272_v60 = vsel %vm1911_vm13, %v6231_v49, 0.0  ;;  %v4260_v27 = vmul.f32 1.442695, %v4255_v18 }
0x1263   : > { %4273 = vadd.xlane.f32.xlu0 %v4272_v60 }
0x1264   : > { %6232 = vpow2.f32 %v4260_v27 }
0x1265   : > { %v3979_v1 = vpop.permute.xlu1 %3978 }
0x126e   : > { %v6233_v0 = vpop.eup %6232 }
0x126f   : > { %v4269_v38 = vsel %vm1911_vm13, %v6233_v0, 0.0 }
0x1279   : > { %4270 = vadd.xlane.f32.xlu1 %v4269_v38  ;;  %4310 = vrot.lane.b32.xlu0 %v3977_v29, %s6806_s30 }
0x1296   : > { %v4249_v28 = vpop.xlane.xlu1 %4248 }
0x1297   : > { %v4253_v5 = vmax.f32 %v4249_v28, -1e+30  ;;  %4318 = vxpose.xlu0.c.b16.start.end [1/1] (short) (narrow) %v4307_v39, 16 }
0x1299   : > { %v4257_v6 = vsub.f32 %v4233_v51, %v4253_v5 }
0x129b   : > { %v4264_v7 = vmul.f32 1.442695, %v4257_v6 }
0x129d   : > { %6234 = vpow2.f32 %v4264_v7 }
0x12a7   : > { %v6235_v9 = vpop.eup %6234 }
0x12a8   : > { %v4275_v11 = vsel %vm1911_vm13, %v6235_v9, 0.0 }
0x12a9   : > { %4276 = vadd.xlane.f32.xlu1 %v4275_v11 }
0x12ba   : > { %v4268_v12 = vpop.xlane.xlu0 %4267  ;;  %4312 = vrot.lane.b32.xlu1 %v3979_v1, %s6806_s30 }
0x12bb   : > { %vm4278_vm3 = vcmp.eq.f32.partialorder %v4268_v12, 0.0 }
0x12bc   : > { %v5579_v15 = vsel %vm4278_vm3, 1.0, %v6800_v4 }
0x12bd   : > { %v4290_v47 = vadd.f32 %v5579_v15, %v4268_v12 }
0x12bf   : > { %6236 = vrcp.f32 %v4290_v47 }
0x12c7   : > { %v4309_v50 = vpop.permute.xlu1 %4308 }
0x12c9   : > { %v6237_v16 = vpop.eup %6236 }
0x12ca   : > { %v4298_v22 = vmul.f32 %v6237_v16, %v6229_v24 }
0x12cc   : > { %v4302_v23 = vpack.c.bf16 %v4298_v22, %v4298_v22 }
0x12ce   : > { %v4386_v13 = vsel %vm1911_vm13, %v4302_v23, 0 }
0x12cf   : > { %5903 = vmatpush3.bf16.xpose.msra.mxu1 %v4386_v13 }
0x12d0   : > { %5914 = vmatprep.subr.bf16.mxu1 %v6800_v4 }
0x12dd   : > { %4334 = vxpose.xlu1.c.b16.start.end [1/1] (short) (narrow) %v4309_v50, 16 }
0x12e7   : > { %3684 = vxpose.xlu1.b32.start.end [1/1] (short) (narrow) %v7966_v21, 8 }
0x12eb   : > { %3780 = vxpose.xlu1.b32.start.end [1/1] (short) (narrow) %v7974_v19, 8 }
0x12f0   : > { %v4274_v30 = vpop.xlane.xlu0 %4273 }
0x12f1   : > { %vm4280_vm7 = vcmp.eq.f32.partialorder %v4274_v30, 0.0 }
0x12f2   : > { %v5581_v31 = vsel %vm4280_vm7, 1.0, %v6800_v4 }
0x12f3   : > { %v4292_v32 = vadd.f32 %v5581_v31, %v4274_v30 }
0x12f4   : > { %v4311_v34 = vpop.permute.xlu0 %4310 }
0x12f5   : > { %6238 = vrcp.f32 %v4292_v32  ;;  %4350 = vxpose.xlu0.c.b16.start.end [1/1] (short) (narrow) %v4311_v34, 16 }
0x12fd   : > { %v4326_v36 = vpop.trf.xlu0 }
0x12fe   : > { %5905 = vmatmul.mubr.msk.bf16.vlgmr.msra.gmra.mrb[60].mxu1 %vm1911_vm13, %v4326_v36 }
0x12ff   : > { %v6239_v40 = vpop.eup %6238  ;;  %5916 = vmatprep.mubr.msk.bf16.mxu1 %vm6801_vm1, %v6800_v4 }
0x1300   : > { %v4300_v42 = vmul.f32 %v6239_v40, %v6231_v49 }
0x1302   : > { %v4304_v44 = vpack.c.bf16 %v4300_v42, %v4300_v42 }
0x1304   : > { %v4478_v21 = vsel %vm1911_vm13, %v4304_v44, 0 }
0x1305   : > { %5915 = vmatpush3.bf16.xpose.msra.mxu1 %v4478_v21 }
0x1306   : > { %v4271_v19 = vpop.xlane.xlu1 %4270  ;;  %5926 = vmatprep.subr.bf16.mxu1 %v6800_v4 }
0x1307   : > { %vm4279_vm8 = vcmp.eq.f32.partialorder %v4271_v19, 0.0 }
0x1308   : > { %v5580_v48 = vsel %vm4279_vm8, 1.0, %v6800_v4 }
0x1309   : > { %v4291_v51 = vadd.f32 %v5580_v48, %v4271_v19 }
0x130b   : > { %6240 = vrcp.f32 %v4291_v51 }
0x1315   : > { %v6241_v3 = vpop.eup %6240 }
0x1316   : > { %v4299_v52 = vmul.f32 %v6241_v3, %v6233_v0 }
0x1318   : > { %v4303_v53 = vpack.c.bf16 %v4299_v52, %v4299_v52 }
0x131a   : > { %v4432_v58 = vsel %vm1911_vm13, %v4303_v53, 0 }
0x131b   : > { %5909 = vmatpush3.bf16.xpose.msra.mxu0 %v4432_v58 }
0x131c   : > { %5920 = vmatprep.subr.bf16.mxu0 %v6800_v4 }
0x1336   : > { %v4277_v54 = vpop.xlane.xlu1 %4276 }
0x1337   : > { %vm4281_vm9 = vcmp.eq.f32.partialorder %v4277_v54, 0.0 }
0x1338   : > { %v5582_v24 = vsel %vm4281_vm9, 1.0, %v6800_v4 }
0x1339   : > { %v4293_v56 = vadd.f32 %v5582_v24, %v4277_v54 }
0x133a   : > { %v4313_v20 = vpop.permute.xlu1 %4312 }
0x133b   : > { %6242 = vrcp.f32 %v4293_v56  ;;  %4366 = vxpose.xlu0.c.b16.start.end [1/1] (short) (narrow) %v4313_v20, 16 }
0x133f   : > { %3716 = vxpose.xlu0.b32.start.end [1/1] (short) (narrow) %v7968_v43, 8 }
0x1343   : > { %3748 = vxpose.xlu0.b32.start.end [1/1] (short) (narrow) %v7970_v63, 8  ;;  %v4342_v41 = vpop.trf.xlu1 }
0x1344   : > { %5911 = vmatmul.mubr.msk.bf16.vlgmr.msra.gmra.mrb[68].mxu0 %vm1911_vm13, %v4342_v41 }
0x1345   : > { %v6243_v35 = vpop.eup %6242  ;;  %5922 = vmatprep.mubr.msk.bf16.mxu0 %vm6801_vm1, %v6800_v4 }
0x1346   : > { %v4301_v45 = vmul.f32 %v6243_v35, %v6235_v9 }
0x1348   : > { %v4305_v59 = vpack.c.bf16 %v4301_v45, %v4301_v45 }
0x134a   : > { %v4524_v25 = vsel %vm1911_vm13, %v4305_v59, 0 }
0x134b   : > { %5921 = vmatpush3.bf16.xpose.msra.mxu0 %v4524_v25 }
0x134c   : > { %5934 = vmatprep.subr.bf16.mxu0 %v6800_v4 }
0x135b   : > { %v4358_v37 = vpop.trf.xlu0 }
0x135c   : > { %5917 = vmatmul.mubr.msk.bf16.vlgmr.msra.gmra.mrb[64].mxu1 %vm1911_vm13, %v4358_v37 }
0x135d   : > { %5930 = vmatprep.mubr.msk.bf16.mxu1 %vm6801_vm1, %v6800_v4 }
0x1367   : > { %v3700_v7 = vpop.trf.xlu1 }
0x136b   : > { %v3796_v11 = vpop.trf.xlu1 }
0x13a1   : > { %v4374_v43 = vpop.trf.xlu0 }
0x13a2   : > { %5923 = vmatmul.mubr.msk.bf16.vlgmr.msra.gmra.mrb[72].mxu0 %vm1911_vm13, %v4374_v43 }
0x13a3   : > { %5938 = vmatprep.mubr.msk.bf16.mxu0 %vm6801_vm1, %v6800_v4 }
0x13bf   : > { %v3732_v6 = vpop.trf.xlu0 }
0x13c0   : > { %v3828_v47 = vcombine.low %v3732_v6, %v3796_v11  ;;  %v3829_v16 = vcombine.high %v3732_v6, %v3796_v11 }
0x13c2   : > { %v3836_v13 = vrot.slane %v3828_v47, %v7712_v62  ;;  %v3843_v50 = vrot.slane %v3829_v16, %v7712_v62 }
0x13c3   : > { %v3764_v9 = vpop.trf.xlu0 }
0x13c4   : > { %v3812_v12 = vcombine.low %v3700_v7, %v3764_v9  ;;  %v3813_v15 = vcombine.high %v3700_v7, %v3764_v9 }
0x13c6   : > { %v3820_v22 = vrot.slane %v3812_v12, %v7712_v62  ;;  %v3827_v23 = vrot.slane %v3813_v15, %v7712_v62 }
0x13c8   : > { %v3844_v30 = vcombine.low %v3820_v22, %v3836_v13  ;;  %v3845_v31 = vcombine.high %v3820_v22, %v3836_v13  ;;  %v3860_v32 = vcombine.low %v3827_v23, %v3843_v50  ;;  %v3861_v34 = vcombine.high %v3827_v23, %v3843_v50 }
0x13ca   : > { %v3852_v36 = vrot.slane %v3844_v30, %v7719_v14  ;;  %v3859_v40 = vrot.slane %v3845_v31, %v7719_v14  ;;  %v3868_v42 = vrot.slane %v3860_v32, %v7719_v14  ;;  %v3875_v44 = vrot.slane %v3861_v34, %v7719_v14  ;;  %v6168_v30 = vld [vmem:[%s783_s27] sm:$0xff]  }
0x13cb   : > { %5927 = vmatpush3.bf16.msra.mxu1 %v6168_v30 }
0x13cc   : > { %v3880_v21 = vcombine.low %v3852_v36, %v3859_v40  ;;  %v5572_v19 = vcombine.high %v3852_v36, %v3859_v40  ;;  %v3896_v48 = vcombine.low %v3868_v42, %v3875_v44  ;;  %v5573_v51 = vcombine.high %v3868_v42, %v3875_v44  ;;  %5928 = vmatprep.subr.bf16.mxu1 %v6800_v4 }
0x13ce   : > { %v3887_v3 = vrot.slane %v3880_v21, %v7712_v62  ;;  %v3895_v52 = vrot.slane %v5572_v19, %v7712_v62  ;;  %v3903_v53 = vrot.slane %v3896_v48, %v7712_v62  ;;  %v3911_v58 = vrot.slane %v5573_v51, %v7712_v62  ;;  %v6169_v51 = vld [vmem:[%s783_s27 + $0x8] sm:$0xff]  }
0x13cf   : > { %5929 = vmatpush3.bf16.msra.mxu1 %v6169_v51 }
0x13d0   : > { %v3912_v41 = vcombine.low %v3887_v3, %v3895_v52  ;;  %v3928_v35 = vcombine.low %v3903_v53, %v3911_v58  ;;  %v3913_v47 = vcombine.high %v3887_v3, %v3895_v52  ;;  %v3929_v16 = vcombine.high %v3903_v53, %v3911_v58  ;;  %5942 = vmatprep.subr.bf16.mxu1 %v6800_v4 }
0x13d1   : > { %v4422_v63 = vpop.f32.mrb[60].mxu1 }
0x13d2   : > { %v5906_v49 = vpop.f32.mrb[61].mxu1  ;;  %4566 = vxpose.xlu0.b32.start.end [1/1] (short) (narrow) %v4422_v63, 8  ;;  %v8034_v45 = vrot.slane %v3912_v41, %v7719_v14  ;;  %v8037_v59 = vrot.slane %v3928_v35, %v7719_v14  ;;  %v3927_v40 = vrot.slane %v3913_v47, %v7719_v14  ;;  %v3943_v42 = vrot.slane %v3929_v16, %v7719_v14 }
0x13d3   : > { %v4425_v60 = vpop.f32.mrb[62].mxu1 }
0x13d4   : > { %v5907_v18 = vpop.f32.mrb[63].mxu1  ;;  %v3944_v25 = vcombine.low %v8034_v45, %v8037_v59  ;;  %v3946_v58 = vcombine.low %v3927_v40, %v3943_v42 }
0x1417   : > { %v4468_v27 = vpop.f32.mrb[68].mxu0 }
0x1418   : > { %v5912_v0 = vpop.f32.mrb[69].mxu0  ;;  %4598 = vxpose.xlu1.b32.start.end [1/1] (short) (narrow) %v4468_v27, 8 }
0x1419   : > { %v4471_v29 = vpop.f32.mrb[70].mxu0 }
0x141a   : > { %v5913_v38 = vpop.f32.mrb[71].mxu0 }
0x142f   : > { %v4514_v1 = vpop.f32.mrb[64].mxu1 }
0x1430   : > { %v5918_v39 = vpop.f32.mrb[65].mxu1  ;;  %4630 = vxpose.xlu0.b32.start.end [1/1] (short) (narrow) %v4514_v1, 8 }
0x1431   : > { %v4517_v28 = vpop.f32.mrb[66].mxu1 }
0x1432   : > { %v5919_v5 = vpop.f32.mrb[67].mxu1 }
0x1452   : > { %v4582_v37 = vpop.trf.xlu0 }
0x1475   : > { %v4560_v54 = vpop.f32.mrb[72].mxu0 }
0x1476   : > { %4662 = vxpose.xlu1.b32.start.end [1/1] (short) (narrow) %v4560_v54, 8  ;;  %v5924_v24 = vpop.f32.mrb[73].mxu0 }
0x1477   : > { %v4563_v56 = vpop.f32.mrb[74].mxu0  ;;  %v3945_v24 = vcombine.high %v8034_v45, %v8037_v59  ;;  %v4853_v45 = vrot.slane %v7856_v17, %v995_v10 }
0x1478   : > { %v5925_v20 = vpop.f32.mrb[75].mxu0 }
0x1498   : > { %v4614_v43 = vpop.trf.xlu1 }
0x14b0   : > { %v4646_v63 = vpop.trf.xlu0 }
0x14b1   : > { %v4694_v49 = vcombine.low %v4582_v37, %v4646_v63  ;;  %v4695_v60 = vcombine.high %v4582_v37, %v4646_v63 }
0x14b3   : > { %v4702_v29 = vrot.slane %v4694_v49, %v7712_v62  ;;  %v4709_v38 = vrot.slane %v4695_v60, %v7712_v62 }
0x14f6   : > { %v4678_v18 = vpop.trf.xlu1 }
0x14f7   : > { %v4710_v27 = vcombine.low %v4614_v43, %v4678_v18  ;;  %v4711_v0 = vcombine.high %v4614_v43, %v4678_v18  ;;  %v3947_v43 = vcombine.high %v3927_v40, %v3943_v42  ;;  %v6170_v42 = vld [vmem:[%s792_s3] sm:$0xff]  }
0x14f8   : > { %5935 = vmatpush3.bf16.msra.mxu0 %v6170_v42 }
0x14f9   : > { %v4718_v1 = vrot.slane %v4710_v27, %v7712_v62  ;;  %v4725_v39 = vrot.slane %v4711_v0, %v7712_v62  ;;  %5936 = vmatprep.subr.bf16.mxu0 %v6800_v4 }
0x14fb   : > { %v4726_v28 = vcombine.low %v4702_v29, %v4718_v1  ;;  %v4727_v5 = vcombine.high %v4702_v29, %v4718_v1  ;;  %v4742_v6 = vcombine.low %v4709_v38, %v4725_v39  ;;  %v4743_v7 = vcombine.high %v4709_v38, %v4725_v39 }
0x14fd   : > { %v4734_v9 = vrot.slane %v4726_v28, %v7719_v14  ;;  %v4741_v11 = vrot.slane %v4727_v5, %v7719_v14  ;;  %v4750_v12 = vrot.slane %v4742_v6, %v7719_v14  ;;  %v4757_v15 = vrot.slane %v4743_v7, %v7719_v14 }
0x14ff   : > { %v4762_v22 = vcombine.low %v4734_v9, %v4741_v11  ;;  %v5587_v23 = vcombine.high %v4734_v9, %v4741_v11  ;;  %v4778_v13 = vcombine.low %v4750_v12, %v4757_v15  ;;  %v5588_v50 = vcombine.high %v4750_v12, %v4757_v15 }
0x1501   : > { %v4769_v31 = vrot.slane %v4762_v22, %v7712_v62  ;;  %v4777_v32 = vrot.slane %v5587_v23, %v7712_v62  ;;  %v4785_v34 = vrot.slane %v4778_v13, %v7712_v62  ;;  %v4793_v36 = vrot.slane %v5588_v50, %v7712_v62 }
0x1503   : > { %v4795_v44 = vcombine.high %v4769_v31, %v4777_v32  ;;  %v4811_v21 = vcombine.high %v4785_v34, %v4793_v36  ;;  %v4794_v19 = vcombine.low %v4769_v31, %v4777_v32  ;;  %v4810_v48 = vcombine.low %v4785_v34, %v4793_v36 }
0x1505   : > { %v4809_v3 = vrot.slane %v4795_v44, %v7719_v14  ;;  %v4825_v52 = vrot.slane %v4811_v21, %v7719_v14  ;;  %v4802_v53 = vrot.slane %v4794_v19, %v7719_v14  ;;  %v4818_v62 = vrot.slane %v4810_v48, %v7719_v14  ;;  %v6171_v44 = vld [vmem:[%s792_s3 + $0x8] sm:$0xff]  }
0x1506   : > { %5937 = vmatpush3.bf16.msra.mxu0 %v6171_v44 }
0x1507   : > { %v4828_v54 = vcombine.low %v4809_v3, %v4825_v52  ;;  %v4827_v56 = vcombine.high %v4802_v53, %v4818_v62  ;;  %v4826_v20 = vcombine.low %v4802_v53, %v4818_v62  ;;  %v4829_v37 = vcombine.high %v4809_v3, %v4825_v52  ;;  %v8097_v53 = vld [vmem:[%s7453_s15 + $0x8] sm:$0xff] }
0x1508   : > { %v4941_v62 = vrot.slane %v8097_v53, %v1005_v33  ;;  %v6173_v33 = vld [vmem:[%s7446_s14 + $0x8] sm:$0xff]  }
0x1509   : > { %v6148_v41 = vpack.i.bf16 %v4828_v54, %v3946_v58  ;;  %v6143_v35 = vpack.i.bf16 %v4827_v56, %v3945_v24  ;;  %v6153_v63 = vpack.i.bf16 %v4829_v37, %v3947_v43  ;;  %v4947_v56 = vrot.slane %v8097_v53, %v2808_v46  ;;  %v6175_v46 = vld [vmem:[%s7446_s14 + $0x18] sm:$0xff]  }
0x150b   : > { %6149 = vrot.lane.b32.xlu1 %v6148_v41, %s6810_s7  ;;  %6144 = vrot.lane.b32.xlu0 %v6143_v35, %s6811_s5 }
0x150f   : > { %6154 = vrot.lane.b32.xlu1 %v6153_v63, %s6812_s13 }
0x157d   : > { %v6150_v14 = vpop.permute.xlu1 %6149  ;;  %v6145_v49 = vpop.permute.xlu0 %6144 }
0x157e   : > { %v6147_v60 = vunpack.i.h.bf16 %v6145_v49  ;;  %v6146_v18 = vunpack.i.l.bf16 %v6145_v49  ;;  %v6152_v27 = vunpack.i.h.bf16 %v6150_v14  ;;  %v6151_v0 = vunpack.i.l.bf16 %v6150_v14  ;;  %v6172_v14 = vld [vmem:[%s7446_s14] sm:$0xff]   ;;  %v6174_v49 = vld [vmem:[%s7446_s14 + $0x10] sm:$0xff]  }
0x1580   : > { %v3960_v29 = vsel %vm1120_vm4, %v3944_v25, %v6146_v18  ;;  %v4842_v38 = vsel %vm1120_vm4, %v4826_v20, %v6147_v60  ;;  %v5592_v60 = vld [vmem:[%s818_s22] ss:$0 sm:$0xff] }
0x1581   : > { %v6155_v1 = vpop.permute.xlu1 %6154  ;;  %v3961_v5 = vsel %vm1911_vm13, %v3960_v29, %v6151_v0  ;;  %v4843_v6 = vsel %vm1911_vm13, %v4842_v38, %v6152_v27 }
0x1582   : > { %v6157_v39 = vunpack.i.h.bf16 %v6155_v1  ;;  %v6156_v28 = vunpack.i.l.bf16 %v6155_v1 }
0x1584   : > { %v3962_v7 = vsel %vm1913_vm14, %v3961_v5, %v6156_v28  ;;  %v4844_v9 = vsel %vm1913_vm14, %v4843_v6, %v6157_v39 }
0x1585   : > { %v4845_v11 = vpack.c.bf16 %v4844_v9, %v3962_v7 }
0x1587   : > { %5931 = vmatmul.mubr.msk.bf16.vlgmr.msra.gmra.mrb[68].mxu1 %vm942_vm2, %v4845_v11 }
0x1588   : > { %5950 = vmatprep.mubr.msk.bf16.mxu1 %vm6801_vm1, %v6800_v4  ;;  %5943 = vmatpush3.bf16.msra.mxu1 %v6172_v14  ;;  %vm5073_vm1 = vcmask 523264  }
0x1589   : > { %5944 = vmatprep.subr.bf16.mxu1 %v6800_v4 }
0x158c   : > { %5945 = vmatpush3.bf16.msra.mxu1 %v6173_v33 }
0x158d   : > { %5946 = vmatprep.subr.bf16.mxu1 %v6800_v4 }
0x1590   : > { %5947 = vmatpush3.bf16.msra.mxu1 %v6174_v49 }
0x1591   : > { %5948 = vmatprep.subr.bf16.mxu1 %v6800_v4 }
0x1594   : > { %5949 = vmatpush3.bf16.msra.mxu1 %v6175_v46 }
0x165a   : > { %v4903_v59 = vpop.f32.mrb[68].mxu1 }
0x165b   : > { %v4904_v25 = vadd.f32 %v4903_v59, %v4853_v45  ;;  %v5932_v12 = vpop.f32.mrb[69].mxu1 }
0x165c   : > { %v4906_v15 = vpop.f32.mrb[70].mxu1 }
0x165d   : > { %v4910_v47 = vadd.f32 %v4904_v25, %v7828_v26  ;;  %v4907_v16 = vadd.f32 %v4906_v15, %v4853_v45  ;;  %v5933_v22 = vpop.f32.mrb[71].mxu1 }
0x165f   : > { %v4911_v23 = vadd.f32 %v4907_v16, %v7830_v61  ;;  %v4912_v13 = vsel %vm942_vm2, %v4910_v47, 0.0 }
0x1660   : > { %4913 = vadd.xlane.f32.xlu1 %v4912_v13 }
0x1661   : > { %v4915_v50 = vsel %vm942_vm2, %v4911_v23, 0.0 }
0x1662   : > { %4916 = vadd.xlane.f32.xlu0 %v4915_v50 }
0x16ed   : > { %v4914_v30 = vpop.xlane.xlu1 %4913 }
0x16ee   : > { %v4918_v10 = vmul.f32 0.03125, %v4914_v30  ;;  %v5048_v30 = vrot.slane %v8097_v53, %v2897_v55 }
0x16ef   : > { %v4917_v17 = vpop.xlane.xlu0 %4916 }
0x16f0   : > { %v4920_v31 = vsub.f32 %v4910_v47, %v4918_v10  ;;  %v4919_v32 = vmul.f32 0.03125, %v4917_v17 }
0x16f2   : > { %v4921_v34 = vsub.f32 %v4911_v23, %v4919_v32  ;;  %v4922_v36 = vmul.f32 %v4920_v31, %v4920_v31 }
0x16f4   : > { %v4924_v26 = vsel %vm942_vm2, %v4922_v36, 0.0  ;;  %v4923_v40 = vmul.f32 %v4921_v34, %v4921_v34 }
0x16f5   : > { %4925 = vadd.xlane.f32.xlu0 %v4924_v26 }
0x16f6   : > { %v4927_v61 = vsel %vm942_vm2, %v4923_v40, 0.0 }
0x16f7   : > { %4928 = vadd.xlane.f32.xlu1 %v4927_v61 }
0x1782   : > { %v4926_v21 = vpop.xlane.xlu0 %4925 }
0x1783   : > { %v4930_v19 = vmul.f32 0.03125, %v4926_v21 }
0x1784   : > { %v4929_v48 = vpop.xlane.xlu1 %4928 }
0x1785   : > { %v4932_v51 = vadd.f32 1e-05, %v4930_v19  ;;  %v4931_v3 = vmul.f32 0.03125, %v4929_v48 }
0x1787   : > { %6244 = vrsqrt.f32 %v4932_v51  ;;  %v4933_v52 = vadd.f32 1e-05, %v4931_v3 }
0x1789   : > { %6246 = vrsqrt.f32 %v4933_v52 }
0x1791   : > { %v6245_v58 = vpop.eup %6244 }
0x1792   : > { %v4936_v54 = vmul.f32 %v6245_v58, %v4920_v31 }
0x1793   : > { %v6247_v24 = vpop.eup %6246 }
0x1794   : > { %v4942_v20 = vmul.f32 %v4941_v62, %v4936_v54  ;;  %v4937_v41 = vmul.f32 %v6247_v24, %v4921_v34 }
0x1796   : > { %v4943_v35 = vmul.f32 %v4941_v62, %v4937_v41  ;;  %v4948_v37 = vadd.f32 %v4947_v56, %v4942_v20 }
0x1798   : > { %v4949_v43 = vadd.f32 %v4947_v56, %v4943_v35 }
0x179a   : > { %v4950_v63 = vpack.c.bf16 %v4949_v43, %v4948_v37 }
0x179c   : > { %5939 = vmatmul.mubr.msk.bf16.vlgmr.msra.gmra.mrb[76].mxu0 %vm942_vm2, %v4950_v63  ;;  %v5155_v63 = vrot.slane %v8097_v53, %v2914_v2 }
0x186f   : > { %v5011_v18 = vpop.f32.mrb[76].mxu0 }
0x1870   : > { %v5012_v27 = vadd.f32 %v5592_v60, %v5011_v18  ;;  %v5940_v0 = vpop.f32.mrb[77].mxu0 }
0x1871   : > { %v5014_v29 = vpop.f32.mrb[78].mxu0 }
0x1872   : > { %v5020_v38 = vmul.f32 0.044715, %v5012_v27  ;;  %v5015_v1 = vadd.f32 %v5592_v60, %v5014_v29  ;;  %v5941_v39 = vpop.f32.mrb[79].mxu0  ;;  %v5018_v47 = vmul.f32 0.5, %v5012_v27 }
0x1874   : > { %v5022_v28 = vmul.f32 %v5020_v38, %v5012_v27  ;;  %v5021_v5 = vmul.f32 0.044715, %v5015_v1  ;;  %v5019_v16 = vmul.f32 0.5, %v5015_v1 }
0x1876   : > { %v5024_v6 = vmul.f32 %v5022_v28, %v5012_v27  ;;  %v5023_v7 = vmul.f32 %v5021_v5, %v5015_v1 }
0x1878   : > { %v5026_v9 = vadd.f32 %v5024_v6, %v5012_v27  ;;  %v5025_v11 = vmul.f32 %v5023_v7, %v5015_v1 }
0x187a   : > { %v5028_v45 = vmul.f32 0.7978846, %v5026_v9  ;;  %v5027_v59 = vadd.f32 %v5025_v11, %v5015_v1 }
0x187c   : > { %6248 = vtanh.f32 %v5028_v45  ;;  %v5029_v4 = vmul.f32 0.7978846, %v5027_v59 }
0x187e   : > { %6250 = vtanh.f32 %v5029_v4 }
0x1886   : > { %v6249_v25 = vpop.eup %6248 }
0x1887   : > { %v5032_v12 = vadd.f32 1.0, %v6249_v25 }
0x1888   : > { %v6251_v15 = vpop.eup %6250 }
0x1889   : > { %v5033_v22 = vadd.f32 1.0, %v6251_v15  ;;  %v5034_v23 = vmul.f32 %v5032_v12, %v5018_v47 }
0x188b   : > { %v5035_v13 = vmul.f32 %v5033_v22, %v5019_v16 }
0x188d   : > { %v5036_v50 = vpack.c.bf16 %v5035_v13, %v5034_v23 }
0x188f   : > { %5951 = vmatmul.mubr.msk.bf16.vlgmr.msra.gmra.mrb[72].mxu1 %vm5073_vm1, %v5036_v50 }
0x1962   : > { %v5111_v10 = vpop.f32.mrb[72].mxu1 }
0x1963   : > { %v5112_v17 = vadd.f32 %v5111_v10, %v5048_v30  ;;  %v5952_v31 = vpop.f32.mrb[73].mxu1 }
0x1964   : > { %v5114_v32 = vpop.f32.mrb[74].mxu1 }
0x1965   : > { %v5118_v34 = vadd.f32 %v5112_v17, %v4948_v37  ;;  %v5115_v36 = vadd.f32 %v5114_v32, %v5048_v30  ;;  %v5953_v26 = vpop.f32.mrb[75].mxu1  ;;  %v5149_v37 = vrot.slane %v8097_v53, %v2903_v57 }
0x1967   : > { %v5119_v40 = vadd.f32 %v5115_v36, %v4949_v43  ;;  %v5120_v61 = vsel %vm942_vm2, %v5118_v34, 0.0 }
0x1968   : > { %5121 = vadd.xlane.f32.xlu0 %v5120_v61 }
0x1969   : > { %v5123_v42 = vsel %vm942_vm2, %v5119_v40, 0.0 }
0x196a   : > { %5124 = vadd.xlane.f32.xlu1 %v5123_v42 }
0x19f5   : > { %v5122_v44 = vpop.xlane.xlu0 %5121 }
0x19f6   : > { %v5126_v21 = vmul.f32 0.03125, %v5122_v44 }
0x19f7   : > { %v5125_v19 = vpop.xlane.xlu1 %5124 }
0x19f8   : > { %v5128_v48 = vsub.f32 %v5118_v34, %v5126_v21  ;;  %v5127_v51 = vmul.f32 0.03125, %v5125_v19 }
0x19fa   : > { %v5129_v55 = vsub.f32 %v5119_v40, %v5127_v51  ;;  %v5130_v3 = vmul.f32 %v5128_v48, %v5128_v48 }
0x19fc   : > { %v5132_v52 = vsel %vm942_vm2, %v5130_v3, 0.0  ;;  %v5131_v62 = vmul.f32 %v5129_v55, %v5129_v55 }
0x19fd   : > { %5133 = vadd.xlane.f32.xlu0 %v5132_v52 }
0x19fe   : > { %v5135_v58 = vsel %vm942_vm2, %v5131_v62, 0.0 }
0x19ff   : > { %5136 = vadd.xlane.f32.xlu1 %v5135_v58 }
0x1a8a   : > { %v5134_v54 = vpop.xlane.xlu0 %5133 }
0x1a8b   : > { %v5138_v24 = vmul.f32 0.03125, %v5134_v54 }
0x1a8c   : > { %v5137_v56 = vpop.xlane.xlu1 %5136 }
0x1a8d   : > { %v5140_v20 = vadd.f32 1e-05, %v5138_v24  ;;  %v5139_v41 = vmul.f32 0.03125, %v5137_v56 }
0x1a8f   : > { %6252 = vrsqrt.f32 %v5140_v20  ;;  %v5141_v35 = vadd.f32 1e-05, %v5139_v41 }
0x1a91   : > { %6254 = vrsqrt.f32 %v5141_v35 }
0x1a99   : > { %v6253_v43 = vpop.eup %6252 }
0x1a9a   : > { %v5144_v14 = vmul.f32 %v6253_v43, %v5128_v48 }
0x1a9b   : > { %v6255_v33 = vpop.eup %6254 }
0x1a9c   : > { %v5150_v49 = vmul.f32 %v5149_v37, %v5144_v14  ;;  %v5145_v46 = vmul.f32 %v6255_v33, %v5129_v55  ;;  %5163 = sbr.rel (%p5601_p9) target bundleno = 6819 (0x1aa3), region = 140 }
0x1a9e   : > { %v5156_v60 = vadd.f32 %v5155_v63, %v5150_v49  ;;  %v5151_v18 = vmul.f32 %v5149_v37, %v5145_v46 }
0x1aa0   : > { %5158 = vst.msk [vmem:[#allocation2] sm:$0xff] %vm942_vm2, %v5156_v60  ;;  %v5157_v27 = vadd.f32 %v5155_v63, %v5151_v18  ;;  %5164 = vst.msk [vmem:[#allocation26] sm:$0xff] (!%p5601_p9), %vm942_vm2, %v5156_v60 }
0x1aa2   : > { %5159 = vst.msk [vmem:[#allocation2 + $0x8] sm:$0xff] %vm942_vm2, %v5157_v27  ;;  %5165 = vst.msk [vmem:[#allocation26 + $0x8] sm:$0xff] (!%p5601_p9), %vm942_vm2, %v5157_v27 }
0x1aa3 PF: > { %s8286_s1 = sld [smem:[#allocation40_spill]]  ;;  %s6813_s20 = smov [#allocation26]  }
0x1aa4   : > { %s5175_s23 = sshll.u32 %s6813_s20, 4  ;;  %s5176_s23 = int_to_ptr.vmem [resolvable:$true] %s5175_s23 }
0x1aa5   : > { %s6670_s27 = scalar_lea.vmem %s5176_s23, 256  ;;  %p6677_p6 = scmp.lt.s32.totalorder %s5176_s23, %s5176_s23 }
0x1aa6   : > { %p6671_p2 = scmp.ne.s32.totalorder %s5176_s23, %s6670_s27  ;;  %p6678_p3 = scmp.lt.s32.totalorder %s6670_s27, %s6670_s27 }
0x1aa8   : > { %p6679_p4 = por %p6678_p3, %p6677_p6 }
0x1aa9   : > { %p6051_p12 = scmp.eq.s32.totalorder %s8286_s1, 1 }
0x1aab   : > { %p6672_p8 = pnand %p6671_p2, %p6051_p12 }
0x1aad   : > { %p6673_p10 = pneg %p6672_p8 }
0x1aaf   : > { %p6680_p5 = pnand %p6679_p4, %p6673_p10 }
0x1ab1   : > { %6683 = shalt.err (!%p6680_p5)
}
0x1ab2   : > { %s8287_s14 = sld [smem:[#allocation51_spill]] }
0x1ab8   : > { %s6684_s15 = scalar_lea.hbm %s8287_s14, 256 }
0x1ab9   : > { %p6685_p11 = scmp.ne.s32.totalorder %s8287_s14, %s6684_s15  ;;  %p6690_p0 = scmp.lt.u32.totalorder %s6684_s15, %s8287_s14 }
0x1abb   : > { %p6686_p13 = pnand %p6685_p11, %p6051_p12 }
0x1abd   : > { %p6687_p1 = pneg %p6686_p13 }
0x1abf   : > { %p6692_p7 = pnand %p6690_p0, %p6687_p1 }
0x1ac1   : > { %6695 = shalt.err (!%p6692_p7)
}
0x1ac2   : > { %s6814_s21 = smov 128  }
0x1ac3   : > { %5993 = dma.vmem_to_hbm [thread:$0]  (%p6051_p12), %s5176_s23, 256, %s8287_s14, [#allocation5], %s6814_s21, %s6814_s21, %s6811_s5  }
0x1ac4   : > { %6753 = dma.done.wait (%p6051_p12), [#allocation5], 256  }
0x1ac5   : > { %6755 = vsyncadd (%p6051_p12), [#allocation5], 4294967040 }
0x1ac6 PF: > { %s8288_s30 = sld [smem:[#allocation39_spill]]  ;;  %s8289_s29 = sld [smem:[#allocation36_spill]] }
0x1ac7   : > { %s8291_s15 = sld [smem:[#allocation44_spill]]  ;;  %s8292_s28 = sld [smem:[#allocation43_spill]] }
0x1ac8   : > { %s8293_s16 = smov %s6774_s17 }
0x1acc   : > { %s43_s18 = sadd.s32 1, %s8288_s30   ;;  %s8290_s30 = sld [smem:[#allocation37_spill]] }
0x1acd   : > { %p40_p9 = scmp.ge.s32.totalorder %s43_s18, 4   ;;  %s8294_s17 = smov %s8292_s28 }
0x1acf   :  { %42 = sbr.rel (!%p40_p9) target bundleno = 24 (0x18), region = 243 }
0x1ad6   :  { %5191 = vsyncpa [#allocation4], 1 }
0x1ad7   :  { %5193 = vsyncpa [#allocation4 + $0x1], 1 }
0x1ad8   :  { %5194 = vsyncpa [#allocation7], 1 }
0x1ad9   :  { %5195 = vsyncpa [#allocation10], 1 }
0x1ada   :  { %5196 = vsyncpa [#allocation13], 1 }
0x1adb   :  { %5198 = vsyncpa [#allocation13 + $0x1], 1 }
0x1adc   :  { %5199 = vsyncpa [#allocation16], 1 }
0x1add   :  { %5201 = vsyncpa [#allocation16 + $0x1], 1 }
0x1ade   :  { %5202 = vsyncpa [#allocation19], 1 }
0x1adf   :  { %5204 = vsyncpa [#allocation19 + $0x1], 1 }
0x1ae0   :  { %5205 = vsyncpa [#allocation22], 1 }
0x1ae1   :  { %5207 = vsyncpa [#allocation22 + $0x1], 1 }
0x1ae2   :  { %5208 = vsyncpa [#allocation25], 1 }
0x1ae3   :  { %5210 = vsyncpa [#allocation25 + $0x1], 1 }
0x1ae4   :  { %5211 = vsyncpa [#allocation5], 1 }
0x1ae5   :  { %5213 = vsyncpa [#allocation5 + $0x1], 1 }

</bundles_post_ra>
